<compile_context>
chip_gen: v7x
topology: tpu7x:2x2x1
jax: 0.10.0
libtpu: 0.0.40
codegen_flags: <defaults>
</compile_context>

<pallas_src>
import jax
import jax.numpy as jnp
from jax.experimental import pallas as pl
from jax.experimental.pallas import tpu as pltpu

BN_EPS = 1e-5
VMEM_LIMIT_BYTES = 32 * 1024 * 1024  # explicit scoped-VMEM budget (safe on v5e..v7x)


# ----------------------------- kernels --------------------------------------


def _partial_stats(z):
    """(TB, F) f32 -> (2, F) [sum; sum-of-squares] for this batch tile."""
    return jnp.concatenate(
        [jnp.sum(z, axis=0, keepdims=True),
         jnp.sum(z * z, axis=0, keepdims=True)], axis=0)


def _stage1_kernel(xI_ref, wI_ref, zI_ref, pstats_ref):
    # zI = xI @ wI  (cast to bf16 inside the kernel; f32 MXU accumulation)
    z = jnp.dot(xI_ref[...].astype(jnp.bfloat16), wI_ref[...],
                preferred_element_type=jnp.float32)
    zI_ref[...] = z
    pstats_ref[...] = _partial_stats(z).reshape(pstats_ref.shape)


def _stage2_kernel(zI_ref, ss_ref, wL_ref, hI_ref, zL_ref, pstats_ref):
    # hI = relu(zI * scaleI + shiftI);  zL = hI @ wL
    hI = jnp.maximum(zI_ref[...] * ss_ref[0:1, :] + ss_ref[1:2, :], 0.0)
    hI_bf = hI.astype(jnp.bfloat16)
    hI_ref[...] = hI_bf
    zL = jnp.dot(hI_bf, wL_ref[...], preferred_element_type=jnp.float32)
    zL_ref[...] = zL
    pstats_ref[...] = _partial_stats(zL).reshape(pstats_ref.shape)


def _stage3_kernel(hI_ref, zL_ref, ss_ref, wF_ref, zF_ref, pstats_ref):
    # hL = relu(zL * scaleL + shiftL);  zF = hI @ wF[:half] + hL @ wF[half:]
    half = hI_ref.shape[1]
    hL = jnp.maximum(zL_ref[...] * ss_ref[0:1, :] + ss_ref[1:2, :], 0.0)
    zF = jnp.dot(hI_ref[...], wF_ref[0:half, :],
                 preferred_element_type=jnp.float32)
    zF = zF + jnp.dot(hL.astype(jnp.bfloat16), wF_ref[half:2 * half, :],
                      preferred_element_type=jnp.float32)
    # Stats computed from the f32 accumulator BEFORE the bf16 store.
    pstats_ref[...] = _partial_stats(zF).reshape(pstats_ref.shape)
    zF_ref[...] = zF.astype(zF_ref.dtype)


def _stage4_kernel(zF_ref, ss_ref, out_ref):
    y = zF_ref[...].astype(jnp.float32) * ss_ref[0:1, :] + ss_ref[1:2, :]
    out_ref[...] = jnp.maximum(y, 0.0).astype(out_ref.dtype)


# ----------------------------- wrapper ---------------------------------------


def _resident(shape):
    """Full-array block with a constant index_map -> DMA'd once, VMEM-resident."""
    nd = len(shape)
    return pl.BlockSpec(shape, lambda i, _nd=nd: (0,) * _nd)


def _fold_bn(pstats, gamma, beta, batch):
    """Per-tile [sum; sumsq] -> per-feature (2, F) [scale; shift] (tiny O(F) op)."""
    stats = jnp.sum(pstats, axis=0)                       # (2, F)
    mean = stats[0] / batch
    var = jnp.maximum(stats[1] / batch - mean * mean, 0.0)  # biased var, clamp cancellation
    scale = gamma * jax.lax.rsqrt(var + BN_EPS)
    shift = beta - mean * scale
    return jnp.stack([scale, shift], axis=0)              # (2, F) f32


def catfusion_forward(xI, xL, params, *, tb=256, out_dtype=jnp.bfloat16):
    # xL is accepted for interface parity but -- exactly like the original
    # PyTorch forward -- never used (fcL is applied to fcI's output).
    B, nf = xI.shape
    half = nf // 2
    assert half % 128 == 0, "nFeature//2 must be a multiple of 128 (lane-dense tiles)"
    assert xL.shape[1] == half, "laserDim must equal nFeature // 2"
    del xL

    tb = min(tb, B)
    assert B % tb == 0, "batch must be divisible by the batch tile TB"
    nt = B // tb

    wI, wL, wF = params["wI"], params["wL"], params["wF"]
    cparams = pltpu.CompilerParams(dimension_semantics=("parallel",),
                                   vmem_limit_bytes=VMEM_LIMIT_BYTES)

    tile = lambda f: pl.BlockSpec((tb, f), lambda i: (i, 0))
    stats_spec = lambda f: pl.BlockSpec((1, 2, f), lambda i: (i, 0, 0))
    stats_shape = lambda f: jax.ShapeDtypeStruct((nt, 2, f), jnp.float32)

    # --- stage 1: zI = xI @ wI, per-tile stats of zI --------------------------
    zI, psI = pl.pallas_call(
        _stage1_kernel,
        grid=(nt,),
        in_specs=[tile(nf), _resident((nf, half))],
        out_specs=[tile(half), stats_spec(half)],
        out_shape=(jax.ShapeDtypeStruct((B, half), jnp.float32), stats_shape(half)),
        compiler_params=cparams,
        cost_estimate=pl.CostEstimate(
            flops=2 * B * nf * half, transcendentals=0,
            bytes_accessed=4 * B * nf + 2 * nf * half + 4 * B * half + 4 * nt * 2 * half),
    )(xI, wI)
    ssI = _fold_bn(psI, params["gI"], params["bI"], B)

    # --- stage 2: hI = bn_relu(zI); zL = hI @ wL, per-tile stats of zL --------
    hI, zL, psL = pl.pallas_call(
        _stage2_kernel,
        grid=(nt,),
        in_specs=[tile(half), _resident((2, half)), _resident((half, half))],
        out_specs=[tile(half), tile(half), stats_spec(half)],
        out_shape=(jax.ShapeDtypeStruct((B, half), jnp.bfloat16),
                   jax.ShapeDtypeStruct((B, half), jnp.float32),
                   stats_shape(half)),
        compiler_params=cparams,
        cost_estimate=pl.CostEstimate(
            flops=2 * B * half * half, transcendentals=0,
            bytes_accessed=4 * B * half + 2 * half * half + 2 * B * half
            + 4 * B * half + 4 * nt * 2 * half),
    )(zI, ssI, wL)
    ssL = _fold_bn(psL, params["gL"], params["bL"], B)

    # --- stage 3: hL = bn_relu(zL); zF = hI@wF_top + hL@wF_bot, stats of zF ---
    zF, psF = pl.pallas_call(
        _stage3_kernel,
        grid=(nt,),
        in_specs=[tile(half), tile(half), _resident((2, half)), _resident((nf, nf))],
        out_specs=[tile(nf), stats_spec(nf)],
        out_shape=(jax.ShapeDtypeStruct((B, nf), jnp.bfloat16), stats_shape(nf)),
        compiler_params=cparams,
        cost_estimate=pl.CostEstimate(
            flops=2 * B * nf * nf, transcendentals=0,
            bytes_accessed=2 * B * half + 4 * B * half + 2 * nf * nf
            + 2 * B * nf + 4 * nt * 2 * nf),
    )(hI, zL, ssL, wF)
    ssF = _fold_bn(psF, params["gF"], params["bF"], B)

    # --- stage 4: out = bn_relu(zF) -------------------------------------------
    out = pl.pallas_call(
        _stage4_kernel,
        grid=(nt,),
        in_specs=[tile(nf), _resident((2, nf))],
        out_specs=tile(nf),
        out_shape=jax.ShapeDtypeStruct((B, nf), out_dtype),
        compiler_params=cparams,
        cost_estimate=pl.CostEstimate(
            flops=3 * B * nf, transcendentals=0,
            bytes_accessed=2 * B * nf + 2 * 4 * nf
            + B * nf * jnp.dtype(out_dtype).itemsize),
    )(zF, ssF)
    return out


# ----------------------------- params / reference ----------------------------


def init_params(key, nf, nl):
    """PyTorch-style Linear init (weights only; biases cancel under train-mode BN),
    BN gamma=1 / beta=0.  Weights stored (in, out) in bf16 for the MXU."""
    half = nf // 2
    assert nl == half, "laserDim must equal nFeature // 2"

    def linear_w(k, fan_in, fan_out):
        bound = 1.0 / (fan_in ** 0.5)
        return jax.random.uniform(k, (fan_in, fan_out), jnp.float32, -bound, bound)

    kI, kL, kF = jax.random.split(key, 3)
    return {
        "wI": linear_w(kI, nf, half).astype(jnp.bfloat16),
        "wL": linear_w(kL, nl, half).astype(jnp.bfloat16),
        "wF": linear_w(kF, nf, nf).astype(jnp.bfloat16),
        "gI": jnp.ones((half,), jnp.float32), "bI": jnp.zeros((half,), jnp.float32),
        "gL": jnp.ones((half,), jnp.float32), "bL": jnp.zeros((half,), jnp.float32),
        "gF": jnp.ones((nf,), jnp.float32),  "bF": jnp.zeros((nf,), jnp.float32),
    }


def catfusion_reference(xI, params):
    """Pure-JAX f32 reference of the original forward (same params)."""
    def bn_relu(x, g, b):
        m = jnp.mean(x, axis=0, keepdims=True)
        v = jnp.mean((x - m) ** 2, axis=0, keepdims=True)
        return jnp.maximum((x - m) * jax.lax.rsqrt(v + BN_EPS) * g + b, 0.0)

    wI = params["wI"].astype(jnp.float32)
    wL = params["wL"].astype(jnp.float32)
    wF = params["wF"].astype(jnp.float32)
    hI = bn_relu(xI @ wI, params["gI"], params["bI"])
    hL = bn_relu(hI @ wL, params["gL"], params["bL"])
    return bn_relu(jnp.concatenate([hI, hL], axis=1) @ wF, params["gF"], params["bF"])


# ----------------------------- demo -------------------------------------------


if __name__ == "__main__":
    # Lane-dense small shapes that still exercise the batch grid:
    # nFeature=256 (half=128 lanes), laserDim=128, batch=1024 with TB=256 -> 4 tiles.
    B, NF, NL, TB = 1024, 256, 128, 256

    key = jax.random.PRNGKey(0)
    k_params, k_xI, k_xL = jax.random.split(key, 3)
    params = init_params(k_params, NF, NL)
    xI = jax.random.normal(k_xI, (B, NF), jnp.float32)
    xL = jax.random.normal(k_xL, (B, NL), jnp.float32)

    fwd = jax.jit(lambda a, b, p: catfusion_forward(a, b, p, tb=TB))
    out = fwd(xI, xL, params)
    jax.block_until_ready(out)

    assert out.shape == (B, NF) and out.dtype == jnp.bfloat16
    assert bool(jnp.all(jnp.isfinite(out)))

    # Loose tolerance: bf16 weights/activations vs. the f32 reference.
    ref = catfusion_reference(xI, params)
    max_err = float(jnp.max(jnp.abs(out.astype(jnp.float32) - ref)))
    assert max_err < 0.5, f"kernel deviates from reference: max_err={max_err}"

    print("KERNEL_OK")
</pallas_src>

<mosaic_0001>
module attributes {stable_mosaic.version = 11 : i64} {
  func.func @_stage1_kernel(%arg0: i32, %arg1: memref<256x256xf32, #tpu.memory_space<vmem>>, %arg2: memref<256x128xbf16, #tpu.memory_space<vmem>>, %arg3: memref<256x128xf32, #tpu.memory_space<vmem>>, %arg4: memref<1x2x128xf32, #tpu.memory_space<vmem>>) attributes {dimension_semantics = [#tpu.dimension_semantics<parallel>], iteration_bounds = array<i64: 4>, scalar_prefetch = 0 : i64, scratch_operands = 0 : i64, tpu.core_type = #tpu.core_type<tc>, window_params = [{transform_indices = @transform_0, window_bounds = array<i64: 256, 256>}, {pipeline_mode = #tpu.pipeline_mode<synchronous>, transform_indices = @transform_1, window_bounds = array<i64: 256, 128>}, {transform_indices = @transform_2, window_bounds = array<i64: 256, 128>}, {transform_indices = @transform_3, window_bounds = array<i64: 1, 2, 128>}]} {
    %c0 = arith.constant 0 : index
    %c0_0 = arith.constant 0 : index
    %0 = vector.load %arg1[%c0, %c0_0] : memref<256x256xf32, #tpu.memory_space<vmem>>, vector<256x256xf32>
    %1 = arith.truncf %0 : vector<256x256xf32> to vector<256x256xbf16>
    %c0_1 = arith.constant 0 : index
    %c0_2 = arith.constant 0 : index
    %2 = vector.load %arg2[%c0_1, %c0_2] : memref<256x128xbf16, #tpu.memory_space<vmem>>, vector<256x128xbf16>
    %cst = arith.constant dense<0.000000e+00> : vector<256x128xf32>
    %3 = tpu.matmul %1, %2, %cst {dimension_numbers = #tpu.dot_dimension_numbers<[1], [0], [0], [1], [0, 0, 1, 1], [], []>} : vector<256x256xbf16>, vector<256x128xbf16>, vector<256x128xf32> -> vector<256x128xf32>
    %c0_3 = arith.constant 0 : index
    %c0_4 = arith.constant 0 : index
    %4 = vector.load %arg3[%c0_3, %c0_4] : memref<256x128xf32, #tpu.memory_space<vmem>>, vector<256x128xf32>
    tpu.vector_store %arg3[%c0_3, %c0_4], %3 {strides = array<i32>} : memref<256x128xf32, #tpu.memory_space<vmem>>, vector<256x128xf32>,
    %cst_5 = arith.constant dense<0.000000e+00> : vector<128xf32>
    %5 = vector.multi_reduction <add>, %3, %cst_5 [0] : vector<256x128xf32> to vector<128xf32>
    %6 = vector.shape_cast %5 : vector<128xf32> to vector<1x128xf32>
    %7 = arith.mulf %3, %3 : vector<256x128xf32>
    %cst_6 = arith.constant dense<0.000000e+00> : vector<128xf32>
    %8 = vector.multi_reduction <add>, %7, %cst_6 [0] : vector<256x128xf32> to vector<128xf32>
    %9 = vector.shape_cast %8 : vector<128xf32> to vector<1x128xf32>
    %10 = tpu.concatenate %6, %9 in 0 : vector<1x128xf32>, vector<1x128xf32> -> vector<2x128xf32>
    %11 = vector.shape_cast %10 : vector<2x128xf32> to vector<1x2x128xf32>
    %c0_7 = arith.constant 0 : index
    %c0_8 = arith.constant 0 : index
    %c0_9 = arith.constant 0 : index
    %12 = vector.load %arg4[%c0_7, %c0_8, %c0_9] : memref<1x2x128xf32, #tpu.memory_space<vmem>>, vector<1x2x128xf32>
    tpu.vector_store %arg4[%c0_7, %c0_8, %c0_9], %11 {strides = array<i32>} : memref<1x2x128xf32, #tpu.memory_space<vmem>>, vector<1x2x128xf32>,
    return
  }
  func.func @transform_0(%arg0: i32) -> (i32, i32) {
    %c0_i32 = arith.constant 0 : i32
    %c0_i32_0 = arith.constant 0 : i32
    return %arg0, %c0_i32 : i32, i32
  }
  func.func @transform_1(%arg0: i32) -> (i32, i32) {
    %c0_i32 = arith.constant 0 : i32
    %c0_i32_0 = arith.constant 0 : i32
    %c0_i32_1 = arith.constant 0 : i32
    return %c0_i32, %c0_i32_0 : i32, i32
  }
  func.func @transform_2(%arg0: i32) -> (i32, i32) {
    %c0_i32 = arith.constant 0 : i32
    %c0_i32_0 = arith.constant 0 : i32
    return %arg0, %c0_i32 : i32, i32
  }
  func.func @transform_3(%arg0: i32) -> (i32, i32, i32) {
    %c0_i32 = arith.constant 0 : i32
    %c0_i32_0 = arith.constant 0 : i32
    %c0_i32_1 = arith.constant 0 : i32
    return %arg0, %c0_i32, %c0_i32_0 : i32, i32, i32
  }
}

module attributes {stable_mosaic.version = 11 : i64} {
  func.func @_stage3_kernel(%arg0: i32, %arg1: memref<256x128xbf16, #tpu.memory_space<vmem>>, %arg2: memref<256x128xf32, #tpu.memory_space<vmem>>, %arg3: memref<2x128xf32, #tpu.memory_space<vmem>>, %arg4: memref<256x256xbf16, #tpu.memory_space<vmem>>, %arg5: memref<256x256xbf16, #tpu.memory_space<vmem>>, %arg6: memref<1x2x256xf32, #tpu.memory_space<vmem>>) attributes {dimension_semantics = [#tpu.dimension_semantics<parallel>], iteration_bounds = array<i64: 4>, scalar_prefetch = 0 : i64, scratch_operands = 0 : i64, tpu.core_type = #tpu.core_type<tc>, window_params = [{transform_indices = @transform_0, window_bounds = array<i64: 256, 128>}, {transform_indices = @transform_1, window_bounds = array<i64: 256, 128>}, {pipeline_mode = #tpu.pipeline_mode<synchronous>, transform_indices = @transform_2, window_bounds = array<i64: 2, 128>}, {pipeline_mode = #tpu.pipeline_mode<synchronous>, transform_indices = @transform_3, window_bounds = array<i64: 256, 256>}, {transform_indices = @transform_4, window_bounds = array<i64: 256, 256>}, {transform_indices = @transform_5, window_bounds = array<i64: 1, 2, 256>}]} {
    %c0 = arith.constant 0 : index
    %c0_0 = arith.constant 0 : index
    %0 = vector.load %arg2[%c0, %c0_0] : memref<256x128xf32, #tpu.memory_space<vmem>>, vector<256x128xf32>
    %c0_1 = arith.constant 0 : index
    %c0_2 = arith.constant 0 : index
    %1 = vector.load %arg3[%c0_1, %c0_2] : memref<2x128xf32, #tpu.memory_space<vmem>>, vector<1x128xf32>
    %2 = vector.broadcast %1 : vector<1x128xf32> to vector<256x128xf32>
    %3 = arith.mulf %0, %2 : vector<256x128xf32>
    %c1 = arith.constant 1 : index
    %c0_3 = arith.constant 0 : index
    %4 = vector.load %arg3[%c1, %c0_3] : memref<2x128xf32, #tpu.memory_space<vmem>>, vector<1x128xf32>
    %5 = vector.broadcast %4 : vector<1x128xf32> to vector<256x128xf32>
    %6 = arith.addf %3, %5 : vector<256x128xf32>
    %cst = arith.constant 0.000000e+00 : f32
    %7 = vector.broadcast %cst : f32 to vector<256x128xf32>
    %8 = arith.maximumf %6, %7 : vector<256x128xf32>
    %c0_4 = arith.constant 0 : index
    %c0_5 = arith.constant 0 : index
    %9 = vector.load %arg1[%c0_4, %c0_5] : memref<256x128xbf16, #tpu.memory_space<vmem>>, vector<256x128xbf16>
    %c0_6 = arith.constant 0 : index
    %c0_7 = arith.constant 0 : index
    %10 = vector.load %arg4[%c0_6, %c0_7] : memref<256x256xbf16, #tpu.memory_space<vmem>>, vector<128x256xbf16>
    %cst_8 = arith.constant dense<0.000000e+00> : vector<256x256xf32>
    %11 = tpu.matmul %9, %10, %cst_8 {dimension_numbers = #tpu.dot_dimension_numbers<[1], [0], [0], [1], [0, 0, 1, 1], [], []>} : vector<256x128xbf16>, vector<128x256xbf16>, vector<256x256xf32> -> vector<256x256xf32>
    %12 = arith.truncf %8 : vector<256x128xf32> to vector<256x128xbf16>
    %c128 = arith.constant 128 : index
    %c0_9 = arith.constant 0 : index
    %13 = vector.load %arg4[%c128, %c0_9] : memref<256x256xbf16, #tpu.memory_space<vmem>>, vector<128x256xbf16>
    %cst_10 = arith.constant dense<0.000000e+00> : vector<256x256xf32>
    %14 = tpu.matmul %12, %13, %cst_10 {dimension_numbers = #tpu.dot_dimension_numbers<[1], [0], [0], [1], [0, 0, 1, 1], [], []>} : vector<256x128xbf16>, vector<128x256xbf16>, vector<256x256xf32> -> vector<256x256xf32>
    %15 = arith.addf %11, %14 : vector<256x256xf32>
    %cst_11 = arith.constant dense<0.000000e+00> : vector<256xf32>
    %16 = vector.multi_reduction <add>, %15, %cst_11 [0] : vector<256x256xf32> to vector<256xf32>
    %17 = vector.shape_cast %16 : vector<256xf32> to vector<1x256xf32>
    %18 = arith.mulf %15, %15 : vector<256x256xf32>
    %cst_12 = arith.constant dense<0.000000e+00> : vector<256xf32>
    %19 = vector.multi_reduction <add>, %18, %cst_12 [0] : vector<256x256xf32> to vector<256xf32>
    %20 = vector.shape_cast %19 : vector<256xf32> to vector<1x256xf32>
    %21 = tpu.concatenate %17, %20 in 0 : vector<1x256xf32>, vector<1x256xf32> -> vector<2x256xf32>
    %22 = vector.shape_cast %21 : vector<2x256xf32> to vector<1x2x256xf32>
    %c0_13 = arith.constant 0 : index
    %c0_14 = arith.constant 0 : index
    %c0_15 = arith.constant 0 : index
    %23 = vector.load %arg6[%c0_13, %c0_14, %c0_15] : memref<1x2x256xf32, #tpu.memory_space<vmem>>, vector<1x2x256xf32>
    tpu.vector_store %arg6[%c0_13, %c0_14, %c0_15], %22 {strides = array<i32>} : memref<1x2x256xf32, #tpu.memory_space<vmem>>, vector<1x2x256xf32>,
    %24 = arith.truncf %15 : vector<256x256xf32> to vector<256x256xbf16>
    %c0_16 = arith.constant 0 : index
    %c0_17 = arith.constant 0 : index
    %25 = vector.load %arg5[%c0_16, %c0_17] : memref<256x256xbf16, #tpu.memory_space<vmem>>, vector<256x256xbf16>
    tpu.vector_store %arg5[%c0_16, %c0_17], %24 {strides = array<i32>} : memref<256x256xbf16, #tpu.memory_space<vmem>>, vector<256x256xbf16>,
    return
  }
  func.func @transform_0(%arg0: i32) -> (i32, i32) {
    %c0_i32 = arith.constant 0 : i32
    %c0_i32_0 = arith.constant 0 : i32
    return %arg0, %c0_i32 : i32, i32
  }
  func.func @transform_1(%arg0: i32) -> (i32, i32) {
    %c0_i32 = arith.constant 0 : i32
    %c0_i32_0 = arith.constant 0 : i32
    return %arg0, %c0_i32 : i32, i32
  }
  func.func @transform_2(%arg0: i32) -> (i32, i32) {
    %c0_i32 = arith.constant 0 : i32
    %c0_i32_0 = arith.constant 0 : i32
    %c0_i32_1 = arith.constant 0 : i32
    return %c0_i32, %c0_i32_0 : i32, i32
  }
  func.func @transform_3(%arg0: i32) -> (i32, i32) {
    %c0_i32 = arith.constant 0 : i32
    %c0_i32_0 = arith.constant 0 : i32
    %c0_i32_1 = arith.constant 0 : i32
    return %c0_i32, %c0_i32_0 : i32, i32
  }
  func.func @transform_4(%arg0: i32) -> (i32, i32) {
    %c0_i32 = arith.constant 0 : i32
    %c0_i32_0 = arith.constant 0 : i32
    return %arg0, %c0_i32 : i32, i32
  }
  func.func @transform_5(%arg0: i32) -> (i32, i32, i32) {
    %c0_i32 = arith.constant 0 : i32
    %c0_i32_0 = arith.constant 0 : i32
    %c0_i32_1 = arith.constant 0 : i32
    return %arg0, %c0_i32, %c0_i32_0 : i32, i32, i32
  }
}

module attributes {stable_mosaic.version = 11 : i64} {
  func.func @_stage2_kernel(%arg0: i32, %arg1: memref<256x128xf32, #tpu.memory_space<vmem>>, %arg2: memref<2x128xf32, #tpu.memory_space<vmem>>, %arg3: memref<128x128xbf16, #tpu.memory_space<vmem>>, %arg4: memref<256x128xbf16, #tpu.memory_space<vmem>>, %arg5: memref<256x128xf32, #tpu.memory_space<vmem>>, %arg6: memref<1x2x128xf32, #tpu.memory_space<vmem>>) attributes {dimension_semantics = [#tpu.dimension_semantics<parallel>], iteration_bounds = array<i64: 4>, scalar_prefetch = 0 : i64, scratch_operands = 0 : i64, tpu.core_type = #tpu.core_type<tc>, window_params = [{transform_indices = @transform_0, window_bounds = array<i64: 256, 128>}, {pipeline_mode = #tpu.pipeline_mode<synchronous>, transform_indices = @transform_1, window_bounds = array<i64: 2, 128>}, {pipeline_mode = #tpu.pipeline_mode<synchronous>, transform_indices = @transform_2, window_bounds = array<i64: 128, 128>}, {transform_indices = @transform_3, window_bounds = array<i64: 256, 128>}, {transform_indices = @transform_4, window_bounds = array<i64: 256, 128>}, {transform_indices = @transform_5, window_bounds = array<i64: 1, 2, 128>}]} {
    %c0 = arith.constant 0 : index
    %c0_0 = arith.constant 0 : index
    %0 = vector.load %arg1[%c0, %c0_0] : memref<256x128xf32, #tpu.memory_space<vmem>>, vector<256x128xf32>
    %c0_1 = arith.constant 0 : index
    %c0_2 = arith.constant 0 : index
    %1 = vector.load %arg2[%c0_1, %c0_2] : memref<2x128xf32, #tpu.memory_space<vmem>>, vector<1x128xf32>
    %2 = vector.broadcast %1 : vector<1x128xf32> to vector<256x128xf32>
    %3 = arith.mulf %0, %2 : vector<256x128xf32>
    %c1 = arith.constant 1 : index
    %c0_3 = arith.constant 0 : index
    %4 = vector.load %arg2[%c1, %c0_3] : memref<2x128xf32, #tpu.memory_space<vmem>>, vector<1x128xf32>
    %5 = vector.broadcast %4 : vector<1x128xf32> to vector<256x128xf32>
    %6 = arith.addf %3, %5 : vector<256x128xf32>
    %cst = arith.constant 0.000000e+00 : f32
    %7 = vector.broadcast %cst : f32 to vector<256x128xf32>
    %8 = arith.maximumf %6, %7 : vector<256x128xf32>
    %9 = arith.truncf %8 : vector<256x128xf32> to vector<256x128xbf16>
    %c0_4 = arith.constant 0 : index
    %c0_5 = arith.constant 0 : index
    %10 = vector.load %arg4[%c0_4, %c0_5] : memref<256x128xbf16, #tpu.memory_space<vmem>>, vector<256x128xbf16>
    tpu.vector_store %arg4[%c0_4, %c0_5], %9 {strides = array<i32>} : memref<256x128xbf16, #tpu.memory_space<vmem>>, vector<256x128xbf16>,
    %c0_6 = arith.constant 0 : index
    %c0_7 = arith.constant 0 : index
    %11 = vector.load %arg3[%c0_6, %c0_7] : memref<128x128xbf16, #tpu.memory_space<vmem>>, vector<128x128xbf16>
    %cst_8 = arith.constant dense<0.000000e+00> : vector<256x128xf32>
    %12 = tpu.matmul %9, %11, %cst_8 {dimension_numbers = #tpu.dot_dimension_numbers<[1], [0], [0], [1], [0, 0, 1, 1], [], []>} : vector<256x128xbf16>, vector<128x128xbf16>, vector<256x128xf32> -> vector<256x128xf32>
    %c0_9 = arith.constant 0 : index
    %c0_10 = arith.constant 0 : index
    %13 = vector.load %arg5[%c0_9, %c0_10] : memref<256x128xf32, #tpu.memory_space<vmem>>, vector<256x128xf32>
    tpu.vector_store %arg5[%c0_9, %c0_10], %12 {strides = array<i32>} : memref<256x128xf32, #tpu.memory_space<vmem>>, vector<256x128xf32>,
    %cst_11 = arith.constant dense<0.000000e+00> : vector<128xf32>
    %14 = vector.multi_reduction <add>, %12, %cst_11 [0] : vector<256x128xf32> to vector<128xf32>
    %15 = vector.shape_cast %14 : vector<128xf32> to vector<1x128xf32>
    %16 = arith.mulf %12, %12 : vector<256x128xf32>
    %cst_12 = arith.constant dense<0.000000e+00> : vector<128xf32>
    %17 = vector.multi_reduction <add>, %16, %cst_12 [0] : vector<256x128xf32> to vector<128xf32>
    %18 = vector.shape_cast %17 : vector<128xf32> to vector<1x128xf32>
    %19 = tpu.concatenate %15, %18 in 0 : vector<1x128xf32>, vector<1x128xf32> -> vector<2x128xf32>
    %20 = vector.shape_cast %19 : vector<2x128xf32> to vector<1x2x128xf32>
    %c0_13 = arith.constant 0 : index
    %c0_14 = arith.constant 0 : index
    %c0_15 = arith.constant 0 : index
    %21 = vector.load %arg6[%c0_13, %c0_14, %c0_15] : memref<1x2x128xf32, #tpu.memory_space<vmem>>, vector<1x2x128xf32>
    tpu.vector_store %arg6[%c0_13, %c0_14, %c0_15], %20 {strides = array<i32>} : memref<1x2x128xf32, #tpu.memory_space<vmem>>, vector<1x2x128xf32>,
    return
  }
  func.func @transform_0(%arg0: i32) -> (i32, i32) {
    %c0_i32 = arith.constant 0 : i32
    %c0_i32_0 = arith.constant 0 : i32
    return %arg0, %c0_i32 : i32, i32
  }
  func.func @transform_1(%arg0: i32) -> (i32, i32) {
    %c0_i32 = arith.constant 0 : i32
    %c0_i32_0 = arith.constant 0 : i32
    %c0_i32_1 = arith.constant 0 : i32
    return %c0_i32, %c0_i32_0 : i32, i32
  }
  func.func @transform_2(%arg0: i32) -> (i32, i32) {
    %c0_i32 = arith.constant 0 : i32
    %c0_i32_0 = arith.constant 0 : i32
    %c0_i32_1 = arith.constant 0 : i32
    return %c0_i32, %c0_i32_0 : i32, i32
  }
  func.func @transform_3(%arg0: i32) -> (i32, i32) {
    %c0_i32 = arith.constant 0 : i32
    %c0_i32_0 = arith.constant 0 : i32
    return %arg0, %c0_i32 : i32, i32
  }
  func.func @transform_4(%arg0: i32) -> (i32, i32) {
    %c0_i32 = arith.constant 0 : i32
    %c0_i32_0 = arith.constant 0 : i32
    return %arg0, %c0_i32 : i32, i32
  }
  func.func @transform_5(%arg0: i32) -> (i32, i32, i32) {
    %c0_i32 = arith.constant 0 : i32
    %c0_i32_0 = arith.constant 0 : i32
    %c0_i32_1 = arith.constant 0 : i32
    return %arg0, %c0_i32, %c0_i32_0 : i32, i32, i32
  }
}

module attributes {stable_mosaic.version = 11 : i64} {
  func.func @_stage4_kernel(%arg0: i32, %arg1: memref<256x256xbf16, #tpu.memory_space<vmem>>, %arg2: memref<2x256xf32, #tpu.memory_space<vmem>>, %arg3: memref<256x256xbf16, #tpu.memory_space<vmem>>) attributes {dimension_semantics = [#tpu.dimension_semantics<parallel>], iteration_bounds = array<i64: 4>, scalar_prefetch = 0 : i64, scratch_operands = 0 : i64, tpu.core_type = #tpu.core_type<tc>, window_params = [{transform_indices = @transform_0, window_bounds = array<i64: 256, 256>}, {pipeline_mode = #tpu.pipeline_mode<synchronous>, transform_indices = @transform_1, window_bounds = array<i64: 2, 256>}, {transform_indices = @transform_2, window_bounds = array<i64: 256, 256>}]} {
    %c0 = arith.constant 0 : index
    %c0_0 = arith.constant 0 : index
    %0 = vector.load %arg1[%c0, %c0_0] : memref<256x256xbf16, #tpu.memory_space<vmem>>, vector<256x256xbf16>
    %1 = arith.extf %0 : vector<256x256xbf16> to vector<256x256xf32>
    %c0_1 = arith.constant 0 : index
    %c0_2 = arith.constant 0 : index
    %2 = vector.load %arg2[%c0_1, %c0_2] : memref<2x256xf32, #tpu.memory_space<vmem>>, vector<1x256xf32>
    %3 = vector.broadcast %2 : vector<1x256xf32> to vector<256x256xf32>
    %4 = arith.mulf %1, %3 : vector<256x256xf32>
    %c1 = arith.constant 1 : index
    %c0_3 = arith.constant 0 : index
    %5 = vector.load %arg2[%c1, %c0_3] : memref<2x256xf32, #tpu.memory_space<vmem>>, vector<1x256xf32>
    %6 = vector.broadcast %5 : vector<1x256xf32> to vector<256x256xf32>
    %7 = arith.addf %4, %6 : vector<256x256xf32>
    %cst = arith.constant 0.000000e+00 : f32
    %8 = vector.broadcast %cst : f32 to vector<256x256xf32>
    %9 = arith.maximumf %7, %8 : vector<256x256xf32>
    %10 = arith.truncf %9 : vector<256x256xf32> to vector<256x256xbf16>
    %c0_4 = arith.constant 0 : index
    %c0_5 = arith.constant 0 : index
    %11 = vector.load %arg3[%c0_4, %c0_5] : memref<256x256xbf16, #tpu.memory_space<vmem>>, vector<256x256xbf16>
    tpu.vector_store %arg3[%c0_4, %c0_5], %10 {strides = array<i32>} : memref<256x256xbf16, #tpu.memory_space<vmem>>, vector<256x256xbf16>,
    return
  }
  func.func @transform_0(%arg0: i32) -> (i32, i32) {
    %c0_i32 = arith.constant 0 : i32
    %c0_i32_0 = arith.constant 0 : i32
    return %arg0, %c0_i32 : i32, i32
  }
  func.func @transform_1(%arg0: i32) -> (i32, i32) {
    %c0_i32 = arith.constant 0 : i32
    %c0_i32_0 = arith.constant 0 : i32
    %c0_i32_1 = arith.constant 0 : i32
    return %c0_i32, %c0_i32_0 : i32, i32
  }
  func.func @transform_2(%arg0: i32) -> (i32, i32) {
    %c0_i32 = arith.constant 0 : i32
    %c0_i32_0 = arith.constant 0 : i32
    return %arg0, %c0_i32 : i32, i32
  }
}

</mosaic_0001>

<bundles_post_ra>
// kernel: _lambda_.4
= control target key start
LH: loop header
LB: loop body
LE: loop exit
PB: predicated region body
PF: predicated region fallthrough
CT: control target
= control target key end

     0   :  { %9 = vsyncpa [#allocation3], 0  ;;  %s1542_s0 = inlined_call_operand.hbm [shape: f32[1024,256], index: 0, kind: input, shape index: {}]   ;;  %s1543_s1 = inlined_call_operand.hbm [shape: bf16[256,128], index: 1, kind: input, shape index: {}]   ;;  %s1544_s2 = inlined_call_operand.vmem [shape: f32[1024,128], index: 2, kind: output, shape index: {0}]   ;;  %s1545_s3 = inlined_call_operand.vmem [shape: f32[4,2,128], index: 3, kind: output, shape index: {1}]  }
   0x1   :  { %11 = vsyncpa [#allocation3 + $0x1], 0 }
   0x2   :  { %12 = vsyncpa [#allocation5], 0  ;;  %s1212_s12 = smov 0   ;;  %s1214_s13 = smov 0  }
   0x3   :  { %s1216_s14 = smov 0   ;;  %s1218_s15 = smov 0  }
   0x4 LB: > { %s1231_s16 = sadd.s32 4294967295, %s1184_s15   ;;  %p38_p0 = scmp.ne.s32.totalorder %s1176_s13, %s1172_s12  ;;  %s1184_s15 = sphi %s1218_s15, %s1560_s15   ;;  %s1180_s14 = sphi %s1216_s14, %s1559_s14   ;;  %s1176_s13 = sphi %s1214_s13, %s1558_s13   ;;  %s1172_s12 = sphi %s1212_s12, %s1557_s12  }
   0x5   : > { %p1546_p1 = scmp.eq.s32.totalorder %s1231_s16, 0  ;;  %p857_p2 = scmp.ge.s32.totalorder %s1184_s15, 1 }
   0x6   : > { %p122_p3 = scmp.lt.s32.totalorder %s1184_s15, 5  ;;  %s1186_s19 = smov [#allocation4]  }
   0x7   : > { %p1239_p4 = por %p1546_p1, %p38_p0  ;;  %s134_s20 = sshll.u32 %s1186_s19, 4  ;;  %s135_s20 = int_to_ptr.vmem [resolvable:$true] %s134_s20 }
   0x8   : > { %p1243_p5 = pnand %p857_p2, %p122_p3  ;;  %s1256_s22 = sadd.s32 1, %s1184_s15  }
   0x9   : > { %s1549_s17 = scalar_select %p1239_p4, 1, 0 }
   0xa   : > { %s1550_s18 = scalar_select %p1243_p5, 1, 0 }
   0xb   : > { %p1024_p6 = pneg %p1243_p5  ;;  %s25_s23 = sadd.s32 1, %s1180_s14 }
   0xc   : > { %s22_s24 = ssub.s32 %s1184_s15, %s1256_s22  ;;  %s1088_s27 = scalar_lea.hbm %s1543_s1, 2048 }
   0xd   : > { %p1251_p7 = pnand %p1024_p6, %p1546_p1  ;;  %p1089_p8 = scmp.ne.s32.totalorder %s1543_s1, %s1088_s27 }
   0xe   : > { %p1095_p12 = scmp.lt.u32.totalorder %s1088_s27, %s1543_s1 }
   0xf   : > { %p1090_p9 = pneg %p1251_p7 }
  0x11   : > { %p1091_p10 = pnand %p1090_p9, %p1089_p8 }
  0x13   : > { %p1092_p11 = pneg %p1091_p10 }
  0x15   : > { %p1097_p13 = pnand %p1095_p12, %p1092_p11 }
  0x17   : > { %1100 = shalt.err (!%p1097_p13)
}
  0x18   : > { %s1101_s5 = scalar_lea.vmem %s135_s20, 2048  ;;  %p1109_p6 = scmp.lt.s32.totalorder %s135_s20, %s135_s20 }
  0x19   : > { %p1102_p0 = scmp.ne.s32.totalorder %s135_s20, %s1101_s5  ;;  %p1110_p1 = scmp.lt.s32.totalorder %s1101_s5, %s1101_s5 }
  0x1b   : > { %p1104_p2 = pnand %p1102_p0, %p1090_p9  ;;  %p1111_p4 = por %p1110_p1, %p1109_p6 }
  0x1d   : > { %p1105_p3 = pneg %p1104_p2 }
  0x1f   : > { %p1112_p5 = pnand %p1111_p4, %p1105_p3 }
  0x21   : > { %1115 = shalt.err (!%p1112_p5)
}
  0x22   : > { %s1187_s6 = smov 64   ;;  %s1188_s7 = smov 4  }
  0x23   : > { %1027 = dma.hbm_to_vmem [thread:$0]  (!%p1251_p7), %s1543_s1, 2048, %s135_s20, [#allocation5], %s1187_s6, %s1187_s6, %s1188_s7  }
  0x24   : > { %p23_p8 = scmp.eq.s32.totalorder %s22_s24, 0  ;;  %p32_p9 = scmp.ne.s32.totalorder %s1180_s14, %s1176_s13 }
  0x25   : > { %p33_p1 = scmp.eq.s32.totalorder %s1184_s15, 0  ;;  %p1033_p4 = scmp.lt.s32.totalorder %s1184_s15, 4 }
  0x26   : > { %s1282_s10 = scalar_select %p23_p8, %s1180_s14, %s25_s23  }
  0x27   : > { %p34_p5 = por %p33_p1, %p32_p9  ;;  %s148_s11 = sand.u32 1, %s1180_s14  }
  0x28   : > { %s860_s12 = sshll.u32 %s148_s11, 9  ;;  %s889_s19 = sshll.u32 %s1184_s15, 13 }
  0x29   : > { %s1289_s27 = scalar_lea.hbm %s1542_s0, %s889_s19  ;;  %s152_s20 = scalar_lea.vmem [#allocation2], %s860_s12 }
  0x2a   : > { %s160_s21 = sshll.u32 %s152_s20, 4  ;;  %p1293_p7 = pnand %p1033_p4, %p34_p5  ;;  %s1291_s21 = int_to_ptr.vmem [resolvable:$true] %s160_s21 }
  0x2b   : > { %s1297_s15 = scalar_lea.sflag [#allocation3], %s148_s11  ;;  %s1116_s24 = scalar_lea.hbm %s1289_s27, 8192 }
  0x2c   : > { %p1117_p10 = scmp.ne.s32.totalorder %s1289_s27, %s1116_s24  ;;  %p1118_p11 = pneg %p1293_p7 }
  0x2d   : > { %s1121_s30 = scalar_lea.hbm %s1542_s0, 32768  ;;  %p1122_p0 = scmp.lt.u32.totalorder %s1289_s27, %s1542_s0 }
  0x2e   : > { %p1119_p12 = pnand %p1118_p11, %p1117_p10  ;;  %p1123_p2 = scmp.lt.u32.totalorder %s1121_s30, %s1116_s24 }
  0x2f   : > { %p1125_p6 = scmp.lt.u32.totalorder %s1116_s24, %s1289_s27 }
  0x30   : > { %p1120_p13 = pneg %p1119_p12  ;;  %p1124_p3 = por %p1123_p2, %p1122_p0 }
  0x32   : > { %p1126_p8 = por %p1125_p6, %p1124_p3 }
  0x34   : > { %p1127_p9 = pnand %p1126_p8, %p1120_p13 }
  0x36   : > { %1130 = shalt.err (!%p1127_p9)
}
  0x37   : > { %s1131_s6 = scalar_lea.vmem %s1291_s21, 8192  ;;  %s1189_s7 = smov [#allocation2]  }
  0x38   : > { %p1132_p1 = scmp.ne.s32.totalorder %s1291_s21, %s1131_s6  ;;  %s1136_s8 = sshll.u32 %s1189_s7, 4  ;;  %s1137_s8 = int_to_ptr.vmem [resolvable:$false] %s1136_s8 }
  0x39   : > { %s1138_s9 = scalar_lea.vmem %s1137_s8, 16384  ;;  %p1139_p10 = scmp.lt.s32.totalorder %s1291_s21, %s1137_s8 }
  0x3a   : > { %p1134_p4 = pnand %p1132_p1, %p1118_p11  ;;  %p1140_p12 = scmp.lt.s32.totalorder %s1138_s9, %s1131_s6 }
  0x3c   : > { %p1135_p5 = pneg %p1134_p4  ;;  %p1141_p0 = por %p1140_p12, %p1139_p10 }
  0x3e   : > { %p1142_p2 = pnand %p1141_p0, %p1135_p5 }
  0x40   : > { %1145 = shalt.err (!%p1142_p2)
}
  0x41   : > { %s1190_s11 = smov 256   ;;  %s1191_s12 = smov 16  }
  0x42   : > { %1031 = dma.hbm_to_vmem [thread:$0]  (!%p1293_p7), %s1289_s27, 8192, %s1291_s21, %s1297_s15, %s1190_s11, %s1190_s11, %s1191_s12  }
  0x43   : > { %p1553_p11 = scmp.ne.s32.totalorder %s1550_s18, 0 }
  0x44   : > { %s174_s19 = sand.u32 (!%p1553_p11), 1, %s1176_s13   ;;  %p1554_p13 = scmp.ne.s32.totalorder (!%p1553_p11), %s1549_s17, 0 }
  0x45   : > { %172 = sbr.rel (%p1553_p11) target bundleno = 436 (0x1b4), region = 28  ;;  %s865_s25 = sshll.u32 (!%p1553_p11), %s174_s19, 9 }
  0x46   : > { %s175_s26 = scalar_lea.sflag (!%p1553_p11), [#allocation3], %s174_s19  ;;  %s1328_s20 = scalar_lea.vmem (!%p1553_p11), [#allocation2], %s865_s25 }
  0x4c   : > { %1163 = dma.done.wait (%p1554_p13), %s175_s26, 8192  }
  0x4d   : > { %1165 = vsyncadd (%p1554_p13), %s175_s26, 4294959104  ;;  %p1555_p3 = scmp.eq.s32.totalorder %s1231_s16, 0 }
  0x4f   : > { %1167 = dma.done.wait (%p1555_p3), [#allocation5], 2048   ;;  %p1556_p7 = pmov %p1555_p3 }
  0x50   : > { %v1072_v0 = vld [vmem:[#allocation4 + $0x40] sm:$0xff]   ;;  %v1074_v2 = vld [vmem:[#allocation4 + $0x48] sm:$0xff]   ;;  %v1076_v4 = vld [vmem:[#allocation4 + $0x50] sm:$0xff]   ;;  %s867_s17 = sshll.u32 %s1231_s16, 5  ;;  %p216_p8 = scmp.lt.s32.totalorder %s1231_s16, 3  ;;  %vm744_vm0 = vcmask 1040384  }
  0x51   : > { %1169 = vsyncadd (%p1556_p7), [#allocation5], 4294965248  ;;  %v1073_v1 = vld [vmem:[#allocation4] sm:$0xff]   ;;  %890 = vmatprep.subr.bf16.mxu0 %v1072_v0  ;;  %1002 = vmatprep.subr.bf16.mxu1 %v1072_v0  ;;  %v1075_v3 = vld [vmem:[#allocation4 + $0x8] sm:$0xff]   ;;  %p211_p6 = scmp.lt.s32.totalorder %s867_s17, 127 }
  0x52   : > { %891 = vmatpush3.bf16.msra.mxu0 %v1073_v1  ;;  %1010 = vmatpush3.bf16.msra.mxu1 %v1073_v1  ;;  %v1077_v5 = vld [vmem:[#allocation4 + $0x10] sm:$0xff]   ;;  %v1078_v6 = vld [vmem:[#allocation4 + $0x58] sm:$0xff]   ;;  %v1080_v8 = vld [vmem:[#allocation4 + $0x60] sm:$0xff]   ;;  %s1564_s16 = smov (!%p216_p8, %s1231_s16), 3 }
  0x53   : > { %892 = vmatprep.subr.bf16.mxu0 %v1074_v2  ;;  %1003 = vmatprep.subr.bf16.mxu1 %v1074_v2  ;;  %v1079_v7 = vld [vmem:[#allocation4 + $0x18] sm:$0xff]   ;;  %v1081_v9 = vld [vmem:[#allocation4 + $0x20] sm:$0xff]   ;;  %v1082_v10 = vld [vmem:[#allocation4 + $0x68] sm:$0xff]   ;;  %s1562_s17 = smov (!%p211_p6, %s867_s17), 127  ;;  %s869_s15 = sshll.u32 %s1564_s16, 1 }
  0x54   : > { %v222_v11 = vld [vmem:[%s1328_s20 + $0x8] sm:$0xff]  ;;  %v224_v12 = vld [vmem:[%s1328_s20 + $0x18] sm:$0xff]  ;;  %v1084_v15 = vld [vmem:[#allocation4 + $0x70] sm:$0xff]   ;;  %s868_s18 = sshll.u32 %s1562_s17, 3  ;;  %s219_s29 = scalar_lea.vmem %s1545_s3, %s869_s15 }
  0x55   : > { %v286_v13 = vpack.c.bf16 %v224_v12, %v222_v11  ;;  %v1083_v14 = vld [vmem:[#allocation4 + $0x28] sm:$0xff]   ;;  %v256_v17 = vld [vmem:[%s1328_s20 + $0x118] sm:$0xff]  ;;  %v1085_v19 = vld [vmem:[#allocation4 + $0x30] sm:$0xff]   ;;  %s1406_s23 = scalar_lea.vmem %s1544_s2, %s868_s18 }
  0x56   : > { %893 = vmatpush3.bf16.msra.mxu0 %v1075_v3  ;;  %1011 = vmatpush3.bf16.msra.mxu1 %v1075_v3  ;;  %v254_v16 = vld [vmem:[%s1328_s20 + $0x108] sm:$0xff]  ;;  %v1086_v20 = vld [vmem:[#allocation4 + $0x78] sm:$0xff]   ;;  %v221_v22 = vld [vmem:[%s1328_s20] sm:$0xff] }
  0x57   : > { %894 = vmatprep.subr.bf16.mxu0 %v1076_v4  ;;  %1004 = vmatprep.subr.bf16.mxu1 %v1076_v4  ;;  %v302_v18 = vpack.c.bf16 %v256_v17, %v254_v16  ;;  %v1087_v21 = vld [vmem:[#allocation4 + $0x38] sm:$0xff]   ;;  %v223_v23 = vld [vmem:[%s1328_s20 + $0x10] sm:$0xff]  ;;  %v226_v24 = vld [vmem:[%s1328_s20 + $0x28] sm:$0xff] }
  0x58   : > { %477 = vmatprep.mubr.bf16.mxu0 %v286_v13  ;;  %v228_v25 = vld [vmem:[%s1328_s20 + $0x38] sm:$0xff]  ;;  %v253_v26 = vld [vmem:[%s1328_s20 + $0x100] sm:$0xff]  ;;  %v255_v27 = vld [vmem:[%s1328_s20 + $0x110] sm:$0xff]  ;;  %v285_v30 = vpack.c.bf16 %v223_v23, %v221_v22 }
  0x59   : > { %541 = vmatprep.mubr.bf16.mxu1 %v302_v18  ;;  %v258_v28 = vld [vmem:[%s1328_s20 + $0x128] sm:$0xff]  ;;  %v260_v29 = vld [vmem:[%s1328_s20 + $0x138] sm:$0xff]  ;;  %v288_v31 = vpack.c.bf16 %v228_v25, %v226_v24  ;;  %v301_v32 = vpack.c.bf16 %v255_v27, %v253_v26  ;;  %v225_v34 = vld [vmem:[%s1328_s20 + $0x20] sm:$0xff] }
  0x5a   : > { %895 = vmatpush3.bf16.msra.mxu0 %v1077_v5  ;;  %1012 = vmatpush3.bf16.msra.mxu1 %v1077_v5  ;;  %v304_v33 = vpack.c.bf16 %v260_v29, %v258_v28  ;;  %v227_v35 = vld [vmem:[%s1328_s20 + $0x30] sm:$0xff]  ;;  %v230_v36 = vld [vmem:[%s1328_s20 + $0x48] sm:$0xff]  ;;  %v232_v37 = vld [vmem:[%s1328_s20 + $0x58] sm:$0xff] }
  0x5b   : > { %896 = vmatprep.subr.bf16.mxu0 %v1078_v6  ;;  %1005 = vmatprep.subr.bf16.mxu1 %v1078_v6  ;;  %v257_v38 = vld [vmem:[%s1328_s20 + $0x120] sm:$0xff]  ;;  %v259_v39 = vld [vmem:[%s1328_s20 + $0x130] sm:$0xff]  ;;  %v262_v40 = vld [vmem:[%s1328_s20 + $0x148] sm:$0xff]  ;;  %v287_v42 = vpack.c.bf16 %v227_v35, %v225_v34  ;;  %v290_v43 = vpack.c.bf16 %v232_v37, %v230_v36 }
  0x5c   : > { %v264_v41 = vld [vmem:[%s1328_s20 + $0x158] sm:$0xff]  ;;  %v303_v44 = vpack.c.bf16 %v259_v39, %v257_v38  ;;  %v229_v46 = vld [vmem:[%s1328_s20 + $0x40] sm:$0xff]  ;;  %v231_v47 = vld [vmem:[%s1328_s20 + $0x50] sm:$0xff] }
  0x5d   : > { %v306_v45 = vpack.c.bf16 %v264_v41, %v262_v40  ;;  %v234_v48 = vld [vmem:[%s1328_s20 + $0x68] sm:$0xff]  ;;  %v236_v49 = vld [vmem:[%s1328_s20 + $0x78] sm:$0xff]  ;;  %v261_v50 = vld [vmem:[%s1328_s20 + $0x140] sm:$0xff]  ;;  %v289_v54 = vpack.c.bf16 %v231_v47, %v229_v46 }
  0x5e   : > { %897 = vmatpush3.bf16.msra.mxu0 %v1079_v7  ;;  %1013 = vmatpush3.bf16.msra.mxu1 %v1079_v7  ;;  %v263_v51 = vld [vmem:[%s1328_s20 + $0x150] sm:$0xff]  ;;  %v266_v52 = vld [vmem:[%s1328_s20 + $0x168] sm:$0xff]  ;;  %v268_v53 = vld [vmem:[%s1328_s20 + $0x178] sm:$0xff]  ;;  %v292_v55 = vpack.c.bf16 %v236_v49, %v234_v48 }
  0x5f   : > { %898 = vmatprep.subr.bf16.mxu0 %v1080_v8  ;;  %1006 = vmatprep.subr.bf16.mxu1 %v1080_v8  ;;  %v305_v56 = vpack.c.bf16 %v263_v51, %v261_v50  ;;  %v308_v57 = vpack.c.bf16 %v268_v53, %v266_v52  ;;  %v233_v58 = vld [vmem:[%s1328_s20 + $0x60] sm:$0xff]  ;;  %v235_v59 = vld [vmem:[%s1328_s20 + $0x70] sm:$0xff]  ;;  %v238_v60 = vld [vmem:[%s1328_s20 + $0x88] sm:$0xff] }
  0x60   : > { %v240_v61 = vld [vmem:[%s1328_s20 + $0x98] sm:$0xff]  ;;  %v265_v62 = vld [vmem:[%s1328_s20 + $0x160] sm:$0xff]  ;;  %v267_v63 = vld [vmem:[%s1328_s20 + $0x170] sm:$0xff]  ;;  %v291_v2 = vpack.c.bf16 %v235_v59, %v233_v58 }
  0x61   : > { %v270_v0 = vld [vmem:[%s1328_s20 + $0x188] sm:$0xff]  ;;  %v272_v1 = vld [vmem:[%s1328_s20 + $0x198] sm:$0xff]  ;;  %v294_v3 = vpack.c.bf16 %v240_v61, %v238_v60  ;;  %v307_v4 = vpack.c.bf16 %v267_v63, %v265_v62  ;;  %v237_v6 = vld [vmem:[%s1328_s20 + $0x80] sm:$0xff] }
  0x62   : > { %899 = vmatpush3.bf16.msra.mxu0 %v1081_v9  ;;  %1014 = vmatpush3.bf16.msra.mxu1 %v1081_v9  ;;  %v310_v5 = vpack.c.bf16 %v272_v1, %v270_v0  ;;  %v239_v7 = vld [vmem:[%s1328_s20 + $0x90] sm:$0xff]  ;;  %v242_v8 = vld [vmem:[%s1328_s20 + $0xa8] sm:$0xff]  ;;  %v244_v9 = vld [vmem:[%s1328_s20 + $0xb8] sm:$0xff] }
  0x63   : > { %900 = vmatprep.subr.bf16.mxu0 %v1082_v10  ;;  %1007 = vmatprep.subr.bf16.mxu1 %v1082_v10  ;;  %v269_v10 = vld [vmem:[%s1328_s20 + $0x180] sm:$0xff]  ;;  %v271_v11 = vld [vmem:[%s1328_s20 + $0x190] sm:$0xff]  ;;  %v274_v12 = vld [vmem:[%s1328_s20 + $0x1a8] sm:$0xff] }
  0x64   : > { %v276_v13 = vld [vmem:[%s1328_s20 + $0x1b8] sm:$0xff]  ;;  %v309_v16 = vpack.c.bf16 %v271_v11, %v269_v10  ;;  %v241_v18 = vld [vmem:[%s1328_s20 + $0xa0] sm:$0xff]  ;;  %v275_v23 = vld [vmem:[%s1328_s20 + $0x1b0] sm:$0xff] }
  0x65   : > { %v312_v17 = vpack.c.bf16 %v276_v13, %v274_v12  ;;  %v273_v22 = vld [vmem:[%s1328_s20 + $0x1a0] sm:$0xff]  ;;  %v278_v24 = vld [vmem:[%s1328_s20 + $0x1c8] sm:$0xff]  ;;  %v280_v25 = vld [vmem:[%s1328_s20 + $0x1d8] sm:$0xff] }
  0x66   : > { %901 = vmatpush3.bf16.msra.mxu0 %v1083_v14  ;;  %1015 = vmatpush3.bf16.msra.mxu1 %v1083_v14  ;;  %v293_v14 = vpack.c.bf16 %v239_v7, %v237_v6  ;;  %v311_v28 = vpack.c.bf16 %v275_v23, %v273_v22  ;;  %v314_v29 = vpack.c.bf16 %v280_v25, %v278_v24  ;;  %v277_v34 = vld [vmem:[%s1328_s20 + $0x1c0] sm:$0xff]  ;;  %v279_v35 = vld [vmem:[%s1328_s20 + $0x1d0] sm:$0xff]  ;;  %v282_v36 = vld [vmem:[%s1328_s20 + $0x1e8] sm:$0xff] }
  0x67   : > { %902 = vmatprep.subr.bf16.mxu0 %v1084_v15  ;;  %1008 = vmatprep.subr.bf16.mxu1 %v1084_v15  ;;  %v296_v15 = vpack.c.bf16 %v244_v9, %v242_v8  ;;  %v284_v37 = vld [vmem:[%s1328_s20 + $0x1f8] sm:$0xff]  ;;  %v313_v40 = vpack.c.bf16 %v279_v35, %v277_v34 }
  0x68   : > { %v316_v41 = vpack.c.bf16 %v284_v37, %v282_v36 }
  0x6a   : > { %903 = vmatpush3.bf16.msra.mxu0 %v1085_v19  ;;  %1016 = vmatpush3.bf16.msra.mxu1 %v1085_v19  ;;  %v243_v19 = vld [vmem:[%s1328_s20 + $0xb0] sm:$0xff] }
  0x6b   : > { %904 = vmatprep.subr.bf16.mxu0 %v1086_v20  ;;  %1009 = vmatprep.subr.bf16.mxu1 %v1086_v20  ;;  %v246_v20 = vld [vmem:[%s1328_s20 + $0xc8] sm:$0xff]  ;;  %v295_v26 = vpack.c.bf16 %v243_v19, %v241_v18 }
  0x6e   : > { %905 = vmatpush3.bf16.msra.mxu0 %v1087_v21  ;;  %1017 = vmatpush3.bf16.msra.mxu1 %v1087_v21  ;;  %v248_v21 = vld [vmem:[%s1328_s20 + $0xd8] sm:$0xff] }
  0x6f   : > { %v298_v27 = vpack.c.bf16 %v248_v21, %v246_v20 }
  0x71   : > { %478 = vmatmul.mubr.bf16.vlgmr.msra.gmra.mrb[0].mxu0 %v285_v30  ;;  %542 = vmatmul.mubr.bf16.vlgmr.msra.gmra.mrb[0].mxu1 %v301_v32  ;;  %v245_v30 = vld [vmem:[%s1328_s20 + $0xc0] sm:$0xff]  ;;  %v250_v32 = vld [vmem:[%s1328_s20 + $0xe8] sm:$0xff] }
  0x72   : > { %485 = vmatprep.mubr.bf16.mxu0 %v288_v31  ;;  %549 = vmatprep.mubr.bf16.mxu1 %v304_v33  ;;  %v247_v31 = vld [vmem:[%s1328_s20 + $0xd0] sm:$0xff]  ;;  %v252_v33 = vld [vmem:[%s1328_s20 + $0xf8] sm:$0xff] }
  0x73   : > { %v297_v38 = vpack.c.bf16 %v247_v31, %v245_v30  ;;  %v300_v39 = vpack.c.bf16 %v252_v33, %v250_v32 }
  0x79   : > { %486 = vmatmul.mubr.bf16.gmra.mrb[4].mxu0 %v287_v42  ;;  %550 = vmatmul.mubr.bf16.gmra.mrb[4].mxu1 %v303_v44  ;;  %v249_v42 = vld [vmem:[%s1328_s20 + $0xe0] sm:$0xff] }
  0x7a   : > { %493 = vmatprep.mubr.bf16.mxu0 %v290_v43  ;;  %557 = vmatprep.mubr.bf16.mxu1 %v306_v45  ;;  %v251_v43 = vld [vmem:[%s1328_s20 + $0xf0] sm:$0xff]  ;;  %v281_v44 = vld [vmem:[%s1328_s20 + $0x1e0] sm:$0xff] }
  0x7b   : > { %v283_v45 = vld [vmem:[%s1328_s20 + $0x1f0] sm:$0xff]  ;;  %v299_v46 = vpack.c.bf16 %v251_v43, %v249_v42 }
  0x7c   : > { %v315_v47 = vpack.c.bf16 %v283_v45, %v281_v44 }
  0x81   : > { %494 = vmatmul.mubr.bf16.gmra.mrb[8].mxu0 %v289_v54  ;;  %558 = vmatmul.mubr.bf16.gmra.mrb[8].mxu1 %v305_v56 }
  0x82   : > { %501 = vmatprep.mubr.bf16.mxu0 %v292_v55  ;;  %565 = vmatprep.mubr.bf16.mxu1 %v308_v57 }
  0x89   : > { %502 = vmatmul.mubr.bf16.gmra.mrb[12].mxu0 %v291_v2  ;;  %566 = vmatmul.mubr.bf16.gmra.mrb[12].mxu1 %v307_v4 }
  0x8a   : > { %509 = vmatprep.mubr.bf16.mxu0 %v294_v3  ;;  %573 = vmatprep.mubr.bf16.mxu1 %v310_v5 }
  0x91   : > { %510 = vmatmul.mubr.bf16.gmra.mrb[16].mxu0 %v293_v14  ;;  %574 = vmatmul.mubr.bf16.gmra.mrb[16].mxu1 %v309_v16 }
  0x92   : > { %517 = vmatprep.mubr.bf16.mxu0 %v296_v15  ;;  %581 = vmatprep.mubr.bf16.mxu1 %v312_v17 }
  0x99   : > { %518 = vmatmul.mubr.bf16.gmra.mrb[20].mxu0 %v295_v26  ;;  %582 = vmatmul.mubr.bf16.gmra.mrb[20].mxu1 %v311_v28 }
  0x9a   : > { %525 = vmatprep.mubr.bf16.mxu0 %v298_v27  ;;  %589 = vmatprep.mubr.bf16.mxu1 %v314_v29 }
  0xa1   : > { %526 = vmatmul.mubr.bf16.gmra.mrb[24].mxu0 %v297_v38  ;;  %590 = vmatmul.mubr.bf16.gmra.mrb[24].mxu1 %v313_v40 }
  0xa2   : > { %533 = vmatprep.mubr.bf16.mxu0 %v300_v39  ;;  %597 = vmatprep.mubr.bf16.mxu1 %v316_v41 }
  0xa9   : > { %534 = vmatmul.mubr.bf16.gmra.mrb[28].mxu0 %v299_v46  ;;  %598 = vmatmul.mubr.bf16.gmra.mrb[28].mxu1 %v315_v47 }
 0x144   : > { %v906_v48 = vpop.f32.mrb[0].mxu0  ;;  %v954_v50 = vpop.f32.mrb[0].mxu1 }
 0x145   : > { %v907_v49 = vpop.f32.mrb[1].mxu0  ;;  %v955_v53 = vpop.f32.mrb[1].mxu1 }
 0x146   : > { %v908_v51 = vadd.f32 %v907_v49, %v906_v48  ;;  %v909_v52 = vpop.f32.mrb[2].mxu0  ;;  %v1408_v55 = vadd.f32 %v955_v53, %v954_v50  ;;  %v957_v56 = vpop.f32.mrb[2].mxu1 }
 0x147   : > { %v910_v54 = vpop.f32.mrb[3].mxu0  ;;  %v958_v58 = vpop.f32.mrb[3].mxu1 }
 0x148   : > { %606 = vst [vmem:[%s1406_s23] sm:$0xff] %v908_v51  ;;  %v911_v57 = vadd.f32 %v910_v54, %v909_v52  ;;  %622 = vst [vmem:[%s1406_s23 + $0x80] sm:$0xff] %v1408_v55  ;;  %v1413_v59 = vadd.f32 %v958_v58, %v957_v56  ;;  %v675_v60 = vmul.f32 %v908_v51, %v908_v51 }
 0x14a   : > { %607 = vst [vmem:[%s1406_s23 + $0x8] sm:$0xff] %v911_v57  ;;  %v638_v61 = vadd.f32 %v911_v57, %v908_v51  ;;  %v676_v62 = vmul.f32 %v911_v57, %v911_v57  ;;  %623 = vst [vmem:[%s1406_s23 + $0x88] sm:$0xff] %v1413_v59 }
 0x14c   : > { %v707_v63 = vadd.f32 %v676_v62, %v675_v60  ;;  %v912_v0 = vpop.f32.mrb[4].mxu0  ;;  %v960_v2 = vpop.f32.mrb[4].mxu1 }
 0x14d   : > { %v913_v1 = vpop.f32.mrb[5].mxu0  ;;  %v961_v5 = vpop.f32.mrb[5].mxu1 }
 0x14e   : > { %v914_v3 = vadd.f32 %v913_v1, %v912_v0  ;;  %v915_v4 = vpop.f32.mrb[6].mxu0  ;;  %v1418_v7 = vadd.f32 %v961_v5, %v960_v2  ;;  %v963_v8 = vpop.f32.mrb[6].mxu1 }
 0x14f   : > { %v916_v6 = vpop.f32.mrb[7].mxu0  ;;  %v964_v12 = vpop.f32.mrb[7].mxu1 }
 0x150   : > { %608 = vst [vmem:[%s1406_s23 + $0x10] sm:$0xff] %v914_v3  ;;  %v639_v9 = vadd.f32 %v914_v3, %v638_v61  ;;  %v677_v10 = vmul.f32 %v914_v3, %v914_v3  ;;  %v917_v11 = vadd.f32 %v916_v6, %v915_v4  ;;  %624 = vst [vmem:[%s1406_s23 + $0x90] sm:$0xff] %v1418_v7 }
 0x151   : > { %v1423_v13 = vadd.f32 %v964_v12, %v963_v8 }
 0x152   : > { %v708_v14 = vadd.f32 %v707_v63, %v677_v10  ;;  %609 = vst [vmem:[%s1406_s23 + $0x18] sm:$0xff] %v917_v11  ;;  %v640_v15 = vadd.f32 %v917_v11, %v639_v9  ;;  %v678_v16 = vmul.f32 %v917_v11, %v917_v11 }
 0x153   : > { %625 = vst [vmem:[%s1406_s23 + $0x98] sm:$0xff] %v1423_v13 }
 0x154   : > { %v709_v17 = vadd.f32 %v708_v14, %v678_v16  ;;  %v918_v18 = vpop.f32.mrb[8].mxu0  ;;  %v966_v20 = vpop.f32.mrb[8].mxu1 }
 0x155   : > { %v919_v19 = vpop.f32.mrb[9].mxu0  ;;  %v967_v23 = vpop.f32.mrb[9].mxu1 }
 0x156   : > { %v920_v21 = vadd.f32 %v919_v19, %v918_v18  ;;  %v921_v22 = vpop.f32.mrb[10].mxu0  ;;  %v1428_v25 = vadd.f32 %v967_v23, %v966_v20  ;;  %v969_v26 = vpop.f32.mrb[10].mxu1 }
 0x157   : > { %v922_v24 = vpop.f32.mrb[11].mxu0  ;;  %v970_v30 = vpop.f32.mrb[11].mxu1 }
 0x158   : > { %610 = vst [vmem:[%s1406_s23 + $0x20] sm:$0xff] %v920_v21  ;;  %v641_v27 = vadd.f32 %v920_v21, %v640_v15  ;;  %v679_v28 = vmul.f32 %v920_v21, %v920_v21  ;;  %v923_v29 = vadd.f32 %v922_v24, %v921_v22  ;;  %626 = vst [vmem:[%s1406_s23 + $0xa0] sm:$0xff] %v1428_v25 }
 0x159   : > { %v1433_v31 = vadd.f32 %v970_v30, %v969_v26 }
 0x15a   : > { %v710_v32 = vadd.f32 %v709_v17, %v679_v28  ;;  %611 = vst [vmem:[%s1406_s23 + $0x28] sm:$0xff] %v923_v29  ;;  %v642_v33 = vadd.f32 %v923_v29, %v641_v27  ;;  %v680_v34 = vmul.f32 %v923_v29, %v923_v29 }
 0x15b   : > { %627 = vst [vmem:[%s1406_s23 + $0xa8] sm:$0xff] %v1433_v31 }
 0x15c   : > { %v711_v35 = vadd.f32 %v710_v32, %v680_v34  ;;  %v924_v36 = vpop.f32.mrb[12].mxu0  ;;  %v972_v38 = vpop.f32.mrb[12].mxu1 }
 0x15d   : > { %v925_v37 = vpop.f32.mrb[13].mxu0  ;;  %v973_v41 = vpop.f32.mrb[13].mxu1 }
 0x15e   : > { %v926_v39 = vadd.f32 %v925_v37, %v924_v36  ;;  %v927_v40 = vpop.f32.mrb[14].mxu0  ;;  %v1438_v43 = vadd.f32 %v973_v41, %v972_v38  ;;  %v975_v44 = vpop.f32.mrb[14].mxu1 }
 0x15f   : > { %v928_v42 = vpop.f32.mrb[15].mxu0  ;;  %v976_v48 = vpop.f32.mrb[15].mxu1 }
 0x160   : > { %612 = vst [vmem:[%s1406_s23 + $0x30] sm:$0xff] %v926_v39  ;;  %v643_v45 = vadd.f32 %v926_v39, %v642_v33  ;;  %v681_v46 = vmul.f32 %v926_v39, %v926_v39  ;;  %v929_v47 = vadd.f32 %v928_v42, %v927_v40  ;;  %628 = vst [vmem:[%s1406_s23 + $0xb0] sm:$0xff] %v1438_v43 }
 0x161   : > { %v1443_v49 = vadd.f32 %v976_v48, %v975_v44 }
 0x162   : > { %v712_v50 = vadd.f32 %v711_v35, %v681_v46  ;;  %613 = vst [vmem:[%s1406_s23 + $0x38] sm:$0xff] %v929_v47  ;;  %v644_v51 = vadd.f32 %v929_v47, %v643_v45  ;;  %v682_v52 = vmul.f32 %v929_v47, %v929_v47 }
 0x163   : > { %629 = vst [vmem:[%s1406_s23 + $0xb8] sm:$0xff] %v1443_v49 }
 0x164   : > { %v713_v53 = vadd.f32 %v712_v50, %v682_v52  ;;  %v930_v54 = vpop.f32.mrb[16].mxu0  ;;  %v978_v57 = vpop.f32.mrb[16].mxu1 }
 0x165   : > { %v931_v56 = vpop.f32.mrb[17].mxu0  ;;  %v979_v61 = vpop.f32.mrb[17].mxu1 }
 0x166   : > { %v932_v58 = vadd.f32 %v931_v56, %v930_v54  ;;  %v933_v60 = vpop.f32.mrb[18].mxu0  ;;  %v1448_v63 = vadd.f32 %v979_v61, %v978_v57  ;;  %v981_v0 = vpop.f32.mrb[18].mxu1 }
 0x167   : > { %v934_v62 = vpop.f32.mrb[19].mxu0  ;;  %v982_v4 = vpop.f32.mrb[19].mxu1 }
 0x168   : > { %614 = vst [vmem:[%s1406_s23 + $0x40] sm:$0xff] %v932_v58  ;;  %v645_v1 = vadd.f32 %v932_v58, %v644_v51  ;;  %v683_v2 = vmul.f32 %v932_v58, %v932_v58  ;;  %v935_v3 = vadd.f32 %v934_v62, %v933_v60  ;;  %630 = vst [vmem:[%s1406_s23 + $0xc0] sm:$0xff] %v1448_v63 }
 0x169   : > { %v1453_v5 = vadd.f32 %v982_v4, %v981_v0 }
 0x16a   : > { %v714_v6 = vadd.f32 %v713_v53, %v683_v2  ;;  %615 = vst [vmem:[%s1406_s23 + $0x48] sm:$0xff] %v935_v3  ;;  %v646_v8 = vadd.f32 %v935_v3, %v645_v1  ;;  %v684_v9 = vmul.f32 %v935_v3, %v935_v3 }
 0x16b   : > { %631 = vst [vmem:[%s1406_s23 + $0xc8] sm:$0xff] %v1453_v5 }
 0x16c   : > { %v715_v10 = vadd.f32 %v714_v6, %v684_v9  ;;  %v936_v11 = vpop.f32.mrb[20].mxu0  ;;  %v984_v14 = vpop.f32.mrb[20].mxu1 }
 0x16d   : > { %v937_v12 = vpop.f32.mrb[21].mxu0  ;;  %v985_v17 = vpop.f32.mrb[21].mxu1 }
 0x16e   : > { %v938_v15 = vadd.f32 %v937_v12, %v936_v11  ;;  %v939_v16 = vpop.f32.mrb[22].mxu0  ;;  %v1458_v19 = vadd.f32 %v985_v17, %v984_v14  ;;  %v987_v20 = vpop.f32.mrb[22].mxu1  ;;  %v692_v14 = vmul.f32 %v1413_v59, %v1413_v59  ;;  %v693_v17 = vmul.f32 %v1418_v7, %v1418_v7 }
 0x16f   : > { %v940_v18 = vpop.f32.mrb[23].mxu0  ;;  %v988_v24 = vpop.f32.mrb[23].mxu1 }
 0x170   : > { %616 = vst [vmem:[%s1406_s23 + $0x50] sm:$0xff] %v938_v15  ;;  %v647_v21 = vadd.f32 %v938_v15, %v646_v8  ;;  %v685_v22 = vmul.f32 %v938_v15, %v938_v15  ;;  %v941_v23 = vadd.f32 %v940_v18, %v939_v16  ;;  %632 = vst [vmem:[%s1406_s23 + $0xd0] sm:$0xff] %v1458_v19 }
 0x171   : > { %v1463_v26 = vadd.f32 %v988_v24, %v987_v20 }
 0x172   : > { %v716_v27 = vadd.f32 %v715_v10, %v685_v22  ;;  %617 = vst [vmem:[%s1406_s23 + $0x58] sm:$0xff] %v941_v23  ;;  %v648_v28 = vadd.f32 %v941_v23, %v647_v21  ;;  %v686_v29 = vmul.f32 %v941_v23, %v941_v23  ;;  %v691_v10 = vmul.f32 %v1408_v55, %v1408_v55 }
 0x173   : > { %633 = vst [vmem:[%s1406_s23 + $0xd8] sm:$0xff] %v1463_v26  ;;  %v694_v21 = vmul.f32 %v1423_v13, %v1423_v13 }
 0x174   : > { %v717_v30 = vadd.f32 %v716_v27, %v686_v29  ;;  %v942_v32 = vpop.f32.mrb[24].mxu0  ;;  %v990_v34 = vpop.f32.mrb[24].mxu1 }
 0x175   : > { %v943_v33 = vpop.f32.mrb[25].mxu0  ;;  %v991_v37 = vpop.f32.mrb[25].mxu1 }
 0x176   : > { %v944_v35 = vadd.f32 %v943_v33, %v942_v32  ;;  %v945_v36 = vpop.f32.mrb[26].mxu0  ;;  %v1468_v39 = vadd.f32 %v991_v37, %v990_v34  ;;  %v993_v40 = vpop.f32.mrb[26].mxu1 }
 0x177   : > { %v946_v38 = vpop.f32.mrb[27].mxu0  ;;  %v994_v45 = vpop.f32.mrb[27].mxu1 }
 0x178   : > { %618 = vst [vmem:[%s1406_s23 + $0x60] sm:$0xff] %v944_v35  ;;  %v649_v41 = vadd.f32 %v944_v35, %v648_v28  ;;  %v687_v42 = vmul.f32 %v944_v35, %v944_v35  ;;  %v947_v44 = vadd.f32 %v946_v38, %v945_v36  ;;  %634 = vst [vmem:[%s1406_s23 + $0xe0] sm:$0xff] %v1468_v39 }
 0x179   : > { %v1473_v46 = vadd.f32 %v994_v45, %v993_v40  ;;  %v699_v35 = vmul.f32 %v1448_v63, %v1448_v63  ;;  %v700_v38 = vmul.f32 %v1453_v5, %v1453_v5 }
 0x17a   : > { %v718_v47 = vadd.f32 %v717_v30, %v687_v42  ;;  %619 = vst [vmem:[%s1406_s23 + $0x68] sm:$0xff] %v947_v44  ;;  %v650_v48 = vadd.f32 %v947_v44, %v649_v41  ;;  %v688_v50 = vmul.f32 %v947_v44, %v947_v44  ;;  %v701_v41 = vmul.f32 %v1458_v19, %v1458_v19 }
 0x17b   : > { %635 = vst [vmem:[%s1406_s23 + $0xe8] sm:$0xff] %v1473_v46 }
 0x17c   : > { %v719_v51 = vadd.f32 %v718_v47, %v688_v50  ;;  %v948_v52 = vpop.f32.mrb[28].mxu0  ;;  %v996_v54 = vpop.f32.mrb[28].mxu1  ;;  %v703_v47 = vmul.f32 %v1468_v39, %v1468_v39 }
 0x17d   : > { %v949_v53 = vpop.f32.mrb[29].mxu0  ;;  %v997_v58 = vpop.f32.mrb[29].mxu1 }
 0x17e   : > { %v950_v56 = vadd.f32 %v949_v53, %v948_v52  ;;  %v951_v57 = vpop.f32.mrb[30].mxu0  ;;  %v998_v61 = vadd.f32 %v997_v58, %v996_v54  ;;  %v999_v62 = vpop.f32.mrb[30].mxu1 }
 0x17f   : > { %v952_v60 = vpop.f32.mrb[31].mxu0  ;;  %v1000_v3 = vpop.f32.mrb[31].mxu1 }
 0x180   : > { %620 = vst [vmem:[%s1406_s23 + $0x70] sm:$0xff] %v950_v56  ;;  %v651_v0 = vadd.f32 %v950_v56, %v650_v48  ;;  %v689_v1 = vmul.f32 %v950_v56, %v950_v56  ;;  %v953_v2 = vadd.f32 %v952_v60, %v951_v57  ;;  %636 = vst [vmem:[%s1406_s23 + $0xf0] sm:$0xff] %v998_v61 }
 0x181   : > { %v1001_v4 = vadd.f32 %v1000_v3, %v999_v62  ;;  %v705_v50 = vmul.f32 %v998_v61, %v998_v61 }
 0x182   : > { %v720_v6 = vadd.f32 %v719_v51, %v689_v1  ;;  %621 = vst [vmem:[%s1406_s23 + $0x78] sm:$0xff] %v953_v2  ;;  %v652_v8 = vadd.f32 %v953_v2, %v651_v0  ;;  %v690_v9 = vmul.f32 %v953_v2, %v953_v2 }
 0x183   : > { %637 = vst [vmem:[%s1406_s23 + $0xf8] sm:$0xff] %v1001_v4  ;;  %v706_v56 = vmul.f32 %v1001_v4, %v1001_v4 }
 0x184   : > { %v653_v11 = vadd.f32 %v1408_v55, %v652_v8  ;;  %v721_v12 = vadd.f32 %v720_v6, %v690_v9  ;;  %v695_v55 = vmul.f32 %v1428_v25, %v1428_v25 }
 0x186   : > { %v654_v15 = vadd.f32 %v1413_v59, %v653_v11  ;;  %v722_v16 = vadd.f32 %v721_v12, %v691_v10  ;;  %v696_v59 = vmul.f32 %v1433_v31, %v1433_v31 }
 0x188   : > { %v655_v18 = vadd.f32 %v1418_v7, %v654_v15  ;;  %v723_v20 = vadd.f32 %v722_v16, %v692_v14  ;;  %v697_v7 = vmul.f32 %v1438_v43, %v1438_v43 }
 0x18a   : > { %v656_v22 = vadd.f32 %v1423_v13, %v655_v18  ;;  %v724_v23 = vadd.f32 %v723_v20, %v693_v17  ;;  %v698_v13 = vmul.f32 %v1443_v49, %v1443_v49 }
 0x18c   : > { %v725_v24 = vadd.f32 %v724_v23, %v694_v21  ;;  %v657_v27 = vadd.f32 %v1428_v25, %v656_v22 }
 0x18e   : > { %v658_v28 = vadd.f32 %v1433_v31, %v657_v27  ;;  %v726_v29 = vadd.f32 %v725_v24, %v695_v55 }
 0x190   : > { %v659_v30 = vadd.f32 %v1438_v43, %v658_v28  ;;  %v727_v32 = vadd.f32 %v726_v29, %v696_v59 }
 0x192   : > { %v660_v33 = vadd.f32 %v1443_v49, %v659_v30  ;;  %v728_v34 = vadd.f32 %v727_v32, %v697_v7 }
 0x194   : > { %v661_v25 = vadd.f32 %v1448_v63, %v660_v33  ;;  %v729_v36 = vadd.f32 %v728_v34, %v698_v13  ;;  %v702_v63 = vmul.f32 %v1463_v26, %v1463_v26 }
 0x196   : > { %v730_v31 = vadd.f32 %v729_v36, %v699_v35  ;;  %v662_v37 = vadd.f32 %v1453_v5, %v661_v25 }
 0x198   : > { %v731_v43 = vadd.f32 %v730_v31, %v700_v38  ;;  %v663_v40 = vadd.f32 %v1458_v19, %v662_v37  ;;  %v704_v19 = vmul.f32 %v1473_v46, %v1473_v46 }
 0x19a   : > { %v732_v49 = vadd.f32 %v731_v43, %v701_v41  ;;  %v664_v42 = vadd.f32 %v1463_v26, %v663_v40 }
 0x19c   : > { %v733_v44 = vadd.f32 %v732_v49, %v702_v63  ;;  %v665_v45 = vadd.f32 %v1468_v39, %v664_v42 }
 0x19e   : > { %v734_v5 = vadd.f32 %v733_v44, %v703_v47  ;;  %v666_v48 = vadd.f32 %v1473_v46, %v665_v45 }
 0x1a0   : > { %v735_v51 = vadd.f32 %v734_v5, %v704_v19  ;;  %v667_v52 = vadd.f32 %v998_v61, %v666_v48 }
 0x1a2   : > { %v736_v53 = vadd.f32 %v735_v51, %v705_v50  ;;  %v668_v54 = vadd.f32 %v1001_v4, %v667_v52 }
 0x1a4   : > { %v669_v26 = vrot.slane %v668_v54, 4  ;;  %v737_v57 = vadd.f32 %v736_v53, %v706_v56 }
 0x1a6   : > { %v670_v58 = vadd.f32 %v669_v26, %v668_v54  ;;  %v738_v60 = vrot.slane %v737_v57, 4 }
 0x1a8   : > { %v671_v62 = vrot.slane %v670_v58, 2  ;;  %v739_v39 = vadd.f32 %v738_v60, %v737_v57 }
 0x1aa   : > { %v672_v0 = vadd.f32 %v671_v62, %v670_v58  ;;  %v740_v1 = vrot.slane %v739_v39, 2 }
 0x1ac   : > { %v673_v2 = vrot.slane %v672_v0, 1  ;;  %v741_v3 = vadd.f32 %v740_v1, %v739_v39 }
 0x1ae   : > { %v742_v46 = vrot.slane %v741_v3, 1  ;;  %v674_v61 = vadd.f32 %v673_v2, %v672_v0 }
 0x1b0   : > { %v743_v4 = vadd.f32 %v742_v46, %v741_v3 }
 0x1b2   : > { %v745_v6 = vsel %vm744_vm0, %v674_v61, %v743_v4 }
 0x1b3   : > { %746 = vst [vmem:[%s219_s29] sm:$0x3] %v745_v6 }
 0x1b4 PF: > { %p15_p9 = scmp.ge.s32.totalorder %s1256_s22, 6   ;;  %s1557_s12 = smov %s1176_s13 }
 0x1b5   : > { %s1558_s13 = smov %s1180_s14  ;;  %s1559_s14 = smov %s1282_s10 }
 0x1b6   : > { %s1560_s15 = smov %s1256_s22  ;;  %17 = sbr.rel (!%p15_p9) target bundleno = 4 (0x4), region = 84 }
 0x1bd   :  { %783 = vsyncpa [#allocation3], 1 }
 0x1be   :  { %785 = vsyncpa [#allocation3 + $0x1], 1 }
 0x1bf   :  { %786 = vsyncpa [#allocation5], 1 }

// kernel: _lambda_.5
= control target key start
LH: loop header
LB: loop body
LE: loop exit
PB: predicated region body
PF: predicated region fallthrough
CT: control target
= control target key end

     0   :  { %s1363_s18 = smov 0   ;;  %s1689_s0 = inlined_call_operand.vmem [shape: f32[1024,128], index: 0, kind: input, shape index: {}]   ;;  %s1690_s1 = inlined_call_operand.vmem [shape: f32[2,128], index: 1, kind: input, shape index: {}]   ;;  %s1691_s2 = inlined_call_operand.vmem [shape: bf16[128,128], index: 2, kind: input, shape index: {}]   ;;  %s1692_s3 = inlined_call_operand.vmem [shape: bf16[1024,128], index: 3, kind: output, shape index: {0}]   ;;  %s1693_s4 = inlined_call_operand.vmem [shape: f32[1024,128], index: 4, kind: output, shape index: {1}]   ;;  %s1694_s5 = inlined_call_operand.vmem [shape: f32[4,2,128], index: 5, kind: output, shape index: {2}]  }
   0x1 LB: > { %s1369_s19 = sadd.s32 4294967295, %s1331_s18   ;;  %p1042_p0 = scmp.ge.s32.totalorder %s1331_s18, 1  ;;  %s1331_s18 = sphi %s1363_s18, %s16_s18  }
   0x2   : > { %p193_p1 = scmp.lt.s32.totalorder %s1331_s18, 5 }
   0x4   : > { %p194_p2 = pnand %p1042_p0, %p193_p1 }
   0x5   : > { %v1317_v0 = vld [vmem:[%s1691_s2] sm:$0xff] (!%p194_p2)   ;;  %s1043_s22 = sshll.u32 (!%p194_p2), %s1369_s19, 5  ;;  %v1318_v1 = vld [vmem:[%s1691_s2 + $0x8] sm:$0xff] (!%p194_p2)   ;;  %v1319_v2 = vld [vmem:[%s1691_s2 + $0x10] sm:$0xff] (!%p194_p2)   ;;  %p248_p4 = scmp.lt.s32.totalorder (!%p194_p2), %s1369_s19, 3  ;;  %vm914_vm0 = vcmask (!%p194_p2), 1040384  }
   0x6   : > { %197 = sbr.rel (%p194_p2) target bundleno = 332 (0x14c), region = 32  ;;  %p231_p3 = scmp.lt.s32.totalorder (!%p194_p2), %s1043_s22, 127  ;;  %1245 = vmatprep.subr.bf16.mxu0 (!%p194_p2), %v1317_v0  ;;  %1293 = vmatprep.subr.bf16.mxu1 (!%p194_p2), %v1317_v0  ;;  %v1320_v3 = vld [vmem:[%s1691_s2 + $0x18] sm:$0xff] (!%p194_p2)   ;;  %v1401_v6 = vld [vmem:[%s1690_s1] ss:$0 sm:$0xff] (!%p194_p2)  ;;  %v1322_v44 = vld [vmem:[%s1691_s2 + $0x28] sm:$0xff] (!%p194_p2)  }
   0x7   : > { %1246 = vmatpush3.bf16.msra.mxu0 (!%p194_p2), %v1317_v0  ;;  %1301 = vmatpush3.bf16.msra.mxu1 (!%p194_p2), %v1317_v0  ;;  %v1408_v9 = vld [vmem:[%s1690_s1 + $0x1] ss:$0 sm:$0xff] (!%p194_p2)  ;;  %v1323_v0 = vld [vmem:[%s1691_s2 + $0x30] sm:$0xff] (!%p194_p2)  }
   0x8   : > { %1247 = vmatprep.subr.bf16.mxu0 (!%p194_p2), %v1318_v1  ;;  %1294 = vmatprep.subr.bf16.mxu1 (!%p194_p2), %v1318_v1  ;;  %v1321_v21 = vld [vmem:[%s1691_s2 + $0x20] sm:$0xff] (!%p194_p2)  }
   0xb   : > { %1248 = vmatpush3.bf16.msra.mxu0 (!%p194_p2), %v1318_v1  ;;  %1302 = vmatpush3.bf16.msra.mxu1 (!%p194_p2), %v1318_v1 }
   0xc   : > { %1249 = vmatprep.subr.bf16.mxu0 (!%p194_p2), %v1319_v2  ;;  %1295 = vmatprep.subr.bf16.mxu1 (!%p194_p2), %v1319_v2 }
   0xd   : > { %s1696_s22 = smov (!%p231_p3, %s1043_s22), 127  ;;  %s1698_s19 = smov (!%p248_p4, %s1369_s19), 3 }
   0xe   : > { %s1044_s27 = sshll.u32 %s1696_s22, 3  ;;  %s1046_s12 = sshll.u32 %s1696_s22, 2 }
   0xf   : > { %s1391_s30 = scalar_lea.vmem %s1689_s0, %s1044_s27  ;;  %1250 = vmatpush3.bf16.msra.mxu0 %v1319_v2  ;;  %1303 = vmatpush3.bf16.msra.mxu1 %v1319_v2  ;;  %s1436_s17 = scalar_lea.vmem %s1692_s3, %s1046_s12 }
  0x10   : > { %v253_v4 = vld [vmem:[%s1391_s30] sm:$0xff]  ;;  %v254_v5 = vld [vmem:[%s1391_s30 + $0x8] sm:$0xff]  ;;  %v255_v10 = vld [vmem:[%s1391_s30 + $0x10] sm:$0xff]  ;;  %1251 = vmatprep.subr.bf16.mxu0 %v1320_v3  ;;  %1296 = vmatprep.subr.bf16.mxu1 %v1320_v3  ;;  %s1049_s22 = sshll.u32 %s1698_s19, 1 }
  0x11   : > { %v290_v7 = vmul.f32 %v1401_v6, %v253_v4  ;;  %v291_v8 = vmul.f32 %v1401_v6, %v254_v5  ;;  %v256_v11 = vld [vmem:[%s1391_s30 + $0x18] sm:$0xff]  ;;  %v292_v12 = vmul.f32 %v1401_v6, %v255_v10  ;;  %v257_v14 = vld [vmem:[%s1391_s30 + $0x20] sm:$0xff]  ;;  %v258_v15 = vld [vmem:[%s1391_s30 + $0x28] sm:$0xff]  ;;  %s251_s7 = scalar_lea.vmem %s1694_s5, %s1049_s22 }
  0x12   : > { %v293_v13 = vmul.f32 %v1401_v6, %v256_v11  ;;  %v259_v16 = vld [vmem:[%s1391_s30 + $0x30] sm:$0xff]  ;;  %v294_v19 = vmul.f32 %v1401_v6, %v257_v14  ;;  %v260_v20 = vld [vmem:[%s1391_s30 + $0x38] sm:$0xff]  ;;  %v295_v24 = vmul.f32 %v1401_v6, %v258_v15  ;;  %v261_v26 = vld [vmem:[%s1391_s30 + $0x40] sm:$0xff] }
  0x13   : > { %v327_v17 = vadd.f32 %v1408_v9, %v290_v7  ;;  %v328_v18 = vadd.f32 %v1408_v9, %v291_v8  ;;  %v329_v22 = vadd.f32 %v1408_v9, %v292_v12  ;;  %v296_v25 = vmul.f32 %v1401_v6, %v259_v16  ;;  %v262_v31 = vld [vmem:[%s1391_s30 + $0x48] sm:$0xff]  ;;  %v263_v36 = vld [vmem:[%s1391_s30 + $0x50] sm:$0xff]  ;;  %v264_v37 = vld [vmem:[%s1391_s30 + $0x58] sm:$0xff]  ;;  %1252 = vmatpush3.bf16.msra.mxu0 %v1320_v3 }
  0x14   : > { %v330_v23 = vadd.f32 %v1408_v9, %v293_v13  ;;  %v331_v29 = vadd.f32 %v1408_v9, %v294_v19  ;;  %v297_v30 = vmul.f32 %v1401_v6, %v260_v20  ;;  %v332_v34 = vadd.f32 %v1408_v9, %v295_v24  ;;  %1304 = vmatpush3.bf16.msra.mxu1 %v1320_v3  ;;  %v265_v42 = vld [vmem:[%s1391_s30 + $0x60] sm:$0xff]  ;;  %v266_v43 = vld [vmem:[%s1391_s30 + $0x68] sm:$0xff]  ;;  %v267_v53 = vld [vmem:[%s1391_s30 + $0x70] sm:$0xff] }
  0x15   : > { %v359_v27 = vmax.f32 %v327_v17, 0.0  ;;  %v360_v28 = vmax.f32 %v328_v18, 0.0  ;;  %v361_v32 = vmax.f32 %v329_v22, 0.0  ;;  %v333_v35 = vadd.f32 %v1408_v9, %v296_v25  ;;  %1253 = vmatprep.subr.bf16.mxu0 %v1321_v21  ;;  %1297 = vmatprep.subr.bf16.mxu1 %v1321_v21  ;;  %v268_v58 = vld [vmem:[%s1391_s30 + $0x78] sm:$0xff]  ;;  %v269_v59 = vld [vmem:[%s1391_s30 + $0x80] sm:$0xff]  ;;  %v270_v5 = vld [vmem:[%s1391_s30 + $0x88] sm:$0xff] }
  0x16   : > { %v362_v33 = vmax.f32 %v330_v23, 0.0  ;;  %v363_v39 = vmax.f32 %v331_v29, 0.0  ;;  %v334_v40 = vadd.f32 %v1408_v9, %v297_v30  ;;  %v298_v41 = vmul.f32 %v1401_v6, %v261_v26  ;;  %v271_v12 = vld [vmem:[%s1391_s30 + $0x90] sm:$0xff]  ;;  %v272_v17 = vld [vmem:[%s1391_s30 + $0x98] sm:$0xff]  ;;  %v273_v18 = vld [vmem:[%s1391_s30 + $0xa0] sm:$0xff] }
  0x17   : > { %v391_v38 = vpack.c.bf16 %v360_v28, %v359_v27  ;;  %v364_v46 = vmax.f32 %v332_v34, 0.0  ;;  %v365_v47 = vmax.f32 %v333_v35, 0.0  ;;  %v299_v48 = vmul.f32 %v1401_v6, %v262_v31  ;;  %1254 = vmatpush3.bf16.msra.mxu0 %v1321_v21  ;;  %v274_v22 = vld [vmem:[%s1391_s30 + $0xa8] sm:$0xff]  ;;  %v275_v23 = vld [vmem:[%s1391_s30 + $0xb0] sm:$0xff]  ;;  %v1324_v24 = vld [vmem:[%s1691_s2 + $0x38] sm:$0xff]  }
  0x18   : > { %v1449_v45 = vpack.c.bf16 %v362_v33, %v361_v32  ;;  %v366_v49 = vmax.f32 %v334_v40, 0.0  ;;  %v335_v50 = vadd.f32 %v1408_v9, %v298_v41  ;;  %v300_v51 = vmul.f32 %v1401_v6, %v263_v36  ;;  %1305 = vmatpush3.bf16.msra.mxu1 %v1321_v21  ;;  %1255 = vmatprep.subr.bf16.mxu0 %v1322_v44  ;;  %v276_v33 = vld [vmem:[%s1391_s30 + $0xb8] sm:$0xff] }
  0x19   : > { %1130 = vst [vmem:[%s1436_s17] sm:$0xff] %v391_v38   ;;  %1261 = vmatprep.mubr.bf16.mxu0 %v391_v38  ;;  %v301_v52 = vmul.f32 %v1401_v6, %v264_v37  ;;  %v1459_v54 = vpack.c.bf16 %v364_v46, %v363_v39  ;;  %v336_v55 = vadd.f32 %v1408_v9, %v299_v48  ;;  %v277_v38 = vld [vmem:[%s1391_s30 + $0xc0] sm:$0xff] }
  0x1a   : > { %1206 = vst [vmem:[%s1436_s17 + $0x8] sm:$0xff] %v1449_v45   ;;  %v302_v56 = vmul.f32 %v1401_v6, %v265_v42  ;;  %v303_v57 = vmul.f32 %v1401_v6, %v266_v43  ;;  %v1466_v60 = vpack.c.bf16 %v366_v49, %v365_v47  ;;  %v367_v61 = vmax.f32 %v335_v50, 0.0  ;;  %1298 = vmatprep.subr.bf16.mxu1 %v1322_v44  ;;  %v278_v43 = vld [vmem:[%s1391_s30 + $0xc8] sm:$0xff]  ;;  %v279_v49 = vld [vmem:[%s1391_s30 + $0xd0] sm:$0xff] }
  0x1b   : > { %v337_v62 = vadd.f32 %v1408_v9, %v300_v51  ;;  %v338_v63 = vadd.f32 %v1408_v9, %v301_v52  ;;  %1207 = vst [vmem:[%s1436_s17 + $0x10] sm:$0xff] %v1459_v54   ;;  %v368_v1 = vmax.f32 %v336_v55, 0.0  ;;  %v304_v4 = vmul.f32 %v1401_v6, %v267_v53  ;;  %1256 = vmatpush3.bf16.msra.mxu0 %v1322_v44  ;;  %v280_v55 = vld [vmem:[%s1391_s30 + $0xd8] sm:$0xff] }
  0x1c   : > { %v339_v2 = vadd.f32 %v1408_v9, %v302_v56  ;;  %v340_v3 = vadd.f32 %v1408_v9, %v303_v57  ;;  %1208 = vst [vmem:[%s1436_s17 + $0x18] sm:$0xff] %v1466_v60   ;;  %v305_v10 = vmul.f32 %v1401_v6, %v268_v58  ;;  %v306_v11 = vmul.f32 %v1401_v6, %v269_v59 }
  0x1d   : > { %v369_v7 = vmax.f32 %v337_v62, 0.0  ;;  %v370_v8 = vmax.f32 %v338_v63, 0.0  ;;  %v1484_v13 = vpack.c.bf16 %v368_v1, %v367_v61  ;;  %v341_v16 = vadd.f32 %v1408_v9, %v304_v4  ;;  %1306 = vmatpush3.bf16.msra.mxu1 %v1322_v44  ;;  %1257 = vmatprep.subr.bf16.mxu0 %v1323_v0  ;;  %v281_v61 = vld [vmem:[%s1391_s30 + $0xe0] sm:$0xff]  ;;  %v282_v62 = vld [vmem:[%s1391_s30 + $0xe8] sm:$0xff] }
  0x1e   : > { %v371_v14 = vmax.f32 %v339_v2, 0.0  ;;  %v372_v15 = vmax.f32 %v340_v3, 0.0  ;;  %v342_v20 = vadd.f32 %v1408_v9, %v305_v10  ;;  %v307_v21 = vmul.f32 %v1401_v6, %v270_v5  ;;  %1299 = vmatprep.subr.bf16.mxu1 %v1323_v0  ;;  %v283_v2 = vld [vmem:[%s1391_s30 + $0xf0] sm:$0xff] }
  0x1f   : > { %v1489_v19 = vpack.c.bf16 %v370_v8, %v369_v7  ;;  %1209 = vst [vmem:[%s1436_s17 + $0x20] sm:$0xff] %v1484_v13   ;;  %v373_v26 = vmax.f32 %v341_v16, 0.0  ;;  %v343_v27 = vadd.f32 %v1408_v9, %v306_v11  ;;  %v308_v28 = vmul.f32 %v1401_v6, %v271_v12  ;;  %1258 = vmatpush3.bf16.msra.mxu0 %v1323_v0  ;;  %v284_v8 = vld [vmem:[%s1391_s30 + $0xf8] sm:$0xff]  ;;  %s1569_s30 = scalar_lea.vmem %s1693_s4, %s1044_s27 }
  0x20   : > { %v1500_v25 = vpack.c.bf16 %v372_v15, %v371_v14  ;;  %v374_v29 = vmax.f32 %v342_v20, 0.0  ;;  %v344_v30 = vadd.f32 %v1408_v9, %v307_v21  ;;  %v309_v31 = vmul.f32 %v1401_v6, %v272_v17  ;;  %1259 = vmatprep.subr.bf16.mxu0 %v1324_v24 }
  0x21   : > { %1210 = vst [vmem:[%s1436_s17 + $0x28] sm:$0xff] %v1489_v19   ;;  %v310_v32 = vmul.f32 %v1401_v6, %v273_v18  ;;  %v375_v34 = vmax.f32 %v343_v27, 0.0  ;;  %v345_v35 = vadd.f32 %v1408_v9, %v308_v28  ;;  %v311_v36 = vmul.f32 %v1401_v6, %v274_v22  ;;  %1307 = vmatpush3.bf16.msra.mxu1 %v1323_v0 }
  0x22   : > { %1211 = vst [vmem:[%s1436_s17 + $0x30] sm:$0xff] %v1500_v25   ;;  %v312_v37 = vmul.f32 %v1401_v6, %v275_v23  ;;  %v1516_v39 = vpack.c.bf16 %v374_v29, %v373_v26  ;;  %v376_v40 = vmax.f32 %v344_v30, 0.0  ;;  %v346_v41 = vadd.f32 %v1408_v9, %v309_v31  ;;  %1300 = vmatprep.subr.bf16.mxu1 %v1324_v24 }
  0x23   : > { %v347_v42 = vadd.f32 %v1408_v9, %v310_v32  ;;  %v377_v44 = vmax.f32 %v345_v35, 0.0  ;;  %v348_v46 = vadd.f32 %v1408_v9, %v311_v36  ;;  %v313_v47 = vmul.f32 %v1401_v6, %v276_v33  ;;  %1260 = vmatpush3.bf16.msra.mxu0 %v1324_v24 }
  0x24   : > { %v349_v48 = vadd.f32 %v1408_v9, %v312_v37  ;;  %1212 = vst [vmem:[%s1436_s17 + $0x38] sm:$0xff] %v1516_v39   ;;  %v399_v50 = vpack.c.bf16 %v376_v40, %v375_v34  ;;  %v378_v51 = vmax.f32 %v346_v41, 0.0  ;;  %v314_v53 = vmul.f32 %v1401_v6, %v277_v38 }
  0x25   : > { %v379_v52 = vmax.f32 %v347_v42, 0.0  ;;  %v380_v56 = vmax.f32 %v348_v46, 0.0  ;;  %v350_v57 = vadd.f32 %v1408_v9, %v313_v47  ;;  %v315_v59 = vmul.f32 %v1401_v6, %v278_v43  ;;  %1308 = vmatpush3.bf16.msra.mxu1 %v1324_v24 }
  0x26   : > { %v381_v58 = vmax.f32 %v349_v48, 0.0  ;;  %1213 = vst [vmem:[%s1436_s17 + $0x40] sm:$0xff] %v399_v50   ;;  %v400_v63 = vpack.c.bf16 %v378_v51, %v377_v44  ;;  %v351_v0 = vadd.f32 %v1408_v9, %v314_v53  ;;  %v316_v1 = vmul.f32 %v1401_v6, %v279_v49  ;;  %1277 = vmatprep.mubr.bf16.mxu1 %v399_v50 }
  0x27   : > { %v401_v3 = vpack.c.bf16 %v380_v56, %v379_v52  ;;  %v382_v4 = vmax.f32 %v350_v57, 0.0  ;;  %v352_v5 = vadd.f32 %v1408_v9, %v315_v59  ;;  %v317_v7 = vmul.f32 %v1401_v6, %v280_v55  ;;  %1262 = vmatmul.mubr.bf16.vlgmr.msra.gmra.mrb[0].mxu0 %v1449_v45 }
  0x28   : > { %1214 = vst [vmem:[%s1436_s17 + $0x48] sm:$0xff] %v400_v63   ;;  %v383_v10 = vmax.f32 %v351_v0, 0.0  ;;  %v353_v11 = vadd.f32 %v1408_v9, %v316_v1  ;;  %v318_v12 = vmul.f32 %v1401_v6, %v281_v61  ;;  %v319_v14 = vmul.f32 %v1401_v6, %v282_v62  ;;  %1278 = vmatmul.mubr.bf16.vlgmr.msra.gmra.mrb[0].mxu1 %v400_v63 }
  0x29   : > { %1215 = vst [vmem:[%s1436_s17 + $0x50] sm:$0xff] %v401_v3   ;;  %v402_v15 = vpack.c.bf16 %v382_v4, %v381_v58  ;;  %v384_v16 = vmax.f32 %v352_v5, 0.0  ;;  %v354_v17 = vadd.f32 %v1408_v9, %v317_v7  ;;  %v320_v18 = vmul.f32 %v1401_v6, %v283_v2  ;;  %1265 = vmatprep.mubr.bf16.mxu0 %v1459_v54 }
  0x2a   : > { %1281 = vmatprep.mubr.bf16.mxu1 %v401_v3  ;;  %v385_v20 = vmax.f32 %v353_v11, 0.0  ;;  %v355_v21 = vadd.f32 %v1408_v9, %v318_v12  ;;  %v356_v22 = vadd.f32 %v1408_v9, %v319_v14  ;;  %v321_v45 = vmul.f32 %v1401_v6, %v284_v8 }
  0x2b   : > { %1216 = vst [vmem:[%s1436_s17 + $0x58] sm:$0xff] %v402_v15   ;;  %v403_v23 = vpack.c.bf16 %v384_v16, %v383_v10  ;;  %v386_v24 = vmax.f32 %v354_v17, 0.0  ;;  %v357_v26 = vadd.f32 %v1408_v9, %v320_v18 }
  0x2c   : > { %v387_v27 = vmax.f32 %v355_v21, 0.0  ;;  %v388_v28 = vmax.f32 %v356_v22, 0.0  ;;  %v358_v54 = vadd.f32 %v1408_v9, %v321_v45 }
  0x2d   : > { %1217 = vst [vmem:[%s1436_s17 + $0x60] sm:$0xff] %v403_v23   ;;  %v404_v29 = vpack.c.bf16 %v386_v24, %v385_v20  ;;  %v389_v30 = vmax.f32 %v357_v26, 0.0 }
  0x2e   : > { %v405_v31 = vpack.c.bf16 %v388_v28, %v387_v27  ;;  %v390_v32 = vmax.f32 %v358_v54, 0.0 }
  0x2f   : > { %1218 = vst [vmem:[%s1436_s17 + $0x68] sm:$0xff] %v404_v29   ;;  %1266 = vmatmul.mubr.bf16.gmra.mrb[4].mxu0 %v1466_v60 }
  0x30   : > { %1219 = vst [vmem:[%s1436_s17 + $0x70] sm:$0xff] %v405_v31   ;;  %v406_v33 = vpack.c.bf16 %v390_v32, %v389_v30  ;;  %1282 = vmatmul.mubr.bf16.gmra.mrb[4].mxu1 %v402_v15  ;;  %1269 = vmatprep.mubr.bf16.mxu0 %v1484_v13 }
  0x31   : > { %1285 = vmatprep.mubr.bf16.mxu1 %v403_v23 }
  0x32   : > { %1220 = vst [vmem:[%s1436_s17 + $0x78] sm:$0xff] %v406_v33  }
  0x37   : > { %1270 = vmatmul.mubr.bf16.gmra.mrb[8].mxu0 %v1489_v19 }
  0x38   : > { %1286 = vmatmul.mubr.bf16.gmra.mrb[8].mxu1 %v404_v29  ;;  %1273 = vmatprep.mubr.bf16.mxu0 %v1500_v25 }
  0x39   : > { %1289 = vmatprep.mubr.bf16.mxu1 %v405_v31 }
  0x3f   : > { %1274 = vmatmul.mubr.bf16.gmra.mrb[12].mxu0 %v1516_v39 }
  0x40   : > { %1290 = vmatmul.mubr.bf16.gmra.mrb[12].mxu1 %v406_v33 }
  0xfa   : > { %v1263_v6 = vpop.f32.mrb[0].mxu0 }
  0xfb   : > { %v1571_v9 = vpop.f32.mrb[0].mxu1  ;;  %778 = vst [vmem:[%s1569_s30 + $0x10] sm:$0xff] %v1263_v6  ;;  %v649_v60 = vpop.f32.mrb[1].mxu0  ;;  %v847_v39 = vmul.f32 %v1263_v6, %v1263_v6 }
  0xfc   : > { %794 = vst [vmem:[%s1569_s30 + $0x90] sm:$0xff] %v1571_v9  ;;  %v1576_v13 = vpop.f32.mrb[1].mxu1  ;;  %776 = vst [vmem:[%s1569_s30] sm:$0xff] %v649_v60  ;;  %v1264_v19 = vpop.f32.mrb[2].mxu0  ;;  %v845_v36 = vmul.f32 %v649_v60, %v649_v60 }
  0xfd   : > { %792 = vst [vmem:[%s1569_s30 + $0x80] sm:$0xff] %v1576_v13  ;;  %v1581_v25 = vpop.f32.mrb[2].mxu1  ;;  %779 = vst [vmem:[%s1569_s30 + $0x18] sm:$0xff] %v1264_v19  ;;  %v652_v34 = vpop.f32.mrb[3].mxu0  ;;  %v848_v42 = vmul.f32 %v1264_v19, %v1264_v19 }
  0xfe   : > { %795 = vst [vmem:[%s1569_s30 + $0x98] sm:$0xff] %v1581_v25  ;;  %v1586_v35 = vpop.f32.mrb[3].mxu1  ;;  %777 = vst [vmem:[%s1569_s30 + $0x8] sm:$0xff] %v652_v34  ;;  %v808_v37 = vadd.f32 %v652_v34, %v649_v60  ;;  %v846_v38 = vmul.f32 %v652_v34, %v652_v34 }
  0xff   : > { %793 = vst [vmem:[%s1569_s30 + $0x88] sm:$0xff] %v1586_v35 }
 0x100   : > { %v809_v40 = vadd.f32 %v1263_v6, %v808_v37  ;;  %v877_v41 = vadd.f32 %v846_v38, %v845_v36 }
 0x102   : > { %v878_v43 = vadd.f32 %v877_v41, %v847_v39  ;;  %v1267_v44 = vpop.f32.mrb[4].mxu0  ;;  %v810_v46 = vadd.f32 %v1264_v19, %v809_v40 }
 0x103   : > { %v1591_v47 = vpop.f32.mrb[4].mxu1  ;;  %782 = vst [vmem:[%s1569_s30 + $0x30] sm:$0xff] %v1267_v44  ;;  %v665_v48 = vpop.f32.mrb[5].mxu0  ;;  %v851_v62 = vmul.f32 %v1267_v44, %v1267_v44 }
 0x104   : > { %798 = vst [vmem:[%s1569_s30 + $0xb0] sm:$0xff] %v1591_v47  ;;  %v1596_v49 = vpop.f32.mrb[5].mxu1  ;;  %780 = vst [vmem:[%s1569_s30 + $0x20] sm:$0xff] %v665_v48  ;;  %v811_v50 = vadd.f32 %v810_v46, %v665_v48  ;;  %v849_v51 = vmul.f32 %v665_v48, %v665_v48  ;;  %v879_v52 = vadd.f32 %v878_v43, %v848_v42  ;;  %v1268_v53 = vpop.f32.mrb[6].mxu0 }
 0x105   : > { %796 = vst [vmem:[%s1569_s30 + $0xa0] sm:$0xff] %v1596_v49  ;;  %v1601_v55 = vpop.f32.mrb[6].mxu1  ;;  %783 = vst [vmem:[%s1569_s30 + $0x38] sm:$0xff] %v1268_v53  ;;  %v668_v56 = vpop.f32.mrb[7].mxu0  ;;  %v852_v1 = vmul.f32 %v1268_v53, %v1268_v53  ;;  %v861_v46 = vmul.f32 %v1576_v13, %v1576_v13 }
 0x106   : > { %799 = vst [vmem:[%s1569_s30 + $0xb8] sm:$0xff] %v1601_v55  ;;  %v1606_v57 = vpop.f32.mrb[7].mxu1  ;;  %v880_v58 = vadd.f32 %v879_v52, %v849_v51  ;;  %781 = vst [vmem:[%s1569_s30 + $0x28] sm:$0xff] %v668_v56  ;;  %v812_v59 = vadd.f32 %v811_v50, %v668_v56  ;;  %v850_v61 = vmul.f32 %v668_v56, %v668_v56 }
 0x107   : > { %797 = vst [vmem:[%s1569_s30 + $0xa8] sm:$0xff] %v1606_v57  ;;  %v863_v56 = vmul.f32 %v1571_v9, %v1571_v9 }
 0x108   : > { %v813_v63 = vadd.f32 %v1267_v44, %v812_v59  ;;  %v881_v0 = vadd.f32 %v880_v58, %v850_v61  ;;  %v864_v61 = vmul.f32 %v1581_v25, %v1581_v25 }
 0x10a   : > { %v882_v2 = vadd.f32 %v881_v0, %v851_v62  ;;  %v1271_v3 = vpop.f32.mrb[8].mxu0  ;;  %v814_v4 = vadd.f32 %v1268_v53, %v813_v63  ;;  %v862_v53 = vmul.f32 %v1586_v35, %v1586_v35 }
 0x10b   : > { %v1611_v5 = vpop.f32.mrb[8].mxu1  ;;  %786 = vst [vmem:[%s1569_s30 + $0x50] sm:$0xff] %v1271_v3  ;;  %v681_v7 = vpop.f32.mrb[9].mxu0  ;;  %v855_v22 = vmul.f32 %v1271_v3, %v1271_v3 }
 0x10c   : > { %802 = vst [vmem:[%s1569_s30 + $0xd0] sm:$0xff] %v1611_v5  ;;  %v1616_v8 = vpop.f32.mrb[9].mxu1  ;;  %784 = vst [vmem:[%s1569_s30 + $0x40] sm:$0xff] %v681_v7  ;;  %v815_v10 = vadd.f32 %v814_v4, %v681_v7  ;;  %v853_v11 = vmul.f32 %v681_v7, %v681_v7  ;;  %v883_v12 = vadd.f32 %v882_v2, %v852_v1  ;;  %v1272_v14 = vpop.f32.mrb[10].mxu0 }
 0x10d   : > { %800 = vst [vmem:[%s1569_s30 + $0xc0] sm:$0xff] %v1616_v8  ;;  %v1621_v15 = vpop.f32.mrb[10].mxu1  ;;  %787 = vst [vmem:[%s1569_s30 + $0x58] sm:$0xff] %v1272_v14  ;;  %v684_v16 = vpop.f32.mrb[11].mxu0  ;;  %v856_v24 = vmul.f32 %v1272_v14, %v1272_v14 }
 0x10e   : > { %803 = vst [vmem:[%s1569_s30 + $0xd8] sm:$0xff] %v1621_v15  ;;  %v1626_v17 = vpop.f32.mrb[11].mxu1  ;;  %v884_v18 = vadd.f32 %v883_v12, %v853_v11  ;;  %785 = vst [vmem:[%s1569_s30 + $0x48] sm:$0xff] %v684_v16  ;;  %v816_v20 = vadd.f32 %v815_v10, %v684_v16  ;;  %v854_v21 = vmul.f32 %v684_v16, %v684_v16 }
 0x10f   : > { %801 = vst [vmem:[%s1569_s30 + $0xc8] sm:$0xff] %v1626_v17 }
 0x110   : > { %v817_v45 = vadd.f32 %v1271_v3, %v816_v20  ;;  %v885_v23 = vadd.f32 %v884_v18, %v854_v21  ;;  %v866_v3 = vmul.f32 %v1606_v57, %v1606_v57  ;;  %v870_v18 = vmul.f32 %v1626_v17, %v1626_v17 }
 0x112   : > { %v886_v26 = vadd.f32 %v885_v23, %v855_v22  ;;  %v1275_v27 = vpop.f32.mrb[12].mxu0  ;;  %v818_v28 = vadd.f32 %v1272_v14, %v817_v45 }
 0x113   : > { %v1631_v54 = vpop.f32.mrb[12].mxu1  ;;  %790 = vst [vmem:[%s1569_s30 + $0x70] sm:$0xff] %v1275_v27  ;;  %v697_v29 = vpop.f32.mrb[13].mxu0  ;;  %v859_v39 = vmul.f32 %v1275_v27, %v1275_v27 }
 0x114   : > { %806 = vst [vmem:[%s1569_s30 + $0xf0] sm:$0xff] %v1631_v54  ;;  %v761_v30 = vpop.f32.mrb[13].mxu1  ;;  %788 = vst [vmem:[%s1569_s30 + $0x60] sm:$0xff] %v697_v29  ;;  %v819_v31 = vadd.f32 %v818_v28, %v697_v29  ;;  %v857_v32 = vmul.f32 %v697_v29, %v697_v29  ;;  %v887_v33 = vadd.f32 %v886_v26, %v856_v24  ;;  %v1276_v6 = vpop.f32.mrb[14].mxu0 }
 0x115   : > { %804 = vst [vmem:[%s1569_s30 + $0xe0] sm:$0xff] %v761_v30  ;;  %v1292_v60 = vpop.f32.mrb[14].mxu1  ;;  %791 = vst [vmem:[%s1569_s30 + $0x78] sm:$0xff] %v1276_v6  ;;  %v700_v19 = vpop.f32.mrb[15].mxu0  ;;  %v860_v42 = vmul.f32 %v1276_v6, %v1276_v6  ;;  %v873_v45 = vmul.f32 %v761_v30, %v761_v30  ;;  %v875_v28 = vmul.f32 %v1631_v54, %v1631_v54 }
 0x116   : > { %807 = vst [vmem:[%s1569_s30 + $0xf8] sm:$0xff] %v1292_v60  ;;  %v764_v34 = vpop.f32.mrb[15].mxu1  ;;  %v888_v36 = vadd.f32 %v887_v33, %v857_v32  ;;  %789 = vst [vmem:[%s1569_s30 + $0x68] sm:$0xff] %v700_v19  ;;  %v820_v37 = vadd.f32 %v819_v31, %v700_v19  ;;  %v858_v38 = vmul.f32 %v700_v19, %v700_v19 }
 0x117   : > { %805 = vst [vmem:[%s1569_s30 + $0xe8] sm:$0xff] %v764_v34  ;;  %v876_v31 = vmul.f32 %v1292_v60, %v1292_v60 }
 0x118   : > { %v821_v40 = vadd.f32 %v1275_v27, %v820_v37  ;;  %v889_v41 = vadd.f32 %v888_v36, %v858_v38 }
 0x11a   : > { %v890_v43 = vadd.f32 %v889_v41, %v859_v39  ;;  %v822_v44 = vadd.f32 %v1276_v6, %v821_v40 }
 0x11c   : > { %v823_v48 = vadd.f32 %v822_v44, %v1576_v13  ;;  %v891_v50 = vadd.f32 %v890_v43, %v860_v42  ;;  %v865_v13 = vmul.f32 %v1596_v49, %v1596_v49 }
 0x11e   : > { %v892_v51 = vadd.f32 %v891_v50, %v861_v46  ;;  %v824_v52 = vadd.f32 %v823_v48, %v1586_v35 }
 0x120   : > { %v825_v58 = vadd.f32 %v1571_v9, %v824_v52  ;;  %v893_v59 = vadd.f32 %v892_v51, %v862_v53  ;;  %v867_v9 = vmul.f32 %v1591_v47, %v1591_v47 }
 0x122   : > { %v894_v62 = vadd.f32 %v893_v59, %v863_v56  ;;  %v826_v63 = vadd.f32 %v1581_v25, %v825_v58  ;;  %v868_v25 = vmul.f32 %v1601_v55, %v1601_v55 }
 0x124   : > { %v827_v0 = vadd.f32 %v826_v63, %v1596_v49  ;;  %v895_v1 = vadd.f32 %v894_v62, %v864_v61  ;;  %v869_v49 = vmul.f32 %v1616_v8, %v1616_v8 }
 0x126   : > { %v896_v2 = vadd.f32 %v895_v1, %v865_v13  ;;  %v828_v35 = vadd.f32 %v827_v0, %v1606_v57 }
 0x128   : > { %v829_v4 = vadd.f32 %v1591_v47, %v828_v35  ;;  %v897_v7 = vadd.f32 %v896_v2, %v866_v3  ;;  %v871_v47 = vmul.f32 %v1611_v5, %v1611_v5 }
 0x12a   : > { %v898_v10 = vadd.f32 %v897_v7, %v867_v9  ;;  %v830_v11 = vadd.f32 %v1601_v55, %v829_v4  ;;  %v872_v55 = vmul.f32 %v1621_v15, %v1621_v15 }
 0x12c   : > { %v831_v12 = vadd.f32 %v830_v11, %v1616_v8  ;;  %v899_v14 = vadd.f32 %v898_v10, %v868_v25 }
 0x12e   : > { %v900_v16 = vadd.f32 %v899_v14, %v869_v49  ;;  %v832_v57 = vadd.f32 %v831_v12, %v1626_v17  ;;  %v874_v17 = vmul.f32 %v764_v34, %v764_v34 }
 0x130   : > { %v833_v20 = vadd.f32 %v1611_v5, %v832_v57  ;;  %v901_v21 = vadd.f32 %v900_v16, %v870_v18 }
 0x132   : > { %v902_v22 = vadd.f32 %v901_v21, %v871_v47  ;;  %v834_v8 = vadd.f32 %v1621_v15, %v833_v20 }
 0x134   : > { %v835_v23 = vadd.f32 %v834_v8, %v761_v30  ;;  %v903_v24 = vadd.f32 %v902_v22, %v872_v55 }
 0x136   : > { %v904_v26 = vadd.f32 %v903_v24, %v873_v45  ;;  %v836_v27 = vadd.f32 %v835_v23, %v764_v34 }
 0x138   : > { %v837_v5 = vadd.f32 %v1631_v54, %v836_v27  ;;  %v905_v29 = vadd.f32 %v904_v26, %v874_v17 }
 0x13a   : > { %v838_v32 = vadd.f32 %v1292_v60, %v837_v5  ;;  %v906_v33 = vadd.f32 %v905_v29, %v875_v28 }
 0x13c   : > { %v839_v6 = vrot.slane %v838_v32, 4  ;;  %v907_v19 = vadd.f32 %v906_v33, %v876_v31 }
 0x13e   : > { %v840_v15 = vadd.f32 %v839_v6, %v838_v32  ;;  %v908_v36 = vrot.slane %v907_v19, 4 }
 0x140   : > { %v841_v30 = vrot.slane %v840_v15, 2  ;;  %v909_v37 = vadd.f32 %v908_v36, %v907_v19 }
 0x142   : > { %v842_v38 = vadd.f32 %v841_v30, %v840_v15  ;;  %v910_v39 = vrot.slane %v909_v37, 2 }
 0x144   : > { %v843_v34 = vrot.slane %v842_v38, 1  ;;  %v911_v40 = vadd.f32 %v910_v39, %v909_v37 }
 0x146   : > { %v912_v41 = vrot.slane %v911_v40, 1  ;;  %v844_v54 = vadd.f32 %v843_v34, %v842_v38 }
 0x148   : > { %v913_v60 = vadd.f32 %v912_v41, %v911_v40 }
 0x14a   : > { %v915_v42 = vsel %vm914_vm0, %v844_v54, %v913_v60 }
 0x14b   : > { %916 = vst [vmem:[%s251_s7] sm:$0x3] %v915_v42 }
 0x14c PF: > { %s16_s18 = sadd.s32 1, %s1331_s18  }
 0x14d   : > { %p13_p5 = scmp.ge.s32.totalorder %s16_s18, 6  }
 0x14f   :  { %15 = sbr.rel (!%p13_p5) target bundleno = 1 (0x1), region = 86 }

// kernel: _lambda_.7
= control target key start
LH: loop header
LB: loop body
LE: loop exit
PB: predicated region body
PF: predicated region fallthrough
CT: control target
= control target key end

     0   :  { %7 = vsyncpa [#allocation3], 0  ;;  %s1284_s0 = inlined_call_operand.vmem [shape: bf16[1024,256], index: 0, kind: input, shape index: {}]   ;;  %s1285_s1 = inlined_call_operand.vmem [shape: f32[2,256], index: 1, kind: input, shape index: {}]   ;;  %s1286_s2 = inlined_call_operand.hbm [shape: bf16[1024,256], index: 2, kind: output, shape index: {}]  }
   0x1   :  { %9 = vsyncpa [#allocation3 + $0x1], 0  ;;  %s967_s9 = smov 0   ;;  %s969_s10 = smov 0  }
   0x2   :  { %s971_s11 = smov 0   ;;  %s973_s12 = smov 0  }
   0x3 LB: > { %s988_s13 = sadd.s32 4294967295, %s947_s12   ;;  %s762_s14 = sadd.s32 4294967294, %s947_s12   ;;  %s947_s12 = sphi %s973_s12, %s1292_s12   ;;  %s943_s11 = sphi %s971_s11, %s1291_s11   ;;  %s939_s10 = sphi %s969_s10, %s1290_s10   ;;  %s935_s9 = sphi %s967_s9, %s1289_s9  }
   0x4   : > { %s992_s15 = sadd.s32 1, %s947_s12   ;;  %s69_s16 = sadd.s32 1, %s943_s11 }
   0x5   : > { %s66_s17 = ssub.s32 %s947_s12, %s992_s15  ;;  %p79_p0 = scmp.ne.s32.totalorder %s943_s11, %s939_s10 }
   0x6   : > { %p67_p1 = scmp.eq.s32.totalorder %s66_s17, 0  ;;  %p80_p2 = scmp.eq.s32.totalorder %s988_s13, 3 }
   0x7   : > { %p85_p3 = scmp.ne.s32.totalorder %s939_s10, %s935_s9  ;;  %p86_p4 = scmp.eq.s32.totalorder %s762_s14, 3 }
   0x8   : > { %s1003_s18 = scalar_select %p67_p1, %s943_s11, %s69_s16  }
   0x9   : > { %p1005_p5 = por %p80_p2, %p79_p0  ;;  %p1009_p6 = por %p86_p4, %p85_p3 }
   0xa   : > { %p765_p7 = scmp.ge.s32.totalorder %s947_s12, 1  ;;  %p117_p8 = scmp.lt.s32.totalorder %s947_s12, 5 }
   0xc   : > { %p118_p9 = pnand %p765_p7, %p117_p8 }
   0xd   : > { %s767_s21 = sshll.u32 (!%p118_p9), %s988_s13, 5  ;;  %v246_v0 = vlaneseq (!%p118_p9)  ;;  %v244_v2 = vld [vmem:[%s1285_s1] ss:$2 sm:$0x3] (!%p118_p9)  ;;  %s137_s30 = sand.u32 (!%p118_p9), 1, %s939_s10  }
   0xe   : > { %121 = sbr.rel (%p118_p9) target bundleno = 117 (0x75), region = 28  ;;  %p141_p10 = scmp.lt.s32.totalorder (!%p118_p9), %s767_s21, 127  ;;  %v770_v5 = vld [vmem:[%s1285_s1 + $0x1] ss:$2 sm:$0x3] (!%p118_p9) }
   0xf   : > { %v247_v1 = vshrl.u32 (!%p118_p9), %v246_v0, 7  ;;  %s766_s3 = sshll.u32 (!%p118_p9), %s137_s30, 8  ;;  %s843_s5 = sshll.u32 (!%p118_p9), %s988_s13, 12 }
  0x10   : > { %s1062_s4 = scalar_lea.vmem (!%p118_p9), [#allocation2], %s766_s3  ;;  %s1235_s14 = scalar_lea.hbm (!%p118_p9), %s1286_s2, %s843_s5 }
  0x11   : > { %v248_v3 = vsub.s32 (!%p118_p9), 0, %v247_v1  ;;  %v252_v4 = vsub.s32 (!%p118_p9), 1, %v247_v1  ;;  %s700_s6 = sshll.u32 (!%p118_p9), %s1062_s4, 4  ;;  %s1243_s13 = scalar_lea.sflag (!%p118_p9), [#allocation3], %s137_s30  ;;  %s1237_s6 = int_to_ptr.vmem [resolvable:$true] %s700_s6 }
  0x12   : > { %s885_s16 = scalar_lea.vmem (!%p118_p9), %s1237_s6, 4096  ;;  %s949_s17 = smov (!%p118_p9), [#allocation2]  }
  0x13   : > { %v1027_v6 = vrot.slane (!%p118_p9), %v244_v2, %v248_v3  ;;  %v1029_v7 = vrot.slane (!%p118_p9), %v244_v2, %v252_v4  ;;  %v1032_v9 = vrot.slane (!%p118_p9), %v770_v5, %v248_v3  ;;  %v1034_v10 = vrot.slane (!%p118_p9), %v770_v5, %v252_v4  ;;  %p886_p11 = scmp.ne.s32.totalorder (!%p118_p9), %s1237_s6, %s885_s16 }
  0x15   : > { %s1294_s21 = smov (!%p141_p10, %s767_s21), 127  ;;  %p887_p12 = pnand %p886_p11, %p1005_p5 }
  0x16   : > { %s809_s26 = sshll.u32 %s1294_s21, 3  ;;  %s889_s21 = sshll.u32 %s949_s17, 4  ;;  %s890_s21 = int_to_ptr.vmem [resolvable:$false] %s889_s21 }
  0x17   : > { %s1025_s29 = scalar_lea.vmem %s1284_s0, %s809_s26  ;;  %p888_p13 = pneg %p887_p12 }
  0x18   : > { %v148_v8 = vld [vmem:[%s1025_s29] sm:$0xff]  ;;  %v149_v11 = vld [vmem:[%s1025_s29 + $0x8] sm:$0xff]  ;;  %v150_v12 = vld [vmem:[%s1025_s29 + $0x10] sm:$0xff]  ;;  %s891_s22 = scalar_lea.vmem %s890_s21, 8192  ;;  %p892_p0 = scmp.lt.s32.totalorder %s1237_s6, %s890_s21 }
  0x19   : > { %v180_v13 = vunpack.c.l.bf16 %v148_v8  ;;  %v181_v14 = vunpack.c.h.bf16 %v148_v8  ;;  %v182_v15 = vunpack.c.l.bf16 %v149_v11  ;;  %v183_v16 = vunpack.c.h.bf16 %v149_v11  ;;  %v151_v17 = vld [vmem:[%s1025_s29 + $0x18] sm:$0xff]  ;;  %v152_v38 = vld [vmem:[%s1025_s29 + $0x20] sm:$0xff]  ;;  %v153_v43 = vld [vmem:[%s1025_s29 + $0x28] sm:$0xff]  ;;  %p893_p1 = scmp.lt.s32.totalorder %s891_s22, %s885_s16 }
  0x1a   : > { %v184_v18 = vunpack.c.l.bf16 %v150_v12  ;;  %v185_v19 = vunpack.c.h.bf16 %v150_v12  ;;  %v186_v20 = vunpack.c.l.bf16 %v151_v17  ;;  %v187_v21 = vunpack.c.h.bf16 %v151_v17  ;;  %v154_v48 = vld [vmem:[%s1025_s29 + $0x30] sm:$0xff]  ;;  %v155_v53 = vld [vmem:[%s1025_s29 + $0x38] sm:$0xff] }
  0x1b   : > { %v256_v22 = vmul.f32 %v1027_v6, %v180_v13  ;;  %v257_v23 = vmul.f32 %v1029_v7, %v181_v14  ;;  %v258_v24 = vmul.f32 %v1027_v6, %v182_v15  ;;  %v259_v25 = vmul.f32 %v1029_v7, %v183_v16  ;;  %v156_v14 = vld [vmem:[%s1025_s29 + $0x40] sm:$0xff]  ;;  %p894_p2 = por %p893_p1, %p892_p0 }
  0x1c   : > { %v260_v26 = vmul.f32 %v1027_v6, %v184_v18  ;;  %v261_v27 = vmul.f32 %v1029_v7, %v185_v19  ;;  %v262_v28 = vmul.f32 %v1027_v6, %v186_v20  ;;  %v263_v29 = vmul.f32 %v1029_v7, %v187_v21 }
  0x1d   : > { %v333_v30 = vadd.f32 %v1032_v9, %v256_v22  ;;  %v334_v31 = vadd.f32 %v1034_v10, %v257_v23  ;;  %v335_v32 = vadd.f32 %v1032_v9, %v258_v24  ;;  %v336_v33 = vadd.f32 %v1034_v10, %v259_v25  ;;  %v157_v23 = vld [vmem:[%s1025_s29 + $0x48] sm:$0xff]  ;;  %p895_p3 = pnand %p894_p2, %p888_p13 }
  0x1e   : > { %v337_v34 = vadd.f32 %v1032_v9, %v260_v26  ;;  %v338_v35 = vadd.f32 %v1034_v10, %v261_v27  ;;  %v339_v36 = vadd.f32 %v1032_v9, %v262_v28  ;;  %v340_v37 = vadd.f32 %v1034_v10, %v263_v29  ;;  %v158_v28 = vld [vmem:[%s1025_s29 + $0x50] sm:$0xff] }
  0x1f   : > { %v397_v39 = vmax.f32 %v333_v30, 0.0  ;;  %v398_v40 = vmax.f32 %v334_v31, 0.0  ;;  %v399_v41 = vmax.f32 %v335_v32, 0.0  ;;  %v400_v42 = vmax.f32 %v336_v33, 0.0  ;;  %v159_v33 = vld [vmem:[%s1025_s29 + $0x58] sm:$0xff] }
  0x20   : > { %v401_v44 = vmax.f32 %v337_v34, 0.0  ;;  %v402_v45 = vmax.f32 %v338_v35, 0.0  ;;  %v403_v46 = vmax.f32 %v339_v36, 0.0  ;;  %v404_v47 = vmax.f32 %v340_v37, 0.0 }
  0x21   : > { %v810_v49 = vpack.c.bf16 %v398_v40, %v397_v39  ;;  %v811_v50 = vpack.c.bf16 %v400_v42, %v399_v41  ;;  %v188_v51 = vunpack.c.l.bf16 %v152_v38  ;;  %v189_v52 = vunpack.c.h.bf16 %v152_v38 }
  0x22   : > { %v812_v54 = vpack.c.bf16 %v402_v45, %v401_v44  ;;  %v813_v55 = vpack.c.bf16 %v404_v47, %v403_v46  ;;  %v190_v56 = vunpack.c.l.bf16 %v153_v43  ;;  %v191_v57 = vunpack.c.h.bf16 %v153_v43 }
  0x23   : > { %653 = vst [vmem:[%s1062_s4] sm:$0xff] %v810_v49  ;;  %654 = vst [vmem:[%s1062_s4 + $0x8] sm:$0xff] %v811_v50  ;;  %v264_v58 = vmul.f32 %v1027_v6, %v188_v51  ;;  %v265_v59 = vmul.f32 %v1029_v7, %v189_v52  ;;  %v192_v60 = vunpack.c.l.bf16 %v154_v48  ;;  %v193_v61 = vunpack.c.h.bf16 %v154_v48  ;;  %v160_v50 = vld [vmem:[%s1025_s29 + $0x60] sm:$0xff] }
  0x24   : > { %655 = vst [vmem:[%s1062_s4 + $0x10] sm:$0xff] %v812_v54  ;;  %656 = vst [vmem:[%s1062_s4 + $0x18] sm:$0xff] %v813_v55  ;;  %v266_v62 = vmul.f32 %v1027_v6, %v190_v56  ;;  %v267_v63 = vmul.f32 %v1029_v7, %v191_v57  ;;  %v194_v0 = vunpack.c.l.bf16 %v155_v53  ;;  %v195_v1 = vunpack.c.h.bf16 %v155_v53 }
  0x25   : > { %v341_v2 = vadd.f32 %v1032_v9, %v264_v58  ;;  %v342_v3 = vadd.f32 %v1034_v10, %v265_v59  ;;  %v268_v4 = vmul.f32 %v1027_v6, %v192_v60  ;;  %v269_v5 = vmul.f32 %v1029_v7, %v193_v61 }
  0x26   : > { %v343_v8 = vadd.f32 %v1032_v9, %v266_v62  ;;  %v344_v11 = vadd.f32 %v1034_v10, %v267_v63  ;;  %v270_v12 = vmul.f32 %v1027_v6, %v194_v0  ;;  %v271_v13 = vmul.f32 %v1029_v7, %v195_v1  ;;  %v161_v63 = vld [vmem:[%s1025_s29 + $0x68] sm:$0xff] }
  0x27   : > { %v405_v15 = vmax.f32 %v341_v2, 0.0  ;;  %v406_v16 = vmax.f32 %v342_v3, 0.0  ;;  %v345_v17 = vadd.f32 %v1032_v9, %v268_v4  ;;  %v346_v18 = vadd.f32 %v1034_v10, %v269_v5  ;;  %v162_v4 = vld [vmem:[%s1025_s29 + $0x70] sm:$0xff] }
  0x28   : > { %v407_v19 = vmax.f32 %v343_v8, 0.0  ;;  %v408_v20 = vmax.f32 %v344_v11, 0.0  ;;  %v347_v21 = vadd.f32 %v1032_v9, %v270_v12  ;;  %v348_v22 = vadd.f32 %v1034_v10, %v271_v13  ;;  %v163_v13 = vld [vmem:[%s1025_s29 + $0x78] sm:$0xff] }
  0x29   : > { %v814_v24 = vpack.c.bf16 %v406_v16, %v405_v15  ;;  %v409_v25 = vmax.f32 %v345_v17, 0.0  ;;  %v410_v26 = vmax.f32 %v346_v18, 0.0  ;;  %v196_v27 = vunpack.c.l.bf16 %v156_v14 }
  0x2a   : > { %v815_v29 = vpack.c.bf16 %v408_v20, %v407_v19  ;;  %v411_v30 = vmax.f32 %v347_v21, 0.0  ;;  %v412_v31 = vmax.f32 %v348_v22, 0.0  ;;  %v197_v32 = vunpack.c.h.bf16 %v156_v14 }
  0x2b   : > { %657 = vst [vmem:[%s1062_s4 + $0x20] sm:$0xff] %v814_v24  ;;  %v816_v34 = vpack.c.bf16 %v410_v26, %v409_v25  ;;  %v272_v35 = vmul.f32 %v1027_v6, %v196_v27  ;;  %v198_v36 = vunpack.c.l.bf16 %v157_v23  ;;  %v199_v37 = vunpack.c.h.bf16 %v157_v23  ;;  %v164_v26 = vld [vmem:[%s1025_s29 + $0x80] sm:$0xff] }
  0x2c   : > { %658 = vst [vmem:[%s1062_s4 + $0x28] sm:$0xff] %v815_v29  ;;  %v817_v38 = vpack.c.bf16 %v412_v31, %v411_v30  ;;  %v273_v39 = vmul.f32 %v1029_v7, %v197_v32  ;;  %v200_v40 = vunpack.c.l.bf16 %v158_v28  ;;  %v201_v41 = vunpack.c.h.bf16 %v158_v28 }
  0x2d   : > { %659 = vst [vmem:[%s1062_s4 + $0x30] sm:$0xff] %v816_v34  ;;  %v349_v42 = vadd.f32 %v1032_v9, %v272_v35  ;;  %v274_v43 = vmul.f32 %v1027_v6, %v198_v36  ;;  %v275_v44 = vmul.f32 %v1029_v7, %v199_v37  ;;  %v202_v45 = vunpack.c.l.bf16 %v159_v33 }
  0x2e   : > { %660 = vst [vmem:[%s1062_s4 + $0x38] sm:$0xff] %v817_v38  ;;  %v350_v46 = vadd.f32 %v1034_v10, %v273_v39  ;;  %v276_v47 = vmul.f32 %v1027_v6, %v200_v40  ;;  %v277_v48 = vmul.f32 %v1029_v7, %v201_v41  ;;  %v203_v49 = vunpack.c.h.bf16 %v159_v33 }
  0x2f   : > { %v413_v51 = vmax.f32 %v349_v42, 0.0  ;;  %v351_v52 = vadd.f32 %v1032_v9, %v274_v43  ;;  %v352_v53 = vadd.f32 %v1034_v10, %v275_v44  ;;  %v278_v54 = vmul.f32 %v1027_v6, %v202_v45  ;;  %v165_v43 = vld [vmem:[%s1025_s29 + $0x88] sm:$0xff] }
  0x30   : > { %v414_v55 = vmax.f32 %v350_v46, 0.0  ;;  %v353_v56 = vadd.f32 %v1032_v9, %v276_v47  ;;  %v354_v57 = vadd.f32 %v1034_v10, %v277_v48  ;;  %v279_v58 = vmul.f32 %v1029_v7, %v203_v49  ;;  %v166_v48 = vld [vmem:[%s1025_s29 + $0x90] sm:$0xff] }
  0x31   : > { %v415_v59 = vmax.f32 %v351_v52, 0.0  ;;  %v416_v60 = vmax.f32 %v352_v53, 0.0  ;;  %v355_v61 = vadd.f32 %v1032_v9, %v278_v54  ;;  %v204_v62 = vunpack.c.l.bf16 %v160_v50  ;;  %v167_v53 = vld [vmem:[%s1025_s29 + $0x98] sm:$0xff] }
  0x32   : > { %v818_v0 = vpack.c.bf16 %v414_v55, %v413_v51  ;;  %v417_v1 = vmax.f32 %v353_v56, 0.0  ;;  %v418_v2 = vmax.f32 %v354_v57, 0.0  ;;  %v356_v3 = vadd.f32 %v1034_v10, %v279_v58 }
  0x33   : > { %v819_v5 = vpack.c.bf16 %v416_v60, %v415_v59  ;;  %v419_v8 = vmax.f32 %v355_v61, 0.0  ;;  %v205_v11 = vunpack.c.h.bf16 %v160_v50  ;;  %v280_v12 = vmul.f32 %v1027_v6, %v204_v62 }
  0x34   : > { %661 = vst [vmem:[%s1062_s4 + $0x40] sm:$0xff] %v818_v0  ;;  %v820_v14 = vpack.c.bf16 %v418_v2, %v417_v1  ;;  %v420_v15 = vmax.f32 %v356_v3, 0.0  ;;  %v206_v16 = vunpack.c.l.bf16 %v161_v63  ;;  %v207_v17 = vunpack.c.h.bf16 %v161_v63  ;;  %v168_v2 = vld [vmem:[%s1025_s29 + $0xa0] sm:$0xff] }
  0x35   : > { %662 = vst [vmem:[%s1062_s4 + $0x48] sm:$0xff] %v819_v5  ;;  %v281_v18 = vmul.f32 %v1029_v7, %v205_v11  ;;  %v357_v19 = vadd.f32 %v1032_v9, %v280_v12  ;;  %v208_v20 = vunpack.c.l.bf16 %v162_v4  ;;  %v209_v21 = vunpack.c.h.bf16 %v162_v4 }
  0x36   : > { %663 = vst [vmem:[%s1062_s4 + $0x50] sm:$0xff] %v820_v14  ;;  %v821_v22 = vpack.c.bf16 %v420_v15, %v419_v8  ;;  %v282_v23 = vmul.f32 %v1027_v6, %v206_v16  ;;  %v283_v24 = vmul.f32 %v1029_v7, %v207_v17  ;;  %v210_v25 = vunpack.c.l.bf16 %v163_v13 }
  0x37   : > { %v358_v27 = vadd.f32 %v1034_v10, %v281_v18  ;;  %v421_v28 = vmax.f32 %v357_v19, 0.0  ;;  %v284_v29 = vmul.f32 %v1027_v6, %v208_v20  ;;  %v285_v30 = vmul.f32 %v1029_v7, %v209_v21  ;;  %v169_v19 = vld [vmem:[%s1025_s29 + $0xa8] sm:$0xff] }
  0x38   : > { %664 = vst [vmem:[%s1062_s4 + $0x58] sm:$0xff] %v821_v22  ;;  %v359_v31 = vadd.f32 %v1032_v9, %v282_v23  ;;  %v360_v32 = vadd.f32 %v1034_v10, %v283_v24  ;;  %v211_v33 = vunpack.c.h.bf16 %v163_v13  ;;  %v286_v34 = vmul.f32 %v1027_v6, %v210_v25 }
  0x39   : > { %v422_v35 = vmax.f32 %v358_v27, 0.0  ;;  %v361_v36 = vadd.f32 %v1032_v9, %v284_v29  ;;  %v362_v37 = vadd.f32 %v1034_v10, %v285_v30  ;;  %v212_v38 = vunpack.c.l.bf16 %v164_v26 }
  0x3a   : > { %v423_v39 = vmax.f32 %v359_v31, 0.0  ;;  %v424_v40 = vmax.f32 %v360_v32, 0.0  ;;  %v287_v41 = vmul.f32 %v1029_v7, %v211_v33  ;;  %v363_v42 = vadd.f32 %v1032_v9, %v286_v34  ;;  %v171_v33 = vld [vmem:[%s1025_s29 + $0xb8] sm:$0xff] }
  0x3b   : > { %v822_v44 = vpack.c.bf16 %v422_v35, %v421_v28  ;;  %v425_v45 = vmax.f32 %v361_v36, 0.0  ;;  %v426_v46 = vmax.f32 %v362_v37, 0.0  ;;  %v213_v47 = vunpack.c.h.bf16 %v164_v26  ;;  %v170_v28 = vld [vmem:[%s1025_s29 + $0xb0] sm:$0xff] }
  0x3c   : > { %v823_v49 = vpack.c.bf16 %v424_v40, %v423_v39  ;;  %v364_v50 = vadd.f32 %v1034_v10, %v287_v41  ;;  %v427_v51 = vmax.f32 %v363_v42, 0.0  ;;  %v288_v52 = vmul.f32 %v1027_v6, %v212_v38 }
  0x3d   : > { %665 = vst [vmem:[%s1062_s4 + $0x60] sm:$0xff] %v822_v44  ;;  %v824_v54 = vpack.c.bf16 %v426_v46, %v425_v45  ;;  %v289_v55 = vmul.f32 %v1029_v7, %v213_v47  ;;  %v214_v56 = vunpack.c.l.bf16 %v165_v43  ;;  %v215_v57 = vunpack.c.h.bf16 %v165_v43  ;;  %v172_v46 = vld [vmem:[%s1025_s29 + $0xc0] sm:$0xff] }
  0x3e   : > { %666 = vst [vmem:[%s1062_s4 + $0x68] sm:$0xff] %v823_v49  ;;  %v428_v58 = vmax.f32 %v364_v50, 0.0  ;;  %v365_v59 = vadd.f32 %v1032_v9, %v288_v52  ;;  %v216_v60 = vunpack.c.l.bf16 %v166_v48  ;;  %v217_v61 = vunpack.c.h.bf16 %v166_v48 }
  0x3f   : > { %667 = vst [vmem:[%s1062_s4 + $0x70] sm:$0xff] %v824_v54  ;;  %v366_v62 = vadd.f32 %v1034_v10, %v289_v55  ;;  %v290_v63 = vmul.f32 %v1027_v6, %v214_v56  ;;  %v291_v0 = vmul.f32 %v1029_v7, %v215_v57  ;;  %v218_v1 = vunpack.c.l.bf16 %v167_v53 }
  0x40   : > { %v825_v3 = vpack.c.bf16 %v428_v58, %v427_v51  ;;  %v429_v4 = vmax.f32 %v365_v59, 0.0  ;;  %v292_v5 = vmul.f32 %v1027_v6, %v216_v60  ;;  %v293_v8 = vmul.f32 %v1029_v7, %v217_v61  ;;  %v173_v59 = vld [vmem:[%s1025_s29 + $0xc8] sm:$0xff] }
  0x41   : > { %v430_v11 = vmax.f32 %v366_v62, 0.0  ;;  %v367_v12 = vadd.f32 %v1032_v9, %v290_v63  ;;  %v368_v13 = vadd.f32 %v1034_v10, %v291_v0  ;;  %v219_v14 = vunpack.c.h.bf16 %v167_v53 }
  0x42   : > { %668 = vst [vmem:[%s1062_s4 + $0x78] sm:$0xff] %v825_v3  ;;  %v369_v15 = vadd.f32 %v1032_v9, %v292_v5  ;;  %v370_v16 = vadd.f32 %v1034_v10, %v293_v8  ;;  %v294_v17 = vmul.f32 %v1027_v6, %v218_v1  ;;  %v220_v18 = vunpack.c.l.bf16 %v168_v2 }
  0x43   : > { %v826_v20 = vpack.c.bf16 %v430_v11, %v429_v4  ;;  %v431_v21 = vmax.f32 %v367_v12, 0.0  ;;  %v432_v22 = vmax.f32 %v368_v13, 0.0  ;;  %v295_v23 = vmul.f32 %v1029_v7, %v219_v14  ;;  %v174_v4 = vld [vmem:[%s1025_s29 + $0xd0] sm:$0xff] }
  0x44   : > { %v433_v24 = vmax.f32 %v369_v15, 0.0  ;;  %v434_v25 = vmax.f32 %v370_v16, 0.0  ;;  %v371_v26 = vadd.f32 %v1032_v9, %v294_v17  ;;  %v221_v27 = vunpack.c.h.bf16 %v168_v2  ;;  %v175_v17 = vld [vmem:[%s1025_s29 + $0xd8] sm:$0xff] }
  0x45   : > { %669 = vst [vmem:[%s1062_s4 + $0x80] sm:$0xff] %v826_v20  ;;  %v827_v29 = vpack.c.bf16 %v432_v22, %v431_v21  ;;  %v372_v30 = vadd.f32 %v1034_v10, %v295_v23  ;;  %v296_v31 = vmul.f32 %v1027_v6, %v220_v18  ;;  %v222_v32 = vunpack.c.l.bf16 %v169_v19 }
  0x46   : > { %v828_v34 = vpack.c.bf16 %v434_v25, %v433_v24  ;;  %v435_v35 = vmax.f32 %v371_v26, 0.0  ;;  %v297_v36 = vmul.f32 %v1029_v7, %v221_v27  ;;  %v223_v37 = vunpack.c.h.bf16 %v169_v19  ;;  %v176_v26 = vld [vmem:[%s1025_s29 + $0xe0] sm:$0xff] }
  0x47   : > { %670 = vst [vmem:[%s1062_s4 + $0x88] sm:$0xff] %v827_v29  ;;  %v436_v38 = vmax.f32 %v372_v30, 0.0  ;;  %v373_v39 = vadd.f32 %v1032_v9, %v296_v31  ;;  %v298_v40 = vmul.f32 %v1027_v6, %v222_v32  ;;  %v224_v41 = vunpack.c.l.bf16 %v170_v28 }
  0x48   : > { %671 = vst [vmem:[%s1062_s4 + $0x90] sm:$0xff] %v828_v34  ;;  %v374_v42 = vadd.f32 %v1034_v10, %v297_v36  ;;  %v299_v43 = vmul.f32 %v1029_v7, %v223_v37  ;;  %v225_v44 = vunpack.c.h.bf16 %v170_v28  ;;  %v226_v45 = vunpack.c.l.bf16 %v171_v33 }
  0x49   : > { %v829_v47 = vpack.c.bf16 %v436_v38, %v435_v35  ;;  %v437_v48 = vmax.f32 %v373_v39, 0.0  ;;  %v375_v49 = vadd.f32 %v1032_v9, %v298_v40  ;;  %v300_v50 = vmul.f32 %v1027_v6, %v224_v41  ;;  %v177_v39 = vld [vmem:[%s1025_s29 + $0xe8] sm:$0xff] }
  0x4a   : > { %v438_v51 = vmax.f32 %v374_v42, 0.0  ;;  %v376_v52 = vadd.f32 %v1034_v10, %v299_v43  ;;  %v301_v53 = vmul.f32 %v1029_v7, %v225_v44  ;;  %v227_v54 = vunpack.c.h.bf16 %v171_v33 }
  0x4b   : > { %672 = vst [vmem:[%s1062_s4 + $0x98] sm:$0xff] %v829_v47  ;;  %v439_v55 = vmax.f32 %v375_v49, 0.0  ;;  %v377_v56 = vadd.f32 %v1032_v9, %v300_v50  ;;  %v302_v57 = vmul.f32 %v1027_v6, %v226_v45  ;;  %v228_v58 = vunpack.c.l.bf16 %v172_v46 }
  0x4c   : > { %v830_v60 = vpack.c.bf16 %v438_v51, %v437_v48  ;;  %v440_v61 = vmax.f32 %v376_v52, 0.0  ;;  %v378_v62 = vadd.f32 %v1034_v10, %v301_v53  ;;  %v303_v63 = vmul.f32 %v1029_v7, %v227_v54  ;;  %v178_v48 = vld [vmem:[%s1025_s29 + $0xf0] sm:$0xff] }
  0x4d   : > { %v441_v0 = vmax.f32 %v377_v56, 0.0  ;;  %v379_v1 = vadd.f32 %v1032_v9, %v302_v57  ;;  %v229_v2 = vunpack.c.h.bf16 %v172_v46  ;;  %v304_v3 = vmul.f32 %v1027_v6, %v228_v58  ;;  %v179_v57 = vld [vmem:[%s1025_s29 + $0xf8] sm:$0xff] }
  0x4e   : > { %673 = vst [vmem:[%s1062_s4 + $0xa0] sm:$0xff] %v830_v60  ;;  %v831_v5 = vpack.c.bf16 %v440_v61, %v439_v55  ;;  %v442_v8 = vmax.f32 %v378_v62, 0.0  ;;  %v380_v11 = vadd.f32 %v1034_v10, %v303_v63  ;;  %v230_v12 = vunpack.c.l.bf16 %v173_v59 }
  0x4f   : > { %v443_v13 = vmax.f32 %v379_v1, 0.0  ;;  %v305_v14 = vmul.f32 %v1029_v7, %v229_v2  ;;  %v381_v15 = vadd.f32 %v1032_v9, %v304_v3  ;;  %v231_v16 = vunpack.c.h.bf16 %v173_v59 }
  0x50   : > { %674 = vst [vmem:[%s1062_s4 + $0xa8] sm:$0xff] %v831_v5  ;;  %v832_v18 = vpack.c.bf16 %v442_v8, %v441_v0  ;;  %v444_v19 = vmax.f32 %v380_v11, 0.0  ;;  %v306_v20 = vmul.f32 %v1027_v6, %v230_v12  ;;  %v232_v21 = vunpack.c.l.bf16 %v174_v4 }
  0x51   : > { %v382_v22 = vadd.f32 %v1034_v10, %v305_v14  ;;  %v445_v23 = vmax.f32 %v381_v15, 0.0  ;;  %v307_v24 = vmul.f32 %v1029_v7, %v231_v16  ;;  %v233_v25 = vunpack.c.h.bf16 %v174_v4 }
  0x52   : > { %675 = vst [vmem:[%s1062_s4 + $0xb0] sm:$0xff] %v832_v18  ;;  %v833_v27 = vpack.c.bf16 %v444_v19, %v443_v13  ;;  %v383_v28 = vadd.f32 %v1032_v9, %v306_v20  ;;  %v308_v29 = vmul.f32 %v1027_v6, %v232_v21  ;;  %v234_v30 = vunpack.c.l.bf16 %v175_v17 }
  0x53   : > { %v446_v31 = vmax.f32 %v382_v22, 0.0  ;;  %v384_v32 = vadd.f32 %v1034_v10, %v307_v24  ;;  %v309_v33 = vmul.f32 %v1029_v7, %v233_v25  ;;  %v235_v34 = vunpack.c.h.bf16 %v175_v17 }
  0x54   : > { %676 = vst [vmem:[%s1062_s4 + $0xb8] sm:$0xff] %v833_v27  ;;  %v447_v35 = vmax.f32 %v383_v28, 0.0  ;;  %v385_v36 = vadd.f32 %v1032_v9, %v308_v29  ;;  %v310_v37 = vmul.f32 %v1027_v6, %v234_v30  ;;  %v236_v38 = vunpack.c.l.bf16 %v176_v26 }
  0x55   : > { %v834_v40 = vpack.c.bf16 %v446_v31, %v445_v23  ;;  %v448_v41 = vmax.f32 %v384_v32, 0.0  ;;  %v386_v42 = vadd.f32 %v1034_v10, %v309_v33  ;;  %v311_v43 = vmul.f32 %v1029_v7, %v235_v34 }
  0x56   : > { %v449_v44 = vmax.f32 %v385_v36, 0.0  ;;  %v387_v45 = vadd.f32 %v1032_v9, %v310_v37  ;;  %v237_v46 = vunpack.c.h.bf16 %v176_v26  ;;  %v312_v47 = vmul.f32 %v1027_v6, %v236_v38 }
  0x57   : > { %677 = vst [vmem:[%s1062_s4 + $0xc0] sm:$0xff] %v834_v40  ;;  %v835_v49 = vpack.c.bf16 %v448_v41, %v447_v35  ;;  %v450_v50 = vmax.f32 %v386_v42, 0.0  ;;  %v388_v51 = vadd.f32 %v1034_v10, %v311_v43  ;;  %v238_v52 = vunpack.c.l.bf16 %v177_v39 }
  0x58   : > { %v451_v53 = vmax.f32 %v387_v45, 0.0  ;;  %v313_v54 = vmul.f32 %v1029_v7, %v237_v46  ;;  %v389_v55 = vadd.f32 %v1032_v9, %v312_v47  ;;  %v239_v56 = vunpack.c.h.bf16 %v177_v39 }
  0x59   : > { %678 = vst [vmem:[%s1062_s4 + $0xc8] sm:$0xff] %v835_v49  ;;  %v836_v58 = vpack.c.bf16 %v450_v50, %v449_v44  ;;  %v452_v59 = vmax.f32 %v388_v51, 0.0  ;;  %v314_v60 = vmul.f32 %v1027_v6, %v238_v52  ;;  %v240_v61 = vunpack.c.l.bf16 %v178_v48 }
  0x5a   : > { %v390_v62 = vadd.f32 %v1034_v10, %v313_v54  ;;  %v453_v63 = vmax.f32 %v389_v55, 0.0  ;;  %v315_v0 = vmul.f32 %v1029_v7, %v239_v56  ;;  %v241_v1 = vunpack.c.h.bf16 %v178_v48 }
  0x5b   : > { %679 = vst [vmem:[%s1062_s4 + $0xd0] sm:$0xff] %v836_v58  ;;  %v837_v2 = vpack.c.bf16 %v452_v59, %v451_v53  ;;  %v391_v3 = vadd.f32 %v1032_v9, %v314_v60  ;;  %v316_v4 = vmul.f32 %v1027_v6, %v240_v61  ;;  %v242_v5 = vunpack.c.l.bf16 %v179_v57 }
  0x5c   : > { %v454_v8 = vmax.f32 %v390_v62, 0.0  ;;  %v392_v11 = vadd.f32 %v1034_v10, %v315_v0  ;;  %v317_v12 = vmul.f32 %v1029_v7, %v241_v1  ;;  %v243_v13 = vunpack.c.h.bf16 %v179_v57 }
  0x5d   : > { %680 = vst [vmem:[%s1062_s4 + $0xd8] sm:$0xff] %v837_v2  ;;  %v455_v14 = vmax.f32 %v391_v3, 0.0  ;;  %v393_v15 = vadd.f32 %v1032_v9, %v316_v4  ;;  %v318_v16 = vmul.f32 %v1027_v6, %v242_v5 }
  0x5e   : > { %v838_v17 = vpack.c.bf16 %v454_v8, %v453_v63  ;;  %v456_v18 = vmax.f32 %v392_v11, 0.0  ;;  %v394_v19 = vadd.f32 %v1034_v10, %v317_v12  ;;  %v319_v20 = vmul.f32 %v1029_v7, %v243_v13 }
  0x5f   : > { %v457_v21 = vmax.f32 %v393_v15, 0.0  ;;  %v395_v22 = vadd.f32 %v1032_v9, %v318_v16 }
  0x60   : > { %681 = vst [vmem:[%s1062_s4 + $0xe0] sm:$0xff] %v838_v17  ;;  %v839_v23 = vpack.c.bf16 %v456_v18, %v455_v14  ;;  %v458_v24 = vmax.f32 %v394_v19, 0.0  ;;  %v396_v25 = vadd.f32 %v1034_v10, %v319_v20 }
  0x61   : > { %v459_v6 = vmax.f32 %v395_v22, 0.0 }
  0x62   : > { %682 = vst [vmem:[%s1062_s4 + $0xe8] sm:$0xff] %v839_v23  ;;  %v840_v26 = vpack.c.bf16 %v458_v24, %v457_v21  ;;  %v460_v27 = vmax.f32 %v396_v25, 0.0 }
  0x64   : > { %683 = vst [vmem:[%s1062_s4 + $0xf0] sm:$0xff] %v840_v26  ;;  %v841_v7 = vpack.c.bf16 %v460_v27, %v459_v6 }
  0x66   : > { %684 = vst [vmem:[%s1062_s4 + $0xf8] sm:$0xff] %v841_v7 }
  0x67   : > { %898 = shalt.err (!%p895_p3)
}
  0x68   : > { %s899_s23 = scalar_lea.hbm %s1235_s14, 4096  ;;  %s903_s26 = scalar_lea.hbm %s1286_s2, 16384 }
  0x69   : > { %p900_p4 = scmp.ne.s32.totalorder %s1235_s14, %s899_s23  ;;  %p904_p9 = scmp.lt.u32.totalorder %s1235_s14, %s1286_s2 }
  0x6a   : > { %p905_p10 = scmp.lt.u32.totalorder %s903_s26, %s899_s23  ;;  %p907_p12 = scmp.lt.u32.totalorder %s899_s23, %s1235_s14 }
  0x6b   : > { %p901_p7 = pnand %p900_p4, %p1005_p5 }
  0x6c   : > { %p906_p11 = por %p905_p10, %p904_p9 }
  0x6d   : > { %p902_p8 = pneg %p901_p7 }
  0x6e   : > { %p908_p13 = por %p907_p12, %p906_p11 }
  0x70   : > { %p909_p0 = pnand %p908_p13, %p902_p8 }
  0x72   : > { %912 = shalt.err (!%p909_p0)
}
  0x73   : > { %s950_s29 = smov 128   ;;  %s951_s30 = smov 8  }
  0x74   : > { %844 = dma.vmem_to_hbm [thread:$0]  (%p1005_p5), %s1237_s6, 4096, %s1235_s14, %s1243_s13, %s950_s29, %s950_s29, %s951_s30  }
  0x75 PF: > { %p850_p1 = scmp.ge.s32.totalorder %s947_s12, 2  ;;  %s715_s3 = sand.u32 1, %s935_s9  }
  0x76   : > { %s716_s4 = scalar_lea.sflag [#allocation3], %s715_s3 }
  0x77   : > { %p847_p2 = pnand %p850_p1, %p1009_p6 }
  0x79   : > { %930 = dma.done.wait (!%p847_p2), %s716_s4, 4096  }
  0x7a   : > { %932 = vsyncadd (!%p847_p2), %s716_s4, 4294963200  ;;  %p12_p3 = scmp.ge.s32.totalorder %s992_s15, 6   ;;  %s1289_s9 = smov %s939_s10 }
  0x7b   : > { %s1290_s10 = smov %s943_s11  ;;  %s1291_s11 = smov %s1003_s18 }
  0x7c   : > { %s1292_s12 = smov %s992_s15  ;;  %14 = sbr.rel (!%p12_p3) target bundleno = 3 (0x3), region = 64 }
  0x83   :  { %721 = vsyncpa [#allocation3], 1 }
  0x84   :  { %723 = vsyncpa [#allocation3 + $0x1], 1 }

// kernel: _lambda_.6
= control target key start
LH: loop header
LB: loop body
LE: loop exit
PB: predicated region body
PF: predicated region fallthrough
CT: control target
= control target key end

     0   :  { %s1989_s18 = smov 0   ;;  %s2349_s0 = inlined_call_operand.vmem [shape: bf16[1024,128], index: 0, kind: input, shape index: {}]   ;;  %s2350_s1 = inlined_call_operand.vmem [shape: f32[1024,128], index: 1, kind: input, shape index: {}]   ;;  %s2351_s2 = inlined_call_operand.vmem [shape: f32[2,128], index: 2, kind: input, shape index: {}]   ;;  %s2352_s3 = inlined_call_operand.vmem [shape: bf16[256,256], index: 3, kind: input, shape index: {}]   ;;  %s2353_s4 = inlined_call_operand.vmem [shape: bf16[1024,256], index: 4, kind: output, shape index: {0}]   ;;  %s2354_s5 = inlined_call_operand.vmem [shape: f32[4,2,256], index: 5, kind: output, shape index: {1}]  }
   0x1 LB: > { %s1995_s19 = sadd.s32 4294967295, %s1956_s18   ;;  %p1684_p0 = scmp.ge.s32.totalorder %s1956_s18, 1  ;;  %s1956_s18 = sphi %s1989_s18, %s16_s18  }
   0x2   : > { %p202_p1 = scmp.lt.s32.totalorder %s1956_s18, 5 }
   0x4   : > { %p203_p2 = pnand %p1684_p0, %p202_p1 }
   0x5   : > { %v1886_v0 = vld [vmem:[%s2352_s3 + $0x84] ss:$8 sps:$4 sm:$0xff] (!%p203_p2)   ;;  %v1958_v2 = vmov (!%p203_p2), 0   ;;  %v1890_v3 = vld [vmem:[%s2352_s3 + $0x80] ss:$8 sps:$4 sm:$0xff] (!%p203_p2)   ;;  %s1685_s30 = sshll.u32 (!%p203_p2), %s1995_s19, 5 }
   0x6   : > { %206 = sbr.rel (%p203_p2) target bundleno = 396 (0x18c), region = 36  ;;  %v1888_v1 = vld [vmem:[%s2352_s3 + $0x4] ss:$8 sps:$4 sm:$0xff] (!%p203_p2)   ;;  %596 = vmatprep.mubr.bf16.mxu1 (!%p203_p2), %v1958_v2  ;;  %965 = vmatprep.mubr.bf16.mxu0 (!%p203_p2), %v1958_v2  ;;  %v1891_v4 = vld [vmem:[%s2352_s3] ss:$8 sps:$4 sm:$0xff] (!%p203_p2)   ;;  %p242_p3 = scmp.lt.s32.totalorder (!%p203_p2), %s1685_s30, 127 }
   0x7   : > { %564 = vmatprep.subr.bf16.mxu1 (!%p203_p2), %v1886_v0  ;;  %933 = vmatprep.subr.bf16.mxu0 (!%p203_p2), %v1888_v1  ;;  %v1892_v5 = vld [vmem:[%s2352_s3 + $0x94] ss:$8 sps:$4 sm:$0xff] (!%p203_p2)   ;;  %v1896_v7 = vld [vmem:[%s2352_s3 + $0x90] ss:$8 sps:$4 sm:$0xff] (!%p203_p2)   ;;  %v1898_v9 = vld [vmem:[%s2352_s3 + $0xa4] ss:$8 sps:$4 sm:$0xff] (!%p203_p2)  }
   0x8   : > { %565 = vmatpush1.bf16.msra.mxu1 (!%p203_p2), %v1890_v3  ;;  %934 = vmatpush1.bf16.msra.mxu0 (!%p203_p2), %v1891_v4  ;;  %v1894_v6 = vld [vmem:[%s2352_s3 + $0x14] ss:$8 sps:$4 sm:$0xff] (!%p203_p2)   ;;  %v1897_v8 = vld [vmem:[%s2352_s3 + $0x10] ss:$8 sps:$4 sm:$0xff] (!%p203_p2)   ;;  %v1900_v10 = vld [vmem:[%s2352_s3 + $0x24] ss:$8 sps:$4 sm:$0xff] (!%p203_p2)  }
   0x9   : > { %566 = vmatprep.subr.bf16.mxu1 (!%p203_p2), %v1892_v5  ;;  %935 = vmatprep.subr.bf16.mxu0 (!%p203_p2), %v1894_v6  ;;  %v1902_v11 = vld [vmem:[%s2352_s3 + $0xa0] ss:$8 sps:$4 sm:$0xff] (!%p203_p2)   ;;  %v1904_v13 = vld [vmem:[%s2352_s3 + $0xb4] ss:$8 sps:$4 sm:$0xff] (!%p203_p2)   ;;  %v1908_v15 = vld [vmem:[%s2352_s3 + $0xb0] ss:$8 sps:$4 sm:$0xff] (!%p203_p2)  }
   0xa   : > { %v1903_v12 = vld [vmem:[%s2352_s3 + $0x20] ss:$8 sps:$4 sm:$0xff] (!%p203_p2)   ;;  %v1906_v14 = vld [vmem:[%s2352_s3 + $0x34] ss:$8 sps:$4 sm:$0xff] (!%p203_p2)   ;;  %v1909_v16 = vld [vmem:[%s2352_s3 + $0x30] ss:$8 sps:$4 sm:$0xff] (!%p203_p2)  }
   0xb   : > { %v1910_v17 = vld [vmem:[%s2352_s3 + $0xc4] ss:$8 sps:$4 sm:$0xff] (!%p203_p2)   ;;  %v1914_v19 = vld [vmem:[%s2352_s3 + $0xc0] ss:$8 sps:$4 sm:$0xff] (!%p203_p2)   ;;  %v1916_v21 = vld [vmem:[%s2352_s3 + $0xd4] ss:$8 sps:$4 sm:$0xff] (!%p203_p2)  }
   0xc   : > { %567 = vmatpush1.bf16.msra.mxu1 (!%p203_p2), %v1896_v7  ;;  %936 = vmatpush1.bf16.msra.mxu0 (!%p203_p2), %v1897_v8  ;;  %v1912_v18 = vld [vmem:[%s2352_s3 + $0x44] ss:$8 sps:$4 sm:$0xff] (!%p203_p2)   ;;  %v1915_v20 = vld [vmem:[%s2352_s3 + $0x40] ss:$8 sps:$4 sm:$0xff] (!%p203_p2)   ;;  %v1918_v22 = vld [vmem:[%s2352_s3 + $0x54] ss:$8 sps:$4 sm:$0xff] (!%p203_p2)  }
   0xd   : > { %568 = vmatprep.subr.bf16.mxu1 %v1898_v9  ;;  %937 = vmatprep.subr.bf16.mxu0 %v1900_v10  ;;  %s2356_s30 = smov (!%p242_p3, %s1685_s30), 127  ;;  %v1920_v23 = vld [vmem:[%s2352_s3 + $0xd0] ss:$8 sps:$4 sm:$0xff]   ;;  %v1922_v25 = vld [vmem:[%s2352_s3 + $0xe4] ss:$8 sps:$4 sm:$0xff]   ;;  %p260_p4 = scmp.lt.s32.totalorder %s1995_s19, 3 }
   0xe   : > { %s1688_s14 = sshll.u32 %s2356_s30, 3  ;;  %s1686_s24 = sshll.u32 %s2356_s30, 2  ;;  %v1921_v24 = vld [vmem:[%s2352_s3 + $0x50] ss:$8 sps:$4 sm:$0xff]   ;;  %v1924_v26 = vld [vmem:[%s2352_s3 + $0x64] ss:$8 sps:$4 sm:$0xff]  }
   0xf   : > { %s2076_s23 = scalar_lea.vmem %s2350_s1, %s1688_s14  ;;  %s2096_s11 = scalar_lea.vmem %s2349_s0, %s1686_s24  ;;  %v1926_v29 = vld [vmem:[%s2352_s3 + $0xe0] ss:$8 sps:$4 sm:$0xff]   ;;  %v1928_v37 = vld [vmem:[%s2352_s3 + $0xf4] ss:$8 sps:$4 sm:$0xff]   ;;  %v1932_v47 = vld [vmem:[%s2352_s3 + $0xf0] ss:$8 sps:$4 sm:$0xff]  }
  0x10   : > { %569 = vmatpush1.bf16.msra.mxu1 %v1902_v11  ;;  %938 = vmatpush1.bf16.msra.mxu0 %v1903_v12  ;;  %v266_v27 = vld [vmem:[%s2076_s23] sm:$0xff]  ;;  %v267_v28 = vld [vmem:[%s2076_s23 + $0x8] sm:$0xff]  ;;  %v268_v35 = vld [vmem:[%s2076_s23 + $0x10] sm:$0xff]  ;;  %s2307_s9 = scalar_lea.vmem %s2353_s4, %s1688_s14  ;;  %s2358_s19 = smov (!%p260_p4, %s1995_s19), 3  ;;  %vm1338_vm0 = vcmask 1040384  }
  0x11   : > { %570 = vmatprep.subr.bf16.mxu1 %v1904_v13  ;;  %939 = vmatprep.subr.bf16.mxu0 %v1906_v14  ;;  %v2104_v30 = vld [vmem:[%s2351_s2] ss:$0 sm:$0xff]  ;;  %v2109_v31 = vld [vmem:[%s2351_s2 + $0x1] ss:$0 sm:$0xff]  ;;  %v269_v36 = vld [vmem:[%s2076_s23 + $0x18] sm:$0xff]  ;;  %s1780_s30 = sshll.u32 %s2358_s19, 2 }
  0x12   : > { %v1927_v32 = vld [vmem:[%s2352_s3 + $0x60] ss:$8 sps:$4 sm:$0xff]   ;;  %v303_v33 = vmul.f32 %v2104_v30, %v266_v27  ;;  %v304_v34 = vmul.f32 %v2104_v30, %v267_v28  ;;  %v1930_v38 = vld [vmem:[%s2352_s3 + $0x74] ss:$8 sps:$4 sm:$0xff]   ;;  %v305_v45 = vmul.f32 %v2104_v30, %v268_v35  ;;  %v306_v46 = vmul.f32 %v2104_v30, %v269_v36  ;;  %v1933_v48 = vld [vmem:[%s2352_s3 + $0x70] ss:$8 sps:$4 sm:$0xff]  }
  0x13   : > { %v270_v41 = vld [vmem:[%s2076_s23 + $0x20] sm:$0xff]  ;;  %v271_v42 = vld [vmem:[%s2076_s23 + $0x28] sm:$0xff]  ;;  %v272_v55 = vld [vmem:[%s2076_s23 + $0x30] sm:$0xff] }
  0x14   : > { %571 = vmatpush1.bf16.msra.mxu1 %v1908_v15  ;;  %940 = vmatpush1.bf16.msra.mxu0 %v1909_v16  ;;  %v340_v39 = vadd.f32 %v2109_v31, %v303_v33  ;;  %v341_v40 = vadd.f32 %v2109_v31, %v304_v34  ;;  %v307_v49 = vmul.f32 %v2104_v30, %v270_v41  ;;  %v1934_v51 = vld [vmem:[%s2096_s11] sm:$0xff]   ;;  %v273_v58 = vld [vmem:[%s2076_s23 + $0x38] sm:$0xff]  ;;  %v275_v63 = vld [vmem:[%s2076_s23 + $0x48] sm:$0xff] }
  0x15   : > { %572 = vmatprep.subr.bf16.mxu1 %v1910_v17  ;;  %941 = vmatprep.subr.bf16.mxu0 %v1912_v18  ;;  %v308_v50 = vmul.f32 %v2104_v30, %v271_v42  ;;  %v342_v53 = vadd.f32 %v2109_v31, %v305_v45  ;;  %v343_v54 = vadd.f32 %v2109_v31, %v306_v46  ;;  %v274_v60 = vld [vmem:[%s2076_s23 + $0x40] sm:$0xff]  ;;  %v283_v1 = vld [vmem:[%s2076_s23 + $0x88] sm:$0xff]  ;;  %v284_v8 = vld [vmem:[%s2076_s23 + $0x90] sm:$0xff] }
  0x16   : > { %v372_v43 = vmax.f32 %v340_v39, 0.0  ;;  %v373_v44 = vmax.f32 %v341_v40, 0.0  ;;  %v344_v56 = vadd.f32 %v2109_v31, %v307_v49  ;;  %v309_v59 = vmul.f32 %v2104_v30, %v272_v55  ;;  %v282_v0 = vld [vmem:[%s2076_s23 + $0x80] sm:$0xff]  ;;  %v285_v9 = vld [vmem:[%s2076_s23 + $0x98] sm:$0xff]  ;;  %v1935_v10 = vld [vmem:[%s2096_s11 + $0x8] sm:$0xff]  }
  0x17   : > { %v345_v57 = vadd.f32 %v2109_v31, %v308_v50  ;;  %v374_v61 = vmax.f32 %v342_v53, 0.0  ;;  %v375_v62 = vmax.f32 %v343_v54, 0.0  ;;  %v310_v3 = vmul.f32 %v2104_v30, %v273_v58  ;;  %v286_v15 = vld [vmem:[%s2076_s23 + $0xa0] sm:$0xff]  ;;  %v295_v58 = vld [vmem:[%s2076_s23 + $0xe8] sm:$0xff] }
  0x18   : > { %573 = vmatpush1.bf16.msra.mxu1 %v1914_v19  ;;  %942 = vmatpush1.bf16.msra.mxu0 %v1915_v20  ;;  %v452_v52 = vpack.c.bf16 %v373_v44, %v372_v43  ;;  %v376_v4 = vmax.f32 %v344_v56, 0.0  ;;  %v319_v6 = vmul.f32 %v2104_v30, %v282_v0  ;;  %v320_v7 = vmul.f32 %v2104_v30, %v283_v1  ;;  %v287_v20 = vld [vmem:[%s2076_s23 + $0xa8] sm:$0xff]  ;;  %v294_v53 = vld [vmem:[%s2076_s23 + $0xe0] sm:$0xff]  ;;  %v296_v0 = vld [vmem:[%s2076_s23 + $0xf0] sm:$0xff] }
  0x19   : > { %574 = vmatprep.subr.bf16.mxu1 %v1916_v21  ;;  %943 = vmatprep.subr.bf16.mxu0 %v1918_v22  ;;  %v377_v5 = vmax.f32 %v345_v57, 0.0  ;;  %v2159_v11 = vadd.f32 %v2109_v31, %v309_v59  ;;  %v2162_v12 = vmul.f32 %v2104_v30, %v274_v60  ;;  %v2165_v13 = vmul.f32 %v2104_v30, %v275_v63  ;;  %v1936_v59 = vld [vmem:[%s2096_s11 + $0x10] sm:$0xff]   ;;  %v297_v1 = vld [vmem:[%s2076_s23 + $0xf8] sm:$0xff] }
  0x1a   : > { %v321_v14 = vmul.f32 %v2104_v30, %v284_v8  ;;  %v453_v16 = vpack.c.bf16 %v375_v62, %v374_v61  ;;  %v356_v17 = vadd.f32 %v2109_v31, %v319_v6  ;;  %v357_v18 = vadd.f32 %v2109_v31, %v320_v7 }
  0x1b   : > { %v322_v19 = vmul.f32 %v2104_v30, %v285_v9  ;;  %v2174_v21 = vadd.f32 %v2109_v31, %v310_v3  ;;  %v454_v27 = vpack.c.bf16 %v377_v5, %v376_v4  ;;  %v331_v63 = vmul.f32 %v2104_v30, %v294_v53  ;;  %v280_v53 = vld [vmem:[%s2076_s23 + $0x70] sm:$0xff] }
  0x1c   : > { %575 = vmatpush1.bf16.msra.mxu1 %v1920_v23  ;;  %944 = vmatpush1.bf16.msra.mxu0 %v1921_v24  ;;  %v358_v22 = vadd.f32 %v2109_v31, %v321_v14  ;;  %v323_v23 = vmul.f32 %v2104_v30, %v286_v15  ;;  %v324_v24 = vmul.f32 %v2104_v30, %v287_v20  ;;  %v388_v28 = vmax.f32 %v356_v17, 0.0 }
  0x1d   : > { %576 = vmatprep.subr.bf16.mxu1 %v1922_v25  ;;  %945 = vmatprep.subr.bf16.mxu0 %v1924_v26  ;;  %v288_v25 = vld [vmem:[%s2076_s23 + $0xb0] sm:$0xff]  ;;  %v289_v26 = vld [vmem:[%s2076_s23 + $0xb8] sm:$0xff]  ;;  %v332_v5 = vmul.f32 %v2104_v30, %v295_v58  ;;  %v333_v6 = vmul.f32 %v2104_v30, %v296_v0  ;;  %v368_v9 = vadd.f32 %v2109_v31, %v331_v63 }
  0x1e   : > { %v390_v33 = vmax.f32 %v358_v22, 0.0  ;;  %v360_v34 = vadd.f32 %v2109_v31, %v323_v23  ;;  %v361_v35 = vadd.f32 %v2109_v31, %v324_v24  ;;  %v325_v36 = vmul.f32 %v2104_v30, %v288_v25 }
  0x1f   : > { %v326_v41 = vmul.f32 %v2104_v30, %v289_v26  ;;  %v370_v17 = vadd.f32 %v2109_v31, %v333_v6  ;;  %v400_v20 = vmax.f32 %v368_v9, 0.0  ;;  %v317_v58 = vmul.f32 %v2104_v30, %v280_v53  ;;  %v1948_v6 = vld [vmem:[%s2096_s11 + $0x70] sm:$0xff]  }
  0x20   : > { %577 = vmatpush1.bf16.msra.mxu1 %v1926_v29  ;;  %946 = vmatpush1.bf16.msra.mxu0 %v1927_v32  ;;  %v389_v29 = vmax.f32 %v357_v18, 0.0  ;;  %v359_v32 = vadd.f32 %v2109_v31, %v322_v19  ;;  %v392_v43 = vmax.f32 %v360_v34, 0.0  ;;  %v393_v44 = vmax.f32 %v361_v35, 0.0  ;;  %v277_v34 = vld [vmem:[%s2076_s23 + $0x58] sm:$0xff] }
  0x21   : > { %578 = vmatprep.subr.bf16.mxu1 %v1928_v37  ;;  %947 = vmatprep.subr.bf16.mxu0 %v1930_v38  ;;  %v290_v37 = vld [vmem:[%s2076_s23 + $0xc0] sm:$0xff]  ;;  %v291_v38 = vld [vmem:[%s2076_s23 + $0xc8] sm:$0xff]  ;;  %v362_v45 = vadd.f32 %v2109_v31, %v325_v36  ;;  %v363_v50 = vadd.f32 %v2109_v31, %v326_v41  ;;  %v378_v18 = vmax.f32 %v2159_v11, 0.0  ;;  %v379_v19 = vmax.f32 %v2174_v21, 0.0  ;;  %v1937_v11 = vld [vmem:[%s2096_s11 + $0x18] sm:$0xff]  }
  0x22   : > { %v2187_v39 = vpack.c.bf16 %v389_v29, %v388_v28  ;;  %v391_v40 = vmax.f32 %v359_v32, 0.0  ;;  %v327_v42 = vmul.f32 %v2104_v30, %v290_v37  ;;  %v328_v46 = vmul.f32 %v2104_v30, %v291_v38 }
  0x23   : > { %v2203_v54 = vpack.c.bf16 %v393_v44, %v392_v43  ;;  %v394_v55 = vmax.f32 %v362_v45, 0.0  ;;  %v395_v60 = vmax.f32 %v363_v50, 0.0  ;;  %v402_v25 = vmax.f32 %v370_v17, 0.0  ;;  %v279_v43 = vld [vmem:[%s2076_s23 + $0x68] sm:$0xff] }
  0x24   : > { %579 = vmatpush1.bf16.msra.mxu1 %v1932_v47  ;;  %948 = vmatpush1.bf16.msra.mxu0 %v1933_v48  ;;  %v292_v47 = vld [vmem:[%s2076_s23 + $0xd0] sm:$0xff]  ;;  %v293_v48 = vld [vmem:[%s2076_s23 + $0xd8] sm:$0xff]  ;;  %v2197_v49 = vpack.c.bf16 %v391_v40, %v390_v33  ;;  %v365_v56 = vadd.f32 %v2109_v31, %v328_v46  ;;  %v455_v28 = vpack.c.bf16 %v379_v19, %v378_v18  ;;  %v1939_v50 = vld [vmem:[%s2096_s11 + $0x28] sm:$0xff]  }
  0x25   : > { %v330_v57 = vmul.f32 %v2104_v30, %v293_v48  ;;  %v2216_v7 = vpack.c.bf16 %v395_v60, %v394_v55  ;;  %v348_v21 = vadd.f32 %v2109_v31, %v2162_v12  ;;  %v349_v29 = vadd.f32 %v2109_v31, %v2165_v13  ;;  %v276_v33 = vld [vmem:[%s2076_s23 + $0x50] sm:$0xff]  ;;  %v1938_v13 = vld [vmem:[%s2096_s11 + $0x20] sm:$0xff]   ;;  %v281_v55 = vld [vmem:[%s2076_s23 + $0x78] sm:$0xff] }
  0x26   : > { %v397_v3 = vmax.f32 %v365_v56, 0.0  ;;  %v313_v37 = vmul.f32 %v2104_v30, %v276_v33  ;;  %v314_v38 = vmul.f32 %v2104_v30, %v277_v34 }
  0x27   : > { %597 = vmatmul.mubr.bf16.vlgmr.msra.gmra.mrb[0].mxu1 %v452_v52  ;;  %966 = vmatmul.mubr.bf16.vlgmr.msra.gmra.mrb[0].mxu0 %v1934_v51  ;;  %v364_v51 = vadd.f32 %v2109_v31, %v327_v42  ;;  %v329_v52 = vmul.f32 %v2104_v30, %v292_v47  ;;  %v367_v4 = vadd.f32 %v2109_v31, %v330_v57  ;;  %v380_v35 = vmax.f32 %v348_v21, 0.0  ;;  %v278_v42 = vld [vmem:[%s2076_s23 + $0x60] sm:$0xff] }
  0x28   : > { %606 = vmatprep.mubr.bf16.mxu1 %v1958_v2  ;;  %975 = vmatprep.mubr.bf16.mxu0 %v1958_v2  ;;  %v381_v36 = vmax.f32 %v349_v29, 0.0  ;;  %v350_v40 = vadd.f32 %v2109_v31, %v313_v37  ;;  %v351_v41 = vadd.f32 %v2109_v31, %v314_v38  ;;  %v315_v46 = vmul.f32 %v2104_v30, %v278_v42 }
  0x29   : > { %v396_v61 = vmax.f32 %v364_v51, 0.0  ;;  %v366_v62 = vadd.f32 %v2109_v31, %v329_v52  ;;  %v399_v15 = vmax.f32 %v367_v4, 0.0  ;;  %v316_v47 = vmul.f32 %v2104_v30, %v279_v43  ;;  %v1943_v4 = vld [vmem:[%s2096_s11 + $0x48] sm:$0xff]  }
  0x2a   : > { %v456_v12 = vpack.c.bf16 %v381_v36, %v380_v35  ;;  %v382_v44 = vmax.f32 %v350_v40, 0.0  ;;  %v383_v45 = vmax.f32 %v351_v41, 0.0  ;;  %v352_v51 = vadd.f32 %v2109_v31, %v315_v46 }
  0x2b   : > { %v398_v8 = vmax.f32 %v366_v62, 0.0  ;;  %v2220_v14 = vpack.c.bf16 %v397_v3, %v396_v61  ;;  %v353_v52 = vadd.f32 %v2109_v31, %v316_v47  ;;  %v1940_v61 = vld [vmem:[%s2096_s11 + $0x30] sm:$0xff]   ;;  %v354_v62 = vadd.f32 %v2109_v31, %v317_v58  ;;  %v1941_v3 = vld [vmem:[%s2096_s11 + $0x38] sm:$0xff]  }
  0x2c   : > { %v457_v48 = vpack.c.bf16 %v383_v45, %v382_v44  ;;  %v384_v56 = vmax.f32 %v352_v51, 0.0 }
  0x2d   : > { %v2229_v23 = vpack.c.bf16 %v399_v15, %v398_v8  ;;  %v385_v57 = vmax.f32 %v353_v52, 0.0  ;;  %v386_v0 = vmax.f32 %v354_v62, 0.0 }
  0x2f   : > { %607 = vmatmul.mubr.bf16.gmra.mrb[4].mxu1 %v453_v16  ;;  %976 = vmatmul.mubr.bf16.gmra.mrb[4].mxu0 %v1935_v10  ;;  %v334_v10 = vmul.f32 %v2104_v30, %v297_v1  ;;  %v369_v16 = vadd.f32 %v2109_v31, %v332_v5  ;;  %v458_v60 = vpack.c.bf16 %v385_v57, %v384_v56  ;;  %v1944_v5 = vld [vmem:[%s2096_s11 + $0x50] sm:$0xff]  }
  0x30   : > { %616 = vmatprep.mubr.bf16.mxu1 %v1958_v2  ;;  %985 = vmatprep.mubr.bf16.mxu0 %v1958_v2 }
  0x31   : > { %v371_v22 = vadd.f32 %v2109_v31, %v334_v10  ;;  %v401_v24 = vmax.f32 %v369_v16, 0.0 }
  0x33   : > { %v403_v26 = vmax.f32 %v371_v22, 0.0 }
  0x35   : > { %v2238_v32 = vpack.c.bf16 %v403_v26, %v402_v25 }
  0x37   : > { %617 = vmatmul.mubr.bf16.gmra.mrb[8].mxu1 %v454_v27  ;;  %986 = vmatmul.mubr.bf16.gmra.mrb[8].mxu0 %v1936_v59  ;;  %v2231_v27 = vpack.c.bf16 %v401_v24, %v400_v20  ;;  %v318_v59 = vmul.f32 %v2104_v30, %v281_v55 }
  0x38   : > { %626 = vmatprep.mubr.bf16.mxu1 %v1958_v2  ;;  %995 = vmatprep.mubr.bf16.mxu0 %v1958_v2 }
  0x39   : > { %v355_v63 = vadd.f32 %v2109_v31, %v318_v59  ;;  %v1942_v31 = vld [vmem:[%s2096_s11 + $0x40] sm:$0xff]  }
  0x3b   : > { %v387_v1 = vmax.f32 %v355_v63, 0.0 }
  0x3d   : > { %v459_v30 = vpack.c.bf16 %v387_v1, %v386_v0 }
  0x3f   : > { %627 = vmatmul.mubr.bf16.gmra.mrb[12].mxu1 %v455_v28  ;;  %996 = vmatmul.mubr.bf16.gmra.mrb[12].mxu0 %v1937_v11 }
  0x40   : > { %636 = vmatprep.mubr.bf16.mxu1 %v1958_v2  ;;  %1005 = vmatprep.mubr.bf16.mxu0 %v1958_v2 }
  0x47   : > { %637 = vmatmul.mubr.bf16.gmra.mrb[16].mxu1 %v456_v12  ;;  %1006 = vmatmul.mubr.bf16.gmra.mrb[16].mxu0 %v1938_v13 }
  0x48   : > { %646 = vmatprep.mubr.bf16.mxu1 %v1958_v2  ;;  %1015 = vmatprep.mubr.bf16.mxu0 %v1958_v2 }
  0x4f   : > { %647 = vmatmul.mubr.bf16.gmra.mrb[20].mxu1 %v457_v48  ;;  %1016 = vmatmul.mubr.bf16.gmra.mrb[20].mxu0 %v1939_v50 }
  0x50   : > { %656 = vmatprep.mubr.bf16.mxu1 %v1958_v2  ;;  %1025 = vmatprep.mubr.bf16.mxu0 %v1958_v2 }
  0x57   : > { %657 = vmatmul.mubr.bf16.gmra.mrb[24].mxu1 %v458_v60  ;;  %1026 = vmatmul.mubr.bf16.gmra.mrb[24].mxu0 %v1940_v61 }
  0x58   : > { %666 = vmatprep.mubr.bf16.mxu1 %v1958_v2  ;;  %1035 = vmatprep.mubr.bf16.mxu0 %v1958_v2 }
  0x5f   : > { %667 = vmatmul.mubr.bf16.gmra.mrb[28].mxu1 %v459_v30  ;;  %1036 = vmatmul.mubr.bf16.gmra.mrb[28].mxu0 %v1941_v3 }
  0x60   : > { %676 = vmatprep.mubr.bf16.mxu1 %v1958_v2  ;;  %1045 = vmatprep.mubr.bf16.mxu0 %v1958_v2 }
  0x67   : > { %677 = vmatmul.mubr.bf16.gmra.mrb[32].mxu1 %v2187_v39  ;;  %1046 = vmatmul.mubr.bf16.gmra.mrb[32].mxu0 %v1942_v31  ;;  %v1945_v39 = vld [vmem:[%s2096_s11 + $0x58] sm:$0xff]  }
  0x68   : > { %686 = vmatprep.mubr.bf16.mxu1 %v1958_v2  ;;  %1055 = vmatprep.mubr.bf16.mxu0 %v1958_v2 }
  0x6f   : > { %687 = vmatmul.mubr.bf16.gmra.mrb[36].mxu1 %v2197_v49  ;;  %1056 = vmatmul.mubr.bf16.gmra.mrb[36].mxu0 %v1943_v4  ;;  %v1946_v49 = vld [vmem:[%s2096_s11 + $0x60] sm:$0xff]  }
  0x70   : > { %696 = vmatprep.mubr.bf16.mxu1 %v1958_v2  ;;  %1065 = vmatprep.mubr.bf16.mxu0 %v1958_v2 }
  0x77   : > { %697 = vmatmul.mubr.bf16.gmra.mrb[40].mxu1 %v2203_v54  ;;  %1066 = vmatmul.mubr.bf16.gmra.mrb[40].mxu0 %v1944_v5  ;;  %v1947_v54 = vld [vmem:[%s2096_s11 + $0x68] sm:$0xff]  }
  0x78   : > { %706 = vmatprep.mubr.bf16.mxu1 %v1958_v2  ;;  %1075 = vmatprep.mubr.bf16.mxu0 %v1958_v2 }
  0x7f   : > { %707 = vmatmul.mubr.bf16.gmra.mrb[44].mxu1 %v2216_v7  ;;  %1076 = vmatmul.mubr.bf16.gmra.mrb[44].mxu0 %v1945_v39  ;;  %v1949_v7 = vld [vmem:[%s2096_s11 + $0x78] sm:$0xff]   ;;  %s264_s11 = scalar_lea.vmem %s2354_s5, %s1780_s30 }
  0x80   : > { %716 = vmatprep.mubr.bf16.mxu1 %v1958_v2  ;;  %1085 = vmatprep.mubr.bf16.mxu0 %v1958_v2 }
  0x87   : > { %717 = vmatmul.mubr.bf16.gmra.mrb[48].mxu1 %v2220_v14  ;;  %1086 = vmatmul.mubr.bf16.gmra.mrb[48].mxu0 %v1946_v49 }
  0x88   : > { %726 = vmatprep.mubr.bf16.mxu1 %v1958_v2  ;;  %1095 = vmatprep.mubr.bf16.mxu0 %v1958_v2 }
  0x8f   : > { %727 = vmatmul.mubr.bf16.gmra.mrb[52].mxu1 %v2229_v23  ;;  %1096 = vmatmul.mubr.bf16.gmra.mrb[52].mxu0 %v1947_v54 }
  0x90   : > { %736 = vmatprep.mubr.bf16.mxu1 %v1958_v2  ;;  %1105 = vmatprep.mubr.bf16.mxu0 %v1958_v2 }
  0x97   : > { %737 = vmatmul.mubr.bf16.gmra.mrb[56].mxu1 %v2231_v27  ;;  %1106 = vmatmul.mubr.bf16.gmra.mrb[56].mxu0 %v1948_v6 }
  0x98   : > { %746 = vmatprep.mubr.bf16.mxu1 %v1958_v2  ;;  %1115 = vmatprep.mubr.bf16.mxu0 %v1958_v2 }
  0x9f   : > { %747 = vmatmul.mubr.bf16.gmra.mrb[60].mxu1 %v2238_v32  ;;  %1116 = vmatmul.mubr.bf16.gmra.mrb[60].mxu0 %v1949_v7 }
  0xfa   : > { %v598_v8 = vpop.f32.mrb[0].mxu1  ;;  %v967_v9 = vpop.f32.mrb[0].mxu0 }
  0xfb   : > { %v968_v10 = vadd.f32 %v967_v9, %v598_v8  ;;  %v600_v14 = vpop.f32.mrb[1].mxu1  ;;  %v969_v15 = vpop.f32.mrb[1].mxu0 }
  0xfc   : > { %v970_v16 = vadd.f32 %v969_v15, %v600_v14  ;;  %v602_v17 = vpop.f32.mrb[2].mxu1  ;;  %v971_v18 = vpop.f32.mrb[2].mxu0 }
  0xfd   : > { %v972_v2 = vadd.f32 %v971_v18, %v602_v17  ;;  %v604_v19 = vpop.f32.mrb[3].mxu1  ;;  %v973_v20 = vpop.f32.mrb[3].mxu0  ;;  %v1200_v24 = vmul.f32 %v968_v10, %v968_v10 }
  0xfe   : > { %v1781_v22 = vpack.c.bf16 %v970_v16, %v968_v10  ;;  %v974_v23 = vadd.f32 %v973_v20, %v604_v19  ;;  %v1201_v27 = vmul.f32 %v970_v16, %v970_v16 }
  0xff   : > { %v1126_v25 = vadd.f32 %v972_v2, %v968_v10  ;;  %v1202_v26 = vmul.f32 %v972_v2, %v972_v2 }
 0x100   : > { %1545 = vst [vmem:[%s2307_s9] sm:$0xff] %v1781_v22  ;;  %v1163_v28 = vadd.f32 %v974_v23, %v970_v16  ;;  %v1203_v11 = vmul.f32 %v974_v23, %v974_v23  ;;  %v1782_v21 = vpack.c.bf16 %v974_v23, %v972_v2 }
 0x101   : > { %v1264_v29 = vadd.f32 %v1202_v26, %v1200_v24 }
 0x102   : > { %v1301_v32 = vadd.f32 %v1203_v11, %v1201_v27  ;;  %1546 = vst [vmem:[%s2307_s9 + $0x8] sm:$0xff] %v1782_v21  ;;  %v608_v33 = vpop.f32.mrb[4].mxu1  ;;  %v977_v34 = vpop.f32.mrb[4].mxu0 }
 0x103   : > { %v978_v35 = vadd.f32 %v977_v34, %v608_v33  ;;  %v610_v36 = vpop.f32.mrb[5].mxu1  ;;  %v979_v37 = vpop.f32.mrb[5].mxu0 }
 0x104   : > { %v980_v38 = vadd.f32 %v979_v37, %v610_v36  ;;  %v612_v12 = vpop.f32.mrb[6].mxu1  ;;  %v981_v13 = vpop.f32.mrb[6].mxu0 }
 0x105   : > { %v1127_v40 = vadd.f32 %v1126_v25, %v978_v35  ;;  %v1204_v41 = vmul.f32 %v978_v35, %v978_v35  ;;  %v982_v42 = vadd.f32 %v981_v13, %v612_v12  ;;  %v614_v43 = vpop.f32.mrb[7].mxu1  ;;  %v983_v44 = vpop.f32.mrb[7].mxu0 }
 0x106   : > { %v1164_v45 = vadd.f32 %v1163_v28, %v980_v38  ;;  %v1205_v46 = vmul.f32 %v980_v38, %v980_v38  ;;  %v1783_v47 = vpack.c.bf16 %v980_v38, %v978_v35  ;;  %v984_v48 = vadd.f32 %v983_v44, %v614_v43 }
 0x107   : > { %v1265_v50 = vadd.f32 %v1264_v29, %v1204_v41  ;;  %v1128_v51 = vadd.f32 %v1127_v40, %v982_v42  ;;  %v1206_v52 = vmul.f32 %v982_v42, %v982_v42 }
 0x108   : > { %v1302_v53 = vadd.f32 %v1301_v32, %v1205_v46  ;;  %1547 = vst [vmem:[%s2307_s9 + $0x10] sm:$0xff] %v1783_v47  ;;  %v1165_v55 = vadd.f32 %v1164_v45, %v984_v48  ;;  %v1207_v56 = vmul.f32 %v984_v48, %v984_v48  ;;  %v1784_v57 = vpack.c.bf16 %v984_v48, %v982_v42 }
 0x109   : > { %v1266_v58 = vadd.f32 %v1265_v50, %v1206_v52 }
 0x10a   : > { %v1303_v59 = vadd.f32 %v1302_v53, %v1207_v56  ;;  %1548 = vst [vmem:[%s2307_s9 + $0x18] sm:$0xff] %v1784_v57  ;;  %v618_v60 = vpop.f32.mrb[8].mxu1  ;;  %v987_v61 = vpop.f32.mrb[8].mxu0 }
 0x10b   : > { %v988_v62 = vadd.f32 %v987_v61, %v618_v60  ;;  %v620_v63 = vpop.f32.mrb[9].mxu1  ;;  %v989_v0 = vpop.f32.mrb[9].mxu0 }
 0x10c   : > { %v990_v1 = vadd.f32 %v989_v0, %v620_v63  ;;  %v622_v30 = vpop.f32.mrb[10].mxu1  ;;  %v991_v3 = vpop.f32.mrb[10].mxu0 }
 0x10d   : > { %v1129_v31 = vadd.f32 %v1128_v51, %v988_v62  ;;  %v1208_v4 = vmul.f32 %v988_v62, %v988_v62  ;;  %v992_v5 = vadd.f32 %v991_v3, %v622_v30  ;;  %v624_v39 = vpop.f32.mrb[11].mxu1  ;;  %v993_v49 = vpop.f32.mrb[11].mxu0 }
 0x10e   : > { %v1166_v54 = vadd.f32 %v1165_v55, %v990_v1  ;;  %v1209_v6 = vmul.f32 %v990_v1, %v990_v1  ;;  %v1785_v7 = vpack.c.bf16 %v990_v1, %v988_v62  ;;  %v994_v8 = vadd.f32 %v993_v49, %v624_v39 }
 0x10f   : > { %v1267_v9 = vadd.f32 %v1266_v58, %v1208_v4  ;;  %v1130_v10 = vadd.f32 %v1129_v31, %v992_v5  ;;  %v1210_v14 = vmul.f32 %v992_v5, %v992_v5 }
 0x110   : > { %v1304_v15 = vadd.f32 %v1303_v59, %v1209_v6  ;;  %1549 = vst [vmem:[%s2307_s9 + $0x20] sm:$0xff] %v1785_v7  ;;  %v1167_v16 = vadd.f32 %v1166_v54, %v994_v8  ;;  %v1211_v17 = vmul.f32 %v994_v8, %v994_v8  ;;  %v1786_v18 = vpack.c.bf16 %v994_v8, %v992_v5 }
 0x111   : > { %v1268_v2 = vadd.f32 %v1267_v9, %v1210_v14 }
 0x112   : > { %v1305_v19 = vadd.f32 %v1304_v15, %v1211_v17  ;;  %1550 = vst [vmem:[%s2307_s9 + $0x28] sm:$0xff] %v1786_v18  ;;  %v628_v20 = vpop.f32.mrb[12].mxu1  ;;  %v997_v22 = vpop.f32.mrb[12].mxu0 }
 0x113   : > { %v998_v23 = vadd.f32 %v997_v22, %v628_v20  ;;  %v630_v24 = vpop.f32.mrb[13].mxu1  ;;  %v999_v25 = vpop.f32.mrb[13].mxu0 }
 0x114   : > { %v1000_v26 = vadd.f32 %v999_v25, %v630_v24  ;;  %v632_v27 = vpop.f32.mrb[14].mxu1  ;;  %v1001_v28 = vpop.f32.mrb[14].mxu0 }
 0x115   : > { %v1131_v11 = vadd.f32 %v1130_v10, %v998_v23  ;;  %v1212_v21 = vmul.f32 %v998_v23, %v998_v23  ;;  %v1002_v29 = vadd.f32 %v1001_v28, %v632_v27  ;;  %v634_v32 = vpop.f32.mrb[15].mxu1  ;;  %v1003_v33 = vpop.f32.mrb[15].mxu0 }
 0x116   : > { %v1168_v34 = vadd.f32 %v1167_v16, %v1000_v26  ;;  %v1213_v35 = vmul.f32 %v1000_v26, %v1000_v26  ;;  %v1787_v36 = vpack.c.bf16 %v1000_v26, %v998_v23  ;;  %v1004_v37 = vadd.f32 %v1003_v33, %v634_v32 }
 0x117   : > { %v1269_v38 = vadd.f32 %v1268_v2, %v1212_v21  ;;  %v1132_v12 = vadd.f32 %v1131_v11, %v1002_v29  ;;  %v1214_v13 = vmul.f32 %v1002_v29, %v1002_v29 }
 0x118   : > { %v1306_v40 = vadd.f32 %v1305_v19, %v1213_v35  ;;  %1551 = vst [vmem:[%s2307_s9 + $0x30] sm:$0xff] %v1787_v36  ;;  %v1169_v41 = vadd.f32 %v1168_v34, %v1004_v37  ;;  %v1215_v42 = vmul.f32 %v1004_v37, %v1004_v37  ;;  %v1788_v43 = vpack.c.bf16 %v1004_v37, %v1002_v29 }
 0x119   : > { %v1270_v44 = vadd.f32 %v1269_v38, %v1214_v13 }
 0x11a   : > { %v1307_v45 = vadd.f32 %v1306_v40, %v1215_v42  ;;  %1552 = vst [vmem:[%s2307_s9 + $0x38] sm:$0xff] %v1788_v43  ;;  %v638_v46 = vpop.f32.mrb[16].mxu1  ;;  %v1007_v47 = vpop.f32.mrb[16].mxu0 }
 0x11b   : > { %v1008_v48 = vadd.f32 %v1007_v47, %v638_v46  ;;  %v640_v50 = vpop.f32.mrb[17].mxu1  ;;  %v1009_v51 = vpop.f32.mrb[17].mxu0 }
 0x11c   : > { %v1010_v52 = vadd.f32 %v1009_v51, %v640_v50  ;;  %v642_v53 = vpop.f32.mrb[18].mxu1  ;;  %v1011_v55 = vpop.f32.mrb[18].mxu0 }
 0x11d   : > { %v1133_v56 = vadd.f32 %v1132_v12, %v1008_v48  ;;  %v1216_v57 = vmul.f32 %v1008_v48, %v1008_v48  ;;  %v1012_v58 = vadd.f32 %v1011_v55, %v642_v53  ;;  %v644_v59 = vpop.f32.mrb[19].mxu1  ;;  %v1013_v60 = vpop.f32.mrb[19].mxu0 }
 0x11e   : > { %v1170_v61 = vadd.f32 %v1169_v41, %v1010_v52  ;;  %v1217_v62 = vmul.f32 %v1010_v52, %v1010_v52  ;;  %v1789_v63 = vpack.c.bf16 %v1010_v52, %v1008_v48  ;;  %v1014_v0 = vadd.f32 %v1013_v60, %v644_v59 }
 0x11f   : > { %v1271_v1 = vadd.f32 %v1270_v44, %v1216_v57  ;;  %v1134_v30 = vadd.f32 %v1133_v56, %v1012_v58  ;;  %v1218_v3 = vmul.f32 %v1012_v58, %v1012_v58 }
 0x120   : > { %v1308_v31 = vadd.f32 %v1307_v45, %v1217_v62  ;;  %1553 = vst [vmem:[%s2307_s9 + $0x40] sm:$0xff] %v1789_v63  ;;  %v1171_v4 = vadd.f32 %v1170_v61, %v1014_v0  ;;  %v1219_v5 = vmul.f32 %v1014_v0, %v1014_v0  ;;  %v1790_v39 = vpack.c.bf16 %v1014_v0, %v1012_v58 }
 0x121   : > { %v1272_v49 = vadd.f32 %v1271_v1, %v1218_v3 }
 0x122   : > { %v1309_v54 = vadd.f32 %v1308_v31, %v1219_v5  ;;  %1554 = vst [vmem:[%s2307_s9 + $0x48] sm:$0xff] %v1790_v39  ;;  %v648_v6 = vpop.f32.mrb[20].mxu1  ;;  %v1017_v7 = vpop.f32.mrb[20].mxu0 }
 0x123   : > { %v1018_v8 = vadd.f32 %v1017_v7, %v648_v6  ;;  %v650_v9 = vpop.f32.mrb[21].mxu1  ;;  %v1019_v10 = vpop.f32.mrb[21].mxu0 }
 0x124   : > { %v1020_v14 = vadd.f32 %v1019_v10, %v650_v9  ;;  %v652_v15 = vpop.f32.mrb[22].mxu1  ;;  %v1021_v16 = vpop.f32.mrb[22].mxu0 }
 0x125   : > { %v1135_v17 = vadd.f32 %v1134_v30, %v1018_v8  ;;  %v1220_v18 = vmul.f32 %v1018_v8, %v1018_v8  ;;  %v1022_v2 = vadd.f32 %v1021_v16, %v652_v15  ;;  %v654_v19 = vpop.f32.mrb[23].mxu1  ;;  %v1023_v20 = vpop.f32.mrb[23].mxu0 }
 0x126   : > { %v1172_v22 = vadd.f32 %v1171_v4, %v1020_v14  ;;  %v1221_v23 = vmul.f32 %v1020_v14, %v1020_v14  ;;  %v1791_v24 = vpack.c.bf16 %v1020_v14, %v1018_v8  ;;  %v1024_v25 = vadd.f32 %v1023_v20, %v654_v19 }
 0x127   : > { %v1273_v26 = vadd.f32 %v1272_v49, %v1220_v18  ;;  %v1136_v27 = vadd.f32 %v1135_v17, %v1022_v2  ;;  %v1222_v28 = vmul.f32 %v1022_v2, %v1022_v2 }
 0x128   : > { %v1310_v11 = vadd.f32 %v1309_v54, %v1221_v23  ;;  %1555 = vst [vmem:[%s2307_s9 + $0x50] sm:$0xff] %v1791_v24  ;;  %v1173_v21 = vadd.f32 %v1172_v22, %v1024_v25  ;;  %v1223_v29 = vmul.f32 %v1024_v25, %v1024_v25  ;;  %v1792_v32 = vpack.c.bf16 %v1024_v25, %v1022_v2 }
 0x129   : > { %v1274_v33 = vadd.f32 %v1273_v26, %v1222_v28 }
 0x12a   : > { %v1311_v34 = vadd.f32 %v1310_v11, %v1223_v29  ;;  %1556 = vst [vmem:[%s2307_s9 + $0x58] sm:$0xff] %v1792_v32  ;;  %v658_v35 = vpop.f32.mrb[24].mxu1  ;;  %v1027_v36 = vpop.f32.mrb[24].mxu0 }
 0x12b   : > { %v1028_v37 = vadd.f32 %v1027_v36, %v658_v35  ;;  %v660_v38 = vpop.f32.mrb[25].mxu1  ;;  %v1029_v12 = vpop.f32.mrb[25].mxu0 }
 0x12c   : > { %v1030_v13 = vadd.f32 %v1029_v12, %v660_v38  ;;  %v662_v40 = vpop.f32.mrb[26].mxu1  ;;  %v1031_v41 = vpop.f32.mrb[26].mxu0 }
 0x12d   : > { %v1137_v42 = vadd.f32 %v1136_v27, %v1028_v37  ;;  %v1224_v43 = vmul.f32 %v1028_v37, %v1028_v37  ;;  %v1032_v44 = vadd.f32 %v1031_v41, %v662_v40  ;;  %v664_v45 = vpop.f32.mrb[27].mxu1  ;;  %v1033_v46 = vpop.f32.mrb[27].mxu0 }
 0x12e   : > { %v1174_v47 = vadd.f32 %v1173_v21, %v1030_v13  ;;  %v1225_v48 = vmul.f32 %v1030_v13, %v1030_v13  ;;  %v1793_v50 = vpack.c.bf16 %v1030_v13, %v1028_v37  ;;  %v1034_v51 = vadd.f32 %v1033_v46, %v664_v45 }
 0x12f   : > { %v1275_v52 = vadd.f32 %v1274_v33, %v1224_v43  ;;  %v1138_v53 = vadd.f32 %v1137_v42, %v1032_v44  ;;  %v1226_v55 = vmul.f32 %v1032_v44, %v1032_v44 }
 0x130   : > { %v1312_v56 = vadd.f32 %v1311_v34, %v1225_v48  ;;  %1557 = vst [vmem:[%s2307_s9 + $0x60] sm:$0xff] %v1793_v50  ;;  %v1175_v57 = vadd.f32 %v1174_v47, %v1034_v51  ;;  %v1227_v58 = vmul.f32 %v1034_v51, %v1034_v51  ;;  %v1794_v59 = vpack.c.bf16 %v1034_v51, %v1032_v44 }
 0x131   : > { %v1276_v60 = vadd.f32 %v1275_v52, %v1226_v55 }
 0x132   : > { %v1313_v61 = vadd.f32 %v1312_v56, %v1227_v58  ;;  %1558 = vst [vmem:[%s2307_s9 + $0x68] sm:$0xff] %v1794_v59  ;;  %v668_v62 = vpop.f32.mrb[28].mxu1  ;;  %v1037_v63 = vpop.f32.mrb[28].mxu0 }
 0x133   : > { %v1038_v0 = vadd.f32 %v1037_v63, %v668_v62  ;;  %v670_v1 = vpop.f32.mrb[29].mxu1  ;;  %v1039_v30 = vpop.f32.mrb[29].mxu0 }
 0x134   : > { %v1040_v3 = vadd.f32 %v1039_v30, %v670_v1  ;;  %v672_v31 = vpop.f32.mrb[30].mxu1  ;;  %v1041_v4 = vpop.f32.mrb[30].mxu0 }
 0x135   : > { %v1139_v5 = vadd.f32 %v1138_v53, %v1038_v0  ;;  %v1228_v39 = vmul.f32 %v1038_v0, %v1038_v0  ;;  %v1042_v49 = vadd.f32 %v1041_v4, %v672_v31  ;;  %v674_v54 = vpop.f32.mrb[31].mxu1  ;;  %v1043_v6 = vpop.f32.mrb[31].mxu0 }
 0x136   : > { %v1176_v7 = vadd.f32 %v1175_v57, %v1040_v3  ;;  %v1229_v8 = vmul.f32 %v1040_v3, %v1040_v3  ;;  %v1795_v9 = vpack.c.bf16 %v1040_v3, %v1038_v0  ;;  %v1044_v10 = vadd.f32 %v1043_v6, %v674_v54 }
 0x137   : > { %v1277_v14 = vadd.f32 %v1276_v60, %v1228_v39  ;;  %v1140_v15 = vadd.f32 %v1139_v5, %v1042_v49  ;;  %v1230_v16 = vmul.f32 %v1042_v49, %v1042_v49 }
 0x138   : > { %v1314_v17 = vadd.f32 %v1313_v61, %v1229_v8  ;;  %1559 = vst [vmem:[%s2307_s9 + $0x70] sm:$0xff] %v1795_v9  ;;  %v1177_v18 = vadd.f32 %v1176_v7, %v1044_v10  ;;  %v1231_v2 = vmul.f32 %v1044_v10, %v1044_v10  ;;  %v1796_v19 = vpack.c.bf16 %v1044_v10, %v1042_v49 }
 0x139   : > { %v1278_v20 = vadd.f32 %v1277_v14, %v1230_v16 }
 0x13a   : > { %v1315_v22 = vadd.f32 %v1314_v17, %v1231_v2  ;;  %1560 = vst [vmem:[%s2307_s9 + $0x78] sm:$0xff] %v1796_v19  ;;  %v678_v23 = vpop.f32.mrb[32].mxu1  ;;  %v1047_v24 = vpop.f32.mrb[32].mxu0 }
 0x13b   : > { %v1048_v25 = vadd.f32 %v1047_v24, %v678_v23  ;;  %v680_v26 = vpop.f32.mrb[33].mxu1  ;;  %v1049_v27 = vpop.f32.mrb[33].mxu0 }
 0x13c   : > { %v1050_v28 = vadd.f32 %v1049_v27, %v680_v26  ;;  %v682_v11 = vpop.f32.mrb[34].mxu1  ;;  %v1051_v21 = vpop.f32.mrb[34].mxu0 }
 0x13d   : > { %v1141_v29 = vadd.f32 %v1140_v15, %v1048_v25  ;;  %v1232_v32 = vmul.f32 %v1048_v25, %v1048_v25  ;;  %v1052_v33 = vadd.f32 %v1051_v21, %v682_v11  ;;  %v684_v34 = vpop.f32.mrb[35].mxu1  ;;  %v1053_v35 = vpop.f32.mrb[35].mxu0 }
 0x13e   : > { %v1178_v36 = vadd.f32 %v1177_v18, %v1050_v28  ;;  %v1233_v37 = vmul.f32 %v1050_v28, %v1050_v28  ;;  %v1797_v38 = vpack.c.bf16 %v1050_v28, %v1048_v25  ;;  %v1054_v12 = vadd.f32 %v1053_v35, %v684_v34 }
 0x13f   : > { %v1279_v13 = vadd.f32 %v1278_v20, %v1232_v32  ;;  %v1142_v40 = vadd.f32 %v1141_v29, %v1052_v33  ;;  %v1234_v41 = vmul.f32 %v1052_v33, %v1052_v33 }
 0x140   : > { %v1316_v42 = vadd.f32 %v1315_v22, %v1233_v37  ;;  %1561 = vst [vmem:[%s2307_s9 + $0x80] sm:$0xff] %v1797_v38  ;;  %v1179_v43 = vadd.f32 %v1178_v36, %v1054_v12  ;;  %v1235_v44 = vmul.f32 %v1054_v12, %v1054_v12  ;;  %v1798_v45 = vpack.c.bf16 %v1054_v12, %v1052_v33 }
 0x141   : > { %v1280_v46 = vadd.f32 %v1279_v13, %v1234_v41 }
 0x142   : > { %v1317_v47 = vadd.f32 %v1316_v42, %v1235_v44  ;;  %1562 = vst [vmem:[%s2307_s9 + $0x88] sm:$0xff] %v1798_v45  ;;  %v688_v48 = vpop.f32.mrb[36].mxu1  ;;  %v1057_v50 = vpop.f32.mrb[36].mxu0 }
 0x143   : > { %v1058_v51 = vadd.f32 %v1057_v50, %v688_v48  ;;  %v690_v52 = vpop.f32.mrb[37].mxu1  ;;  %v1059_v53 = vpop.f32.mrb[37].mxu0 }
 0x144   : > { %v1060_v55 = vadd.f32 %v1059_v53, %v690_v52  ;;  %v692_v56 = vpop.f32.mrb[38].mxu1  ;;  %v1061_v57 = vpop.f32.mrb[38].mxu0 }
 0x145   : > { %v1143_v58 = vadd.f32 %v1142_v40, %v1058_v51  ;;  %v1236_v59 = vmul.f32 %v1058_v51, %v1058_v51  ;;  %v1062_v60 = vadd.f32 %v1061_v57, %v692_v56  ;;  %v694_v61 = vpop.f32.mrb[39].mxu1  ;;  %v1063_v62 = vpop.f32.mrb[39].mxu0 }
 0x146   : > { %v1180_v63 = vadd.f32 %v1179_v43, %v1060_v55  ;;  %v1237_v0 = vmul.f32 %v1060_v55, %v1060_v55  ;;  %v1799_v1 = vpack.c.bf16 %v1060_v55, %v1058_v51  ;;  %v1064_v30 = vadd.f32 %v1063_v62, %v694_v61 }
 0x147   : > { %v1281_v3 = vadd.f32 %v1280_v46, %v1236_v59  ;;  %v1144_v31 = vadd.f32 %v1143_v58, %v1062_v60  ;;  %v1238_v4 = vmul.f32 %v1062_v60, %v1062_v60 }
 0x148   : > { %v1318_v5 = vadd.f32 %v1317_v47, %v1237_v0  ;;  %1563 = vst [vmem:[%s2307_s9 + $0x90] sm:$0xff] %v1799_v1  ;;  %v1181_v39 = vadd.f32 %v1180_v63, %v1064_v30  ;;  %v1239_v49 = vmul.f32 %v1064_v30, %v1064_v30  ;;  %v1800_v54 = vpack.c.bf16 %v1064_v30, %v1062_v60 }
 0x149   : > { %v1282_v6 = vadd.f32 %v1281_v3, %v1238_v4 }
 0x14a   : > { %v1319_v7 = vadd.f32 %v1318_v5, %v1239_v49  ;;  %1564 = vst [vmem:[%s2307_s9 + $0x98] sm:$0xff] %v1800_v54  ;;  %v698_v8 = vpop.f32.mrb[40].mxu1  ;;  %v1067_v9 = vpop.f32.mrb[40].mxu0 }
 0x14b   : > { %v1068_v10 = vadd.f32 %v1067_v9, %v698_v8  ;;  %v700_v14 = vpop.f32.mrb[41].mxu1  ;;  %v1069_v15 = vpop.f32.mrb[41].mxu0 }
 0x14c   : > { %v1070_v16 = vadd.f32 %v1069_v15, %v700_v14  ;;  %v702_v17 = vpop.f32.mrb[42].mxu1  ;;  %v1071_v18 = vpop.f32.mrb[42].mxu0 }
 0x14d   : > { %v1145_v2 = vadd.f32 %v1144_v31, %v1068_v10  ;;  %v1240_v19 = vmul.f32 %v1068_v10, %v1068_v10  ;;  %v1072_v20 = vadd.f32 %v1071_v18, %v702_v17  ;;  %v704_v22 = vpop.f32.mrb[43].mxu1  ;;  %v1073_v23 = vpop.f32.mrb[43].mxu0 }
 0x14e   : > { %v1182_v24 = vadd.f32 %v1181_v39, %v1070_v16  ;;  %v1241_v25 = vmul.f32 %v1070_v16, %v1070_v16  ;;  %v1801_v26 = vpack.c.bf16 %v1070_v16, %v1068_v10  ;;  %v1074_v27 = vadd.f32 %v1073_v23, %v704_v22 }
 0x14f   : > { %v1283_v28 = vadd.f32 %v1282_v6, %v1240_v19  ;;  %v1146_v11 = vadd.f32 %v1145_v2, %v1072_v20  ;;  %v1242_v21 = vmul.f32 %v1072_v20, %v1072_v20 }
 0x150   : > { %v1320_v29 = vadd.f32 %v1319_v7, %v1241_v25  ;;  %1565 = vst [vmem:[%s2307_s9 + $0xa0] sm:$0xff] %v1801_v26  ;;  %v1183_v32 = vadd.f32 %v1182_v24, %v1074_v27  ;;  %v1243_v33 = vmul.f32 %v1074_v27, %v1074_v27  ;;  %v1802_v34 = vpack.c.bf16 %v1074_v27, %v1072_v20 }
 0x151   : > { %v1284_v35 = vadd.f32 %v1283_v28, %v1242_v21 }
 0x152   : > { %v1321_v36 = vadd.f32 %v1320_v29, %v1243_v33  ;;  %1566 = vst [vmem:[%s2307_s9 + $0xa8] sm:$0xff] %v1802_v34  ;;  %v708_v37 = vpop.f32.mrb[44].mxu1  ;;  %v1077_v38 = vpop.f32.mrb[44].mxu0 }
 0x153   : > { %v1078_v12 = vadd.f32 %v1077_v38, %v708_v37  ;;  %v710_v13 = vpop.f32.mrb[45].mxu1  ;;  %v1079_v40 = vpop.f32.mrb[45].mxu0 }
 0x154   : > { %v1080_v41 = vadd.f32 %v1079_v40, %v710_v13  ;;  %v712_v42 = vpop.f32.mrb[46].mxu1  ;;  %v1081_v43 = vpop.f32.mrb[46].mxu0 }
 0x155   : > { %v1147_v44 = vadd.f32 %v1146_v11, %v1078_v12  ;;  %v1244_v45 = vmul.f32 %v1078_v12, %v1078_v12  ;;  %v1082_v46 = vadd.f32 %v1081_v43, %v712_v42  ;;  %v714_v47 = vpop.f32.mrb[47].mxu1  ;;  %v1083_v48 = vpop.f32.mrb[47].mxu0 }
 0x156   : > { %v1184_v50 = vadd.f32 %v1183_v32, %v1080_v41  ;;  %v1245_v51 = vmul.f32 %v1080_v41, %v1080_v41  ;;  %v1803_v52 = vpack.c.bf16 %v1080_v41, %v1078_v12  ;;  %v1084_v53 = vadd.f32 %v1083_v48, %v714_v47 }
 0x157   : > { %v1285_v55 = vadd.f32 %v1284_v35, %v1244_v45  ;;  %v1148_v56 = vadd.f32 %v1147_v44, %v1082_v46  ;;  %v1246_v57 = vmul.f32 %v1082_v46, %v1082_v46 }
 0x158   : > { %v1322_v58 = vadd.f32 %v1321_v36, %v1245_v51  ;;  %1567 = vst [vmem:[%s2307_s9 + $0xb0] sm:$0xff] %v1803_v52  ;;  %v1185_v59 = vadd.f32 %v1184_v50, %v1084_v53  ;;  %v1247_v60 = vmul.f32 %v1084_v53, %v1084_v53  ;;  %v1804_v61 = vpack.c.bf16 %v1084_v53, %v1082_v46 }
 0x159   : > { %v1286_v62 = vadd.f32 %v1285_v55, %v1246_v57 }
 0x15a   : > { %v1323_v63 = vadd.f32 %v1322_v58, %v1247_v60  ;;  %1568 = vst [vmem:[%s2307_s9 + $0xb8] sm:$0xff] %v1804_v61  ;;  %v718_v0 = vpop.f32.mrb[48].mxu1  ;;  %v1087_v1 = vpop.f32.mrb[48].mxu0 }
 0x15b   : > { %v1088_v30 = vadd.f32 %v1087_v1, %v718_v0  ;;  %v720_v3 = vpop.f32.mrb[49].mxu1  ;;  %v1089_v31 = vpop.f32.mrb[49].mxu0 }
 0x15c   : > { %v1090_v4 = vadd.f32 %v1089_v31, %v720_v3  ;;  %v722_v5 = vpop.f32.mrb[50].mxu1  ;;  %v1091_v39 = vpop.f32.mrb[50].mxu0 }
 0x15d   : > { %v1149_v49 = vadd.f32 %v1148_v56, %v1088_v30  ;;  %v1248_v54 = vmul.f32 %v1088_v30, %v1088_v30  ;;  %v1092_v6 = vadd.f32 %v1091_v39, %v722_v5  ;;  %v724_v7 = vpop.f32.mrb[51].mxu1  ;;  %v1093_v8 = vpop.f32.mrb[51].mxu0 }
 0x15e   : > { %v1186_v9 = vadd.f32 %v1185_v59, %v1090_v4  ;;  %v1249_v10 = vmul.f32 %v1090_v4, %v1090_v4  ;;  %v1805_v14 = vpack.c.bf16 %v1090_v4, %v1088_v30  ;;  %v1094_v15 = vadd.f32 %v1093_v8, %v724_v7 }
 0x15f   : > { %v1287_v16 = vadd.f32 %v1286_v62, %v1248_v54  ;;  %v1150_v17 = vadd.f32 %v1149_v49, %v1092_v6  ;;  %v1250_v18 = vmul.f32 %v1092_v6, %v1092_v6 }
 0x160   : > { %v1324_v2 = vadd.f32 %v1323_v63, %v1249_v10  ;;  %1569 = vst [vmem:[%s2307_s9 + $0xc0] sm:$0xff] %v1805_v14  ;;  %v1187_v19 = vadd.f32 %v1186_v9, %v1094_v15  ;;  %v1251_v20 = vmul.f32 %v1094_v15, %v1094_v15  ;;  %v1806_v22 = vpack.c.bf16 %v1094_v15, %v1092_v6 }
 0x161   : > { %v1288_v23 = vadd.f32 %v1287_v16, %v1250_v18 }
 0x162   : > { %v1325_v24 = vadd.f32 %v1324_v2, %v1251_v20  ;;  %1570 = vst [vmem:[%s2307_s9 + $0xc8] sm:$0xff] %v1806_v22  ;;  %v728_v25 = vpop.f32.mrb[52].mxu1  ;;  %v1097_v26 = vpop.f32.mrb[52].mxu0 }
 0x163   : > { %v1098_v27 = vadd.f32 %v1097_v26, %v728_v25  ;;  %v730_v28 = vpop.f32.mrb[53].mxu1  ;;  %v1099_v11 = vpop.f32.mrb[53].mxu0 }
 0x164   : > { %v1100_v21 = vadd.f32 %v1099_v11, %v730_v28  ;;  %v732_v29 = vpop.f32.mrb[54].mxu1  ;;  %v1101_v32 = vpop.f32.mrb[54].mxu0 }
 0x165   : > { %v1151_v33 = vadd.f32 %v1150_v17, %v1098_v27  ;;  %v1252_v34 = vmul.f32 %v1098_v27, %v1098_v27  ;;  %v1102_v35 = vadd.f32 %v1101_v32, %v732_v29  ;;  %v734_v36 = vpop.f32.mrb[55].mxu1  ;;  %v1103_v37 = vpop.f32.mrb[55].mxu0 }
 0x166   : > { %v1188_v38 = vadd.f32 %v1187_v19, %v1100_v21  ;;  %v1253_v12 = vmul.f32 %v1100_v21, %v1100_v21  ;;  %v1807_v13 = vpack.c.bf16 %v1100_v21, %v1098_v27  ;;  %v1104_v40 = vadd.f32 %v1103_v37, %v734_v36 }
 0x167   : > { %v1289_v41 = vadd.f32 %v1288_v23, %v1252_v34  ;;  %v1152_v42 = vadd.f32 %v1151_v33, %v1102_v35  ;;  %v1254_v43 = vmul.f32 %v1102_v35, %v1102_v35 }
 0x168   : > { %v1326_v44 = vadd.f32 %v1325_v24, %v1253_v12  ;;  %1571 = vst [vmem:[%s2307_s9 + $0xd0] sm:$0xff] %v1807_v13  ;;  %v1189_v45 = vadd.f32 %v1188_v38, %v1104_v40  ;;  %v1255_v46 = vmul.f32 %v1104_v40, %v1104_v40  ;;  %v1808_v47 = vpack.c.bf16 %v1104_v40, %v1102_v35 }
 0x169   : > { %v1290_v48 = vadd.f32 %v1289_v41, %v1254_v43 }
 0x16a   : > { %v1327_v50 = vadd.f32 %v1326_v44, %v1255_v46  ;;  %1572 = vst [vmem:[%s2307_s9 + $0xd8] sm:$0xff] %v1808_v47  ;;  %v738_v51 = vpop.f32.mrb[56].mxu1  ;;  %v1107_v52 = vpop.f32.mrb[56].mxu0 }
 0x16b   : > { %v1108_v53 = vadd.f32 %v1107_v52, %v738_v51  ;;  %v740_v55 = vpop.f32.mrb[57].mxu1  ;;  %v1109_v56 = vpop.f32.mrb[57].mxu0 }
 0x16c   : > { %v1110_v57 = vadd.f32 %v1109_v56, %v740_v55  ;;  %v742_v58 = vpop.f32.mrb[58].mxu1  ;;  %v1111_v59 = vpop.f32.mrb[58].mxu0 }
 0x16d   : > { %v1153_v60 = vadd.f32 %v1152_v42, %v1108_v53  ;;  %v1256_v61 = vmul.f32 %v1108_v53, %v1108_v53  ;;  %v1112_v62 = vadd.f32 %v1111_v59, %v742_v58  ;;  %v744_v63 = vpop.f32.mrb[59].mxu1  ;;  %v1113_v0 = vpop.f32.mrb[59].mxu0 }
 0x16e   : > { %v1190_v1 = vadd.f32 %v1189_v45, %v1110_v57  ;;  %v1257_v30 = vmul.f32 %v1110_v57, %v1110_v57  ;;  %v1809_v3 = vpack.c.bf16 %v1110_v57, %v1108_v53  ;;  %v1114_v31 = vadd.f32 %v1113_v0, %v744_v63 }
 0x16f   : > { %v1291_v4 = vadd.f32 %v1290_v48, %v1256_v61  ;;  %v1154_v5 = vadd.f32 %v1153_v60, %v1112_v62  ;;  %v1258_v39 = vmul.f32 %v1112_v62, %v1112_v62 }
 0x170   : > { %v1328_v49 = vadd.f32 %v1327_v50, %v1257_v30  ;;  %1573 = vst [vmem:[%s2307_s9 + $0xe0] sm:$0xff] %v1809_v3  ;;  %v1191_v54 = vadd.f32 %v1190_v1, %v1114_v31  ;;  %v1259_v6 = vmul.f32 %v1114_v31, %v1114_v31  ;;  %v1810_v7 = vpack.c.bf16 %v1114_v31, %v1112_v62 }
 0x171   : > { %v1292_v8 = vadd.f32 %v1291_v4, %v1258_v39 }
 0x172   : > { %v1329_v9 = vadd.f32 %v1328_v49, %v1259_v6  ;;  %1574 = vst [vmem:[%s2307_s9 + $0xe8] sm:$0xff] %v1810_v7  ;;  %v748_v10 = vpop.f32.mrb[60].mxu1  ;;  %v1117_v14 = vpop.f32.mrb[60].mxu0 }
 0x173   : > { %v1118_v15 = vadd.f32 %v1117_v14, %v748_v10  ;;  %v750_v16 = vpop.f32.mrb[61].mxu1  ;;  %v1119_v17 = vpop.f32.mrb[61].mxu0 }
 0x174   : > { %v1120_v18 = vadd.f32 %v1119_v17, %v750_v16  ;;  %v752_v2 = vpop.f32.mrb[62].mxu1  ;;  %v1121_v19 = vpop.f32.mrb[62].mxu0 }
 0x175   : > { %v1155_v20 = vadd.f32 %v1154_v5, %v1118_v15  ;;  %v1260_v22 = vmul.f32 %v1118_v15, %v1118_v15  ;;  %v1122_v23 = vadd.f32 %v1121_v19, %v752_v2  ;;  %v754_v24 = vpop.f32.mrb[63].mxu1  ;;  %v1123_v25 = vpop.f32.mrb[63].mxu0 }
 0x176   : > { %v1192_v26 = vadd.f32 %v1191_v54, %v1120_v18  ;;  %v1261_v27 = vmul.f32 %v1120_v18, %v1120_v18  ;;  %v1811_v28 = vpack.c.bf16 %v1120_v18, %v1118_v15  ;;  %v1124_v11 = vadd.f32 %v1123_v25, %v754_v24 }
 0x177   : > { %v1293_v21 = vadd.f32 %v1292_v8, %v1260_v22  ;;  %v1156_v29 = vadd.f32 %v1155_v20, %v1122_v23  ;;  %v1262_v32 = vmul.f32 %v1122_v23, %v1122_v23 }
 0x178   : > { %v1330_v33 = vadd.f32 %v1329_v9, %v1261_v27  ;;  %1575 = vst [vmem:[%s2307_s9 + $0xf0] sm:$0xff] %v1811_v28  ;;  %v1193_v34 = vadd.f32 %v1192_v26, %v1124_v11  ;;  %v1263_v35 = vmul.f32 %v1124_v11, %v1124_v11  ;;  %v1812_v36 = vpack.c.bf16 %v1124_v11, %v1122_v23 }
 0x179   : > { %v1157_v37 = vrot.slane %v1156_v29, 4  ;;  %v1294_v38 = vadd.f32 %v1293_v21, %v1262_v32 }
 0x17a   : > { %v1194_v12 = vrot.slane %v1193_v34, 4  ;;  %v1331_v13 = vadd.f32 %v1330_v33, %v1263_v35  ;;  %1576 = vst [vmem:[%s2307_s9 + $0xf8] sm:$0xff] %v1812_v36 }
 0x17b   : > { %v1158_v40 = vadd.f32 %v1157_v37, %v1156_v29  ;;  %v1295_v41 = vrot.slane %v1294_v38, 4 }
 0x17c   : > { %v1195_v42 = vadd.f32 %v1194_v12, %v1193_v34  ;;  %v1332_v43 = vrot.slane %v1331_v13, 4 }
 0x17d   : > { %v1159_v44 = vrot.slane %v1158_v40, 2  ;;  %v1296_v45 = vadd.f32 %v1295_v41, %v1294_v38 }
 0x17e   : > { %v1196_v46 = vrot.slane %v1195_v42, 2  ;;  %v1333_v47 = vadd.f32 %v1332_v43, %v1331_v13 }
 0x17f   : > { %v1160_v48 = vadd.f32 %v1159_v44, %v1158_v40  ;;  %v1297_v50 = vrot.slane %v1296_v45, 2 }
 0x180   : > { %v1197_v51 = vadd.f32 %v1196_v46, %v1195_v42  ;;  %v1334_v52 = vrot.slane %v1333_v47, 2 }
 0x181   : > { %v1161_v53 = vrot.slane %v1160_v48, 1  ;;  %v1298_v55 = vadd.f32 %v1297_v50, %v1296_v45 }
 0x182   : > { %v1198_v56 = vrot.slane %v1197_v51, 1  ;;  %v1335_v57 = vadd.f32 %v1334_v52, %v1333_v47 }
 0x183   : > { %v1299_v58 = vrot.slane %v1298_v55, 1  ;;  %v1162_v60 = vadd.f32 %v1161_v53, %v1160_v48 }
 0x184   : > { %v1336_v59 = vrot.slane %v1335_v57, 1  ;;  %v1199_v62 = vadd.f32 %v1198_v56, %v1197_v51 }
 0x185   : > { %v1300_v61 = vadd.f32 %v1299_v58, %v1298_v55 }
 0x186   : > { %v1337_v63 = vadd.f32 %v1336_v59, %v1335_v57 }
 0x187   : > { %v1339_v0 = vsel %vm1338_vm0, %v1162_v60, %v1300_v61 }
 0x188   : > { %v1340_v1 = vsel %vm1338_vm0, %v1199_v62, %v1337_v63 }
 0x189   : > { %v1343_v30 = vcombine.low %v1339_v0, %v1340_v1 }
 0x18b   : > { %1744 = vst.sshfl [vmem:[%s264_s11] sm:$0x33 pattern:$0x76325410] %v1343_v30 }
 0x18c PF: > { %s16_s18 = sadd.s32 1, %s1956_s18  }
 0x18d   : > { %p13_p5 = scmp.ge.s32.totalorder %s16_s18, 6  }
 0x18f   :  { %15 = sbr.rel (!%p13_p5) target bundleno = 1 (0x1), region = 81 }

</bundles_post_ra>
